<compile_context>
chip_gen: v6e
topology: v6e:2x2x1
jax: 0.10.0
libtpu: 0.0.40
codegen_flags: <defaults>
</compile_context>

<pallas_src>
import functools

import jax
import jax.numpy as jnp
from jax.experimental import pallas as pl
from jax.experimental.pallas import tpu as pltpu

VMEM_LIMIT = 32 * 1024 * 1024   # explicit scoped-VMEM budget (safe on v5e/v6e/v7x)
LANES = 128                     # TPU lane width; channel padding target


def _round_up(x, m):
    return (x + m - 1) // m * m


# ----------------------------------------------------------------------------
# Kernel 1: tiled matmul + bias + activation  (fc, t_fc, conv-transpose layers)
# ----------------------------------------------------------------------------
def _matmul_kernel(x_ref, w_ref, b_ref, o_ref, acc_ref, *, act):
    @pl.when(pl.program_id(2) == 0)
    def _init():
        acc_ref[...] = jnp.zeros_like(acc_ref)

    acc_ref[...] += jnp.dot(x_ref[...], w_ref[...],
                            preferred_element_type=jnp.float32)

    @pl.when(pl.program_id(2) == pl.num_programs(2) - 1)
    def _epilogue():
        y = acc_ref[...] + b_ref[...]           # (tm, tn) + (1, tn)
        if act == "relu":
            y = jnp.maximum(y, 0.0)
        elif act == "sigmoid":
            y = jax.nn.sigmoid(y)
        o_ref[...] = y.astype(o_ref.dtype)


def matmul_bias_act(x, w, b, act="none", out_dtype=jnp.bfloat16):
    """y = act(x @ w + b).  x:(M,K) w:(K,N) b:(N,).  bf16 operands, f32 accum."""
    M, K = x.shape
    K2, N = w.shape
    assert K == K2 and b.shape == (N,)
    tm = min(256, _round_up(M, 8))
    tn = min(256, _round_up(N, LANES))
    tk = min(512, _round_up(K, LANES))
    Mp, Np, Kp = _round_up(M, tm), _round_up(N, tn), _round_up(K, tk)

    xp = jnp.pad(x, ((0, Mp - M), (0, Kp - K))).astype(jnp.bfloat16)
    wp = jnp.pad(w, ((0, Kp - K), (0, Np - N))).astype(jnp.bfloat16)
    bp = jnp.pad(b.astype(jnp.float32), (0, Np - N)).reshape(1, Np)

    grid = (Mp // tm, Np // tn, Kp // tk)
    out = pl.pallas_call(
        functools.partial(_matmul_kernel, act=act),
        out_shape=jax.ShapeDtypeStruct((Mp, Np), out_dtype),
        grid=grid,
        in_specs=[
            pl.BlockSpec((tm, tk), lambda i, j, k: (i, k)),
            pl.BlockSpec((tk, tn), lambda i, j, k: (k, j)),
            pl.BlockSpec((1, tn), lambda i, j, k: (0, j)),
        ],
        out_specs=pl.BlockSpec((tm, tn), lambda i, j, k: (i, j)),
        scratch_shapes=[pltpu.VMEM((tm, tn), jnp.float32)],
        compiler_params=pltpu.CompilerParams(
            dimension_semantics=("parallel", "parallel", "arbitrary"),
            vmem_limit_bytes=VMEM_LIMIT),
        cost_estimate=pl.CostEstimate(
            flops=2 * Mp * Np * Kp,
            transcendentals=Mp * Np if act == "sigmoid" else 0,
            bytes_accessed=(Mp * Kp + Kp * Np) * 2 + Np * 4
                           + Mp * Np * jnp.dtype(out_dtype).itemsize),
    )(xp, wp, bp)
    return out[:M, :N]


# ----------------------------------------------------------------------------
# Kernel 2: fused 3x3 conv + MaxPool(p,p) + bias + ReLU, channels-last
# ----------------------------------------------------------------------------
def _conv_pool_kernel(x_ref, w_ref, b_ref, o_ref, *, H, p, Wc, Wp):
    """One image: 3x3 same-conv -> MaxPool(p,p) -> +bias -> ReLU.

    x_ref: (1, p, 2, (H+2)*Wc, Cin)  parity-split, pre-shifted, zero-padded input
    w_ref: (9, Cin, Cp)              taps ordered (ky, kx); channels padded to Cp
    b_ref: (1, Cp)
    o_ref: (1, H//p, Wp, Cp)
    Bias/ReLU are applied after the max-pool (both commute with max).
    """
    Hp = H // p
    L = H * Wc
    m = None
    for j in range(p):                      # column position inside the pool window
        acc = None
        for ky in range(3):
            for kx in range(3):
                r = (j + kx) % p            # parity plane holding this tap
                s = (j + kx) // p           # 0/1: pre-shifted copy (keeps loads aligned)
                lhs = x_ref[0, r, s, pl.ds(ky * Wc, L), :]          # (L, Cin)
                d = jnp.dot(lhs, w_ref[3 * ky + kx],
                            preferred_element_type=jnp.float32)     # (L, Cp) f32
                acc = d if acc is None else acc + d
        m = acc if m is None else jnp.maximum(m, acc)               # max-pool along W
    cp = m.shape[-1]
    y = m.reshape(H, Wc, cp)[:, :Wp, :]                             # drop wrap-around junk
    y = y.reshape(Hp, p, Wp, cp).max(axis=1)                        # max-pool along H
    y = jnp.maximum(y + b_ref[...], 0.0)                            # bias + ReLU
    o_ref[0] = y.astype(o_ref.dtype)


def conv3x3_relu_maxpool(x_nhwc, w, b, p):
    """nn.Conv2d(Cin, Cout, 3, padding=1) -> ReLU -> nn.MaxPool2d(p, p), NHWC.

    x_nhwc: (N, H, W, Cx) with Cx >= w.shape[1]; any extra channels must be zero.
    w: (Cout, Cin, 3, 3) (PyTorch layout), b: (Cout,)
    returns (N, H//p, W//p, 128) bf16 with output channels zero-padded to 128.
    """
    N, H, W, Cx = x_nhwc.shape
    Cout, Cin = w.shape[0], w.shape[1]
    assert H % p == 0 and W % p == 0
    Hp, Wp = H // p, W // p
    Wc = _round_up(Wp + 1, 16)           # parity-plane width (sublane/bf16 aligned)
    Lfull = (H + 2) * Wc
    Cp = LANES

    # zero-pad: 1 px conv halo + extra width so the padded width is exactly p*Wc
    xpad = jnp.pad(x_nhwc, ((0, 0), (1, 1), (1, p * Wc - (W + 1)), (0, 0)))
    # parity split along W: padded column w -> plane (w % p), plane-column (w // p)
    base = xpad.reshape(N, H + 2, Wc, p, Cx).transpose(0, 3, 1, 2, 4)
    base = base.reshape(N, p, Lfull, Cx)
    # copy shifted by one plane column, so every in-kernel slice start is aligned
    shift = jnp.concatenate(
        [base[:, :, 1:, :], jnp.zeros_like(base[:, :, :1, :])], axis=2)
    planes = jnp.stack([base, shift], axis=2).astype(jnp.bfloat16)  # (N,p,2,Lfull,Cx)

    # weights as (9, Cx, 128): taps ordered (ky, kx); zero-pad cin and cout
    wk = jnp.transpose(w, (2, 3, 1, 0)).reshape(9, Cin, Cout)
    wk = jnp.pad(wk, ((0, 0), (0, Cx - Cin), (0, Cp - Cout))).astype(jnp.bfloat16)
    bk = jnp.pad(b.astype(jnp.float32), (0, Cp - Cout)).reshape(1, Cp)

    out = pl.pallas_call(
        functools.partial(_conv_pool_kernel, H=H, p=p, Wc=Wc, Wp=Wp),
        out_shape=jax.ShapeDtypeStruct((N, Hp, Wp, Cp), jnp.bfloat16),
        grid=(N,),
        in_specs=[
            pl.BlockSpec((1, p, 2, Lfull, Cx), lambda n: (n, 0, 0, 0, 0)),
            pl.BlockSpec((9, Cx, Cp), lambda n: (0, 0, 0)),
            pl.BlockSpec((1, Cp), lambda n: (0, 0)),
        ],
        out_specs=pl.BlockSpec((1, Hp, Wp, Cp), lambda n: (n, 0, 0, 0)),
        compiler_params=pltpu.CompilerParams(
            dimension_semantics=("parallel",),
            vmem_limit_bytes=VMEM_LIMIT),
        cost_estimate=pl.CostEstimate(
            flops=2 * N * p * 9 * (H * Wc) * Cx * Cp,
            transcendentals=0,
            bytes_accessed=planes.size * 2 + wk.size * 2 + bk.size * 4
                           + N * Hp * Wp * Cp * 2),
    )(planes, wk, bk)
    return out


# ----------------------------------------------------------------------------
# Layer wrappers / forward (glue: layout plumbing only)
# ----------------------------------------------------------------------------
def conv_transpose_k_eq_s(x_nhwc, w, b, p, act, out_dtype=jnp.bfloat16):
    """nn.ConvTranspose2d(Cin, Cout, p, stride=p) on NHWC input.  w:(Cin,Cout,p,p).

    kernel_size == stride => disjoint output blocks => one matmul:
    (N*H*W, Cin) @ (Cin, Cout*p*p), column order co*p*p + i*p + j.
    """
    N, H, W, Cin = x_nhwc.shape
    Cout = w.shape[1]
    xm = x_nhwc.reshape(N * H * W, Cin)
    wm = w.reshape(Cin, Cout * p * p)
    bm = jnp.repeat(b, p * p)
    y = matmul_bias_act(xm, wm, bm, act=act, out_dtype=out_dtype)
    y = y.reshape(N, H, W, Cout, p, p).transpose(0, 1, 4, 2, 5, 3)
    return y.reshape(N, H * p, W * p, Cout)


def init_params(key, in_dim, pools, filters1, filters2, z_dim):
    fc_dim = int((in_dim / pools ** 2) ** 2 * filters2)
    ks = jax.random.split(key, 12)

    def u(k, shape, fan_in):
        lim = 1.0 / float(fan_in) ** 0.5
        return jax.random.uniform(k, shape, jnp.float32, -lim, lim)

    return {
        "conv1_w": u(ks[0], (filters1, 3, 3, 3), 3 * 9),
        "conv1_b": u(ks[1], (filters1,), 3 * 9),
        "conv2_w": u(ks[2], (filters2, filters1, 3, 3), filters1 * 9),
        "conv2_b": u(ks[3], (filters2,), filters1 * 9),
        "fc_w": u(ks[4], (z_dim, fc_dim), fc_dim),
        "fc_b": u(ks[5], (z_dim,), fc_dim),
        "t_fc_w": u(ks[6], (fc_dim, z_dim), z_dim),
        "t_fc_b": u(ks[7], (fc_dim,), z_dim),
        "t_conv1_w": u(ks[8], (filters2, filters1, pools, pools), filters2 * pools * pools),
        "t_conv1_b": u(ks[9], (filters1,), filters2 * pools * pools),
        "t_conv2_w": u(ks[10], (filters1, 3, pools, pools), filters1 * pools * pools),
        "t_conv2_b": u(ks[11], (3,), filters1 * pools * pools),
    }


def conv_autoencoder_forward(params, x, pools):
    N = x.shape[0]
    f2 = params["conv2_b"].shape[0]

    x = jnp.transpose(x, (0, 2, 3, 1))        # NCHW -> NHWC (boundary only)

    # encoder: two fused conv + ReLU + maxpool kernels (channels padded to 128)
    x = conv3x3_relu_maxpool(x, params["conv1_w"], params["conv1_b"], pools)
    x = conv3x3_relu_maxpool(x, params["conv2_w"], params["conv2_b"], pools)

    side = x.shape[1]
    # Flatten in PyTorch NCHW order so the fc weights line up
    xf = jnp.transpose(x[..., :f2], (0, 3, 1, 2)).reshape(N, f2 * side * side)
    z = matmul_bias_act(xf, params["fc_w"].T, params["fc_b"], act="relu")
    h = matmul_bias_act(z, params["t_fc_w"].T, params["t_fc_b"], act="none")

    # Unflatten back to (N, side, side, f2) channels-last
    h = h.reshape(N, f2, side, side).transpose(0, 2, 3, 1)

    # decoder: ConvTranspose2d with kernel == stride == pools (exact matmuls)
    x = conv_transpose_k_eq_s(h, params["t_conv1_w"], params["t_conv1_b"],
                              pools, act="relu")
    x = conv_transpose_k_eq_s(x, params["t_conv2_w"], params["t_conv2_b"],
                              pools, act="sigmoid", out_dtype=jnp.float32)
    return jnp.transpose(x, (0, 3, 1, 2))     # NHWC -> NCHW


if __name__ == "__main__":
    # Small deterministic config consistent with the module's constructor math:
    # fc_dim = (in_dim / pools**2)**2 * filters2 = (16/4)^2 * 4 = 64
    batch, in_dim, pools, filters1, filters2, z_dim = 2, 16, 2, 8, 4, 32

    key = jax.random.PRNGKey(0)
    k_x, k_p = jax.random.split(key)
    x = jax.random.uniform(k_x, (batch, 3, in_dim, in_dim), jnp.float32)
    params = init_params(k_p, in_dim, pools, filters1, filters2, z_dim)

    fwd = jax.jit(functools.partial(conv_autoencoder_forward, pools=pools))
    y = jax.block_until_ready(fwd(params, x))

    assert y.shape == (batch, 3, in_dim, in_dim), y.shape
    assert bool(jnp.all(jnp.isfinite(y)))
    assert bool(jnp.all((y >= 0.0) & (y <= 1.0)))  # sigmoid output range
    print("KERNEL_OK")
</pallas_src>

<mosaic_0001>
module attributes {stable_mosaic.version = 11 : i64} {
  func.func @_conv_pool_kernel(%arg0: i32, %arg1: memref<1x2x2x288x3xbf16, #tpu.memory_space<vmem>>, %arg2: memref<9x3x128xbf16, #tpu.memory_space<vmem>>, %arg3: memref<1x128xf32, #tpu.memory_space<vmem>>, %arg4: memref<1x8x8x128xbf16, #tpu.memory_space<vmem>>) attributes {dimension_semantics = [#tpu.dimension_semantics<parallel>], iteration_bounds = array<i64: 2>, scalar_prefetch = 0 : i64, scratch_operands = 0 : i64, tpu.core_type = #tpu.core_type<tc>, window_params = [{transform_indices = @transform_0, window_bounds = array<i64: 1, 2, 2, 288, 3>}, {pipeline_mode = #tpu.pipeline_mode<synchronous>, transform_indices = @transform_1, window_bounds = array<i64: 9, 3, 128>}, {pipeline_mode = #tpu.pipeline_mode<synchronous>, transform_indices = @transform_2, window_bounds = array<i64: 1, 128>}, {transform_indices = @transform_3, window_bounds = array<i64: 1, 8, 8, 128>}]} {
    %c0 = arith.constant 0 : index
    %c0_0 = arith.constant 0 : index
    %c0_1 = arith.constant 0 : index
    %c0_2 = arith.constant 0 : index
    %c0_3 = arith.constant 0 : index
    %0 = vector.load %arg1[%c0, %c0_0, %c0_1, %c0_2, %c0_3] : memref<1x2x2x288x3xbf16, #tpu.memory_space<vmem>>, vector<1x1x1x256x3xbf16>
    %1 = vector.shape_cast %0 : vector<1x1x1x256x3xbf16> to vector<256x3xbf16>
    %c0_4 = arith.constant 0 : index
    %c0_5 = arith.constant 0 : index
    %c0_6 = arith.constant 0 : index
    %2 = vector.load %arg2[%c0_4, %c0_5, %c0_6] : memref<9x3x128xbf16, #tpu.memory_space<vmem>>, vector<1x3x128xbf16>
    %3 = vector.shape_cast %2 : vector<1x3x128xbf16> to vector<3x128xbf16>
    %cst = arith.constant dense<0.000000e+00> : vector<256x128xf32>
    %4 = tpu.matmul %1, %3, %cst {dimension_numbers = #tpu.dot_dimension_numbers<[1], [0], [0], [1], [0, 0, 1, 1], [], []>} : vector<256x3xbf16>, vector<3x128xbf16>, vector<256x128xf32> -> vector<256x128xf32>
    %c0_7 = arith.constant 0 : index
    %c1 = arith.constant 1 : index
    %c0_8 = arith.constant 0 : index
    %c0_9 = arith.constant 0 : index
    %c0_10 = arith.constant 0 : index
    %5 = vector.load %arg1[%c0_7, %c1, %c0_8, %c0_9, %c0_10] : memref<1x2x2x288x3xbf16, #tpu.memory_space<vmem>>, vector<1x1x1x256x3xbf16>
    %6 = vector.shape_cast %5 : vector<1x1x1x256x3xbf16> to vector<256x3xbf16>
    %c1_11 = arith.constant 1 : index
    %c0_12 = arith.constant 0 : index
    %c0_13 = arith.constant 0 : index
    %7 = vector.load %arg2[%c1_11, %c0_12, %c0_13] : memref<9x3x128xbf16, #tpu.memory_space<vmem>>, vector<1x3x128xbf16>
    %8 = vector.shape_cast %7 : vector<1x3x128xbf16> to vector<3x128xbf16>
    %cst_14 = arith.constant dense<0.000000e+00> : vector<256x128xf32>
    %9 = tpu.matmul %6, %8, %cst_14 {dimension_numbers = #tpu.dot_dimension_numbers<[1], [0], [0], [1], [0, 0, 1, 1], [], []>} : vector<256x3xbf16>, vector<3x128xbf16>, vector<256x128xf32> -> vector<256x128xf32>
    %10 = arith.addf %4, %9 : vector<256x128xf32>
    %c0_15 = arith.constant 0 : index
    %c0_16 = arith.constant 0 : index
    %c1_17 = arith.constant 1 : index
    %c0_18 = arith.constant 0 : index
    %c0_19 = arith.constant 0 : index
    %11 = vector.load %arg1[%c0_15, %c0_16, %c1_17, %c0_18, %c0_19] : memref<1x2x2x288x3xbf16, #tpu.memory_space<vmem>>, vector<1x1x1x256x3xbf16>
    %12 = vector.shape_cast %11 : vector<1x1x1x256x3xbf16> to vector<256x3xbf16>
    %c2 = arith.constant 2 : index
    %c0_20 = arith.constant 0 : index
    %c0_21 = arith.constant 0 : index
    %13 = vector.load %arg2[%c2, %c0_20, %c0_21] : memref<9x3x128xbf16, #tpu.memory_space<vmem>>, vector<1x3x128xbf16>
    %14 = vector.shape_cast %13 : vector<1x3x128xbf16> to vector<3x128xbf16>
    %cst_22 = arith.constant dense<0.000000e+00> : vector<256x128xf32>
    %15 = tpu.matmul %12, %14, %cst_22 {dimension_numbers = #tpu.dot_dimension_numbers<[1], [0], [0], [1], [0, 0, 1, 1], [], []>} : vector<256x3xbf16>, vector<3x128xbf16>, vector<256x128xf32> -> vector<256x128xf32>
    %16 = arith.addf %10, %15 : vector<256x128xf32>
    %c0_23 = arith.constant 0 : index
    %c0_24 = arith.constant 0 : index
    %c0_25 = arith.constant 0 : index
    %c16 = arith.constant 16 : index
    %c0_26 = arith.constant 0 : index
    %17 = vector.load %arg1[%c0_23, %c0_24, %c0_25, %c16, %c0_26] : memref<1x2x2x288x3xbf16, #tpu.memory_space<vmem>>, vector<1x1x1x256x3xbf16>
    %18 = vector.shape_cast %17 : vector<1x1x1x256x3xbf16> to vector<256x3xbf16>
    %c3 = arith.constant 3 : index
    %c0_27 = arith.constant 0 : index
    %c0_28 = arith.constant 0 : index
    %19 = vector.load %arg2[%c3, %c0_27, %c0_28] : memref<9x3x128xbf16, #tpu.memory_space<vmem>>, vector<1x3x128xbf16>
    %20 = vector.shape_cast %19 : vector<1x3x128xbf16> to vector<3x128xbf16>
    %cst_29 = arith.constant dense<0.000000e+00> : vector<256x128xf32>
    %21 = tpu.matmul %18, %20, %cst_29 {dimension_numbers = #tpu.dot_dimension_numbers<[1], [0], [0], [1], [0, 0, 1, 1], [], []>} : vector<256x3xbf16>, vector<3x128xbf16>, vector<256x128xf32> -> vector<256x128xf32>
    %22 = arith.addf %16, %21 : vector<256x128xf32>
    %c0_30 = arith.constant 0 : index
    %c1_31 = arith.constant 1 : index
    %c0_32 = arith.constant 0 : index
    %c16_33 = arith.constant 16 : index
    %c0_34 = arith.constant 0 : index
    %23 = vector.load %arg1[%c0_30, %c1_31, %c0_32, %c16_33, %c0_34] : memref<1x2x2x288x3xbf16, #tpu.memory_space<vmem>>, vector<1x1x1x256x3xbf16>
    %24 = vector.shape_cast %23 : vector<1x1x1x256x3xbf16> to vector<256x3xbf16>
    %c4 = arith.constant 4 : index
    %c0_35 = arith.constant 0 : index
    %c0_36 = arith.constant 0 : index
    %25 = vector.load %arg2[%c4, %c0_35, %c0_36] : memref<9x3x128xbf16, #tpu.memory_space<vmem>>, vector<1x3x128xbf16>
    %26 = vector.shape_cast %25 : vector<1x3x128xbf16> to vector<3x128xbf16>
    %cst_37 = arith.constant dense<0.000000e+00> : vector<256x128xf32>
    %27 = tpu.matmul %24, %26, %cst_37 {dimension_numbers = #tpu.dot_dimension_numbers<[1], [0], [0], [1], [0, 0, 1, 1], [], []>} : vector<256x3xbf16>, vector<3x128xbf16>, vector<256x128xf32> -> vector<256x128xf32>
    %28 = arith.addf %22, %27 : vector<256x128xf32>
    %c0_38 = arith.constant 0 : index
    %c0_39 = arith.constant 0 : index
    %c1_40 = arith.constant 1 : index
    %c16_41 = arith.constant 16 : index
    %c0_42 = arith.constant 0 : index
    %29 = vector.load %arg1[%c0_38, %c0_39, %c1_40, %c16_41, %c0_42] : memref<1x2x2x288x3xbf16, #tpu.memory_space<vmem>>, vector<1x1x1x256x3xbf16>
    %30 = vector.shape_cast %29 : vector<1x1x1x256x3xbf16> to vector<256x3xbf16>
    %c5 = arith.constant 5 : index
    %c0_43 = arith.constant 0 : index
    %c0_44 = arith.constant 0 : index
    %31 = vector.load %arg2[%c5, %c0_43, %c0_44] : memref<9x3x128xbf16, #tpu.memory_space<vmem>>, vector<1x3x128xbf16>
    %32 = vector.shape_cast %31 : vector<1x3x128xbf16> to vector<3x128xbf16>
    %cst_45 = arith.constant dense<0.000000e+00> : vector<256x128xf32>
    %33 = tpu.matmul %30, %32, %cst_45 {dimension_numbers = #tpu.dot_dimension_numbers<[1], [0], [0], [1], [0, 0, 1, 1], [], []>} : vector<256x3xbf16>, vector<3x128xbf16>, vector<256x128xf32> -> vector<256x128xf32>
    %34 = arith.addf %28, %33 : vector<256x128xf32>
    %c0_46 = arith.constant 0 : index
    %c0_47 = arith.constant 0 : index
    %c0_48 = arith.constant 0 : index
    %c32 = arith.constant 32 : index
    %c0_49 = arith.constant 0 : index
    %35 = vector.load %arg1[%c0_46, %c0_47, %c0_48, %c32, %c0_49] : memref<1x2x2x288x3xbf16, #tpu.memory_space<vmem>>, vector<1x1x1x256x3xbf16>
    %36 = vector.shape_cast %35 : vector<1x1x1x256x3xbf16> to vector<256x3xbf16>
    %c6 = arith.constant 6 : index
    %c0_50 = arith.constant 0 : index
    %c0_51 = arith.constant 0 : index
    %37 = vector.load %arg2[%c6, %c0_50, %c0_51] : memref<9x3x128xbf16, #tpu.memory_space<vmem>>, vector<1x3x128xbf16>
    %38 = vector.shape_cast %37 : vector<1x3x128xbf16> to vector<3x128xbf16>
    %cst_52 = arith.constant dense<0.000000e+00> : vector<256x128xf32>
    %39 = tpu.matmul %36, %38, %cst_52 {dimension_numbers = #tpu.dot_dimension_numbers<[1], [0], [0], [1], [0, 0, 1, 1], [], []>} : vector<256x3xbf16>, vector<3x128xbf16>, vector<256x128xf32> -> vector<256x128xf32>
    %40 = arith.addf %34, %39 : vector<256x128xf32>
    %c0_53 = arith.constant 0 : index
    %c1_54 = arith.constant 1 : index
    %c0_55 = arith.constant 0 : index
    %c32_56 = arith.constant 32 : index
    %c0_57 = arith.constant 0 : index
    %41 = vector.load %arg1[%c0_53, %c1_54, %c0_55, %c32_56, %c0_57] : memref<1x2x2x288x3xbf16, #tpu.memory_space<vmem>>, vector<1x1x1x256x3xbf16>
    %42 = vector.shape_cast %41 : vector<1x1x1x256x3xbf16> to vector<256x3xbf16>
    %c7 = arith.constant 7 : index
    %c0_58 = arith.constant 0 : index
    %c0_59 = arith.constant 0 : index
    %43 = vector.load %arg2[%c7, %c0_58, %c0_59] : memref<9x3x128xbf16, #tpu.memory_space<vmem>>, vector<1x3x128xbf16>
    %44 = vector.shape_cast %43 : vector<1x3x128xbf16> to vector<3x128xbf16>
    %cst_60 = arith.constant dense<0.000000e+00> : vector<256x128xf32>
    %45 = tpu.matmul %42, %44, %cst_60 {dimension_numbers = #tpu.dot_dimension_numbers<[1], [0], [0], [1], [0, 0, 1, 1], [], []>} : vector<256x3xbf16>, vector<3x128xbf16>, vector<256x128xf32> -> vector<256x128xf32>
    %46 = arith.addf %40, %45 : vector<256x128xf32>
    %c0_61 = arith.constant 0 : index
    %c0_62 = arith.constant 0 : index
    %c1_63 = arith.constant 1 : index
    %c32_64 = arith.constant 32 : index
    %c0_65 = arith.constant 0 : index
    %47 = vector.load %arg1[%c0_61, %c0_62, %c1_63, %c32_64, %c0_65] : memref<1x2x2x288x3xbf16, #tpu.memory_space<vmem>>, vector<1x1x1x256x3xbf16>
    %48 = vector.shape_cast %47 : vector<1x1x1x256x3xbf16> to vector<256x3xbf16>
    %c8 = arith.constant 8 : index
    %c0_66 = arith.constant 0 : index
    %c0_67 = arith.constant 0 : index
    %49 = vector.load %arg2[%c8, %c0_66, %c0_67] : memref<9x3x128xbf16, #tpu.memory_space<vmem>>, vector<1x3x128xbf16>
    %50 = vector.shape_cast %49 : vector<1x3x128xbf16> to vector<3x128xbf16>
    %cst_68 = arith.constant dense<0.000000e+00> : vector<256x128xf32>
    %51 = tpu.matmul %48, %50, %cst_68 {dimension_numbers = #tpu.dot_dimension_numbers<[1], [0], [0], [1], [0, 0, 1, 1], [], []>} : vector<256x3xbf16>, vector<3x128xbf16>, vector<256x128xf32> -> vector<256x128xf32>
    %52 = arith.addf %46, %51 : vector<256x128xf32>
    %c0_69 = arith.constant 0 : index
    %c1_70 = arith.constant 1 : index
    %c0_71 = arith.constant 0 : index
    %c0_72 = arith.constant 0 : index
    %c0_73 = arith.constant 0 : index
    %53 = vector.load %arg1[%c0_69, %c1_70, %c0_71, %c0_72, %c0_73] : memref<1x2x2x288x3xbf16, #tpu.memory_space<vmem>>, vector<1x1x1x256x3xbf16>
    %54 = vector.shape_cast %53 : vector<1x1x1x256x3xbf16> to vector<256x3xbf16>
    %c0_74 = arith.constant 0 : index
    %c0_75 = arith.constant 0 : index
    %c0_76 = arith.constant 0 : index
    %55 = vector.load %arg2[%c0_74, %c0_75, %c0_76] : memref<9x3x128xbf16, #tpu.memory_space<vmem>>, vector<1x3x128xbf16>
    %56 = vector.shape_cast %55 : vector<1x3x128xbf16> to vector<3x128xbf16>
    %cst_77 = arith.constant dense<0.000000e+00> : vector<256x128xf32>
    %57 = tpu.matmul %54, %56, %cst_77 {dimension_numbers = #tpu.dot_dimension_numbers<[1], [0], [0], [1], [0, 0, 1, 1], [], []>} : vector<256x3xbf16>, vector<3x128xbf16>, vector<256x128xf32> -> vector<256x128xf32>
    %c0_78 = arith.constant 0 : index
    %c0_79 = arith.constant 0 : index
    %c1_80 = arith.constant 1 : index
    %c0_81 = arith.constant 0 : index
    %c0_82 = arith.constant 0 : index
    %58 = vector.load %arg1[%c0_78, %c0_79, %c1_80, %c0_81, %c0_82] : memref<1x2x2x288x3xbf16, #tpu.memory_space<vmem>>, vector<1x1x1x256x3xbf16>
    %59 = vector.shape_cast %58 : vector<1x1x1x256x3xbf16> to vector<256x3xbf16>
    %c1_83 = arith.constant 1 : index
    %c0_84 = arith.constant 0 : index
    %c0_85 = arith.constant 0 : index
    %60 = vector.load %arg2[%c1_83, %c0_84, %c0_85] : memref<9x3x128xbf16, #tpu.memory_space<vmem>>, vector<1x3x128xbf16>
    %61 = vector.shape_cast %60 : vector<1x3x128xbf16> to vector<3x128xbf16>
    %cst_86 = arith.constant dense<0.000000e+00> : vector<256x128xf32>
    %62 = tpu.matmul %59, %61, %cst_86 {dimension_numbers = #tpu.dot_dimension_numbers<[1], [0], [0], [1], [0, 0, 1, 1], [], []>} : vector<256x3xbf16>, vector<3x128xbf16>, vector<256x128xf32> -> vector<256x128xf32>
    %63 = arith.addf %57, %62 : vector<256x128xf32>
    %c0_87 = arith.constant 0 : index
    %c1_88 = arith.constant 1 : index
    %c1_89 = arith.constant 1 : index
    %c0_90 = arith.constant 0 : index
    %c0_91 = arith.constant 0 : index
    %64 = vector.load %arg1[%c0_87, %c1_88, %c1_89, %c0_90, %c0_91] : memref<1x2x2x288x3xbf16, #tpu.memory_space<vmem>>, vector<1x1x1x256x3xbf16>
    %65 = vector.shape_cast %64 : vector<1x1x1x256x3xbf16> to vector<256x3xbf16>
    %c2_92 = arith.constant 2 : index
    %c0_93 = arith.constant 0 : index
    %c0_94 = arith.constant 0 : index
    %66 = vector.load %arg2[%c2_92, %c0_93, %c0_94] : memref<9x3x128xbf16, #tpu.memory_space<vmem>>, vector<1x3x128xbf16>
    %67 = vector.shape_cast %66 : vector<1x3x128xbf16> to vector<3x128xbf16>
    %cst_95 = arith.constant dense<0.000000e+00> : vector<256x128xf32>
    %68 = tpu.matmul %65, %67, %cst_95 {dimension_numbers = #tpu.dot_dimension_numbers<[1], [0], [0], [1], [0, 0, 1, 1], [], []>} : vector<256x3xbf16>, vector<3x128xbf16>, vector<256x128xf32> -> vector<256x128xf32>
    %69 = arith.addf %63, %68 : vector<256x128xf32>
    %c0_96 = arith.constant 0 : index
    %c1_97 = arith.constant 1 : index
    %c0_98 = arith.constant 0 : index
    %c16_99 = arith.constant 16 : index
    %c0_100 = arith.constant 0 : index
    %70 = vector.load %arg1[%c0_96, %c1_97, %c0_98, %c16_99, %c0_100] : memref<1x2x2x288x3xbf16, #tpu.memory_space<vmem>>, vector<1x1x1x256x3xbf16>
    %71 = vector.shape_cast %70 : vector<1x1x1x256x3xbf16> to vector<256x3xbf16>
    %c3_101 = arith.constant 3 : index
    %c0_102 = arith.constant 0 : index
    %c0_103 = arith.constant 0 : index
    %72 = vector.load %arg2[%c3_101, %c0_102, %c0_103] : memref<9x3x128xbf16, #tpu.memory_space<vmem>>, vector<1x3x128xbf16>
    %73 = vector.shape_cast %72 : vector<1x3x128xbf16> to vector<3x128xbf16>
    %cst_104 = arith.constant dense<0.000000e+00> : vector<256x128xf32>
    %74 = tpu.matmul %71, %73, %cst_104 {dimension_numbers = #tpu.dot_dimension_numbers<[1], [0], [0], [1], [0, 0, 1, 1], [], []>} : vector<256x3xbf16>, vector<3x128xbf16>, vector<256x128xf32> -> vector<256x128xf32>
    %75 = arith.addf %69, %74 : vector<256x128xf32>
    %c0_105 = arith.constant 0 : index
    %c0_106 = arith.constant 0 : index
    %c1_107 = arith.constant 1 : index
    %c16_108 = arith.constant 16 : index
    %c0_109 = arith.constant 0 : index
    %76 = vector.load %arg1[%c0_105, %c0_106, %c1_107, %c16_108, %c0_109] : memref<1x2x2x288x3xbf16, #tpu.memory_space<vmem>>, vector<1x1x1x256x3xbf16>
    %77 = vector.shape_cast %76 : vector<1x1x1x256x3xbf16> to vector<256x3xbf16>
    %c4_110 = arith.constant 4 : index
    %c0_111 = arith.constant 0 : index
    %c0_112 = arith.constant 0 : index
    %78 = vector.load %arg2[%c4_110, %c0_111, %c0_112] : memref<9x3x128xbf16, #tpu.memory_space<vmem>>, vector<1x3x128xbf16>
    %79 = vector.shape_cast %78 : vector<1x3x128xbf16> to vector<3x128xbf16>
    %cst_113 = arith.constant dense<0.000000e+00> : vector<256x128xf32>
    %80 = tpu.matmul %77, %79, %cst_113 {dimension_numbers = #tpu.dot_dimension_numbers<[1], [0], [0], [1], [0, 0, 1, 1], [], []>} : vector<256x3xbf16>, vector<3x128xbf16>, vector<256x128xf32> -> vector<256x128xf32>
    %81 = arith.addf %75, %80 : vector<256x128xf32>
    %c0_114 = arith.constant 0 : index
    %c1_115 = arith.constant 1 : index
    %c1_116 = arith.constant 1 : index
    %c16_117 = arith.constant 16 : index
    %c0_118 = arith.constant 0 : index
    %82 = vector.load %arg1[%c0_114, %c1_115, %c1_116, %c16_117, %c0_118] : memref<1x2x2x288x3xbf16, #tpu.memory_space<vmem>>, vector<1x1x1x256x3xbf16>
    %83 = vector.shape_cast %82 : vector<1x1x1x256x3xbf16> to vector<256x3xbf16>
    %c5_119 = arith.constant 5 : index
    %c0_120 = arith.constant 0 : index
    %c0_121 = arith.constant 0 : index
    %84 = vector.load %arg2[%c5_119, %c0_120, %c0_121] : memref<9x3x128xbf16, #tpu.memory_space<vmem>>, vector<1x3x128xbf16>
    %85 = vector.shape_cast %84 : vector<1x3x128xbf16> to vector<3x128xbf16>
    %cst_122 = arith.constant dense<0.000000e+00> : vector<256x128xf32>
    %86 = tpu.matmul %83, %85, %cst_122 {dimension_numbers = #tpu.dot_dimension_numbers<[1], [0], [0], [1], [0, 0, 1, 1], [], []>} : vector<256x3xbf16>, vector<3x128xbf16>, vector<256x128xf32> -> vector<256x128xf32>
    %87 = arith.addf %81, %86 : vector<256x128xf32>
    %c0_123 = arith.constant 0 : index
    %c1_124 = arith.constant 1 : index
    %c0_125 = arith.constant 0 : index
    %c32_126 = arith.constant 32 : index
    %c0_127 = arith.constant 0 : index
    %88 = vector.load %arg1[%c0_123, %c1_124, %c0_125, %c32_126, %c0_127] : memref<1x2x2x288x3xbf16, #tpu.memory_space<vmem>>, vector<1x1x1x256x3xbf16>
    %89 = vector.shape_cast %88 : vector<1x1x1x256x3xbf16> to vector<256x3xbf16>
    %c6_128 = arith.constant 6 : index
    %c0_129 = arith.constant 0 : index
    %c0_130 = arith.constant 0 : index
    %90 = vector.load %arg2[%c6_128, %c0_129, %c0_130] : memref<9x3x128xbf16, #tpu.memory_space<vmem>>, vector<1x3x128xbf16>
    %91 = vector.shape_cast %90 : vector<1x3x128xbf16> to vector<3x128xbf16>
    %cst_131 = arith.constant dense<0.000000e+00> : vector<256x128xf32>
    %92 = tpu.matmul %89, %91, %cst_131 {dimension_numbers = #tpu.dot_dimension_numbers<[1], [0], [0], [1], [0, 0, 1, 1], [], []>} : vector<256x3xbf16>, vector<3x128xbf16>, vector<256x128xf32> -> vector<256x128xf32>
    %93 = arith.addf %87, %92 : vector<256x128xf32>
    %c0_132 = arith.constant 0 : index
    %c0_133 = arith.constant 0 : index
    %c1_134 = arith.constant 1 : index
    %c32_135 = arith.constant 32 : index
    %c0_136 = arith.constant 0 : index
    %94 = vector.load %arg1[%c0_132, %c0_133, %c1_134, %c32_135, %c0_136] : memref<1x2x2x288x3xbf16, #tpu.memory_space<vmem>>, vector<1x1x1x256x3xbf16>
    %95 = vector.shape_cast %94 : vector<1x1x1x256x3xbf16> to vector<256x3xbf16>
    %c7_137 = arith.constant 7 : index
    %c0_138 = arith.constant 0 : index
    %c0_139 = arith.constant 0 : index
    %96 = vector.load %arg2[%c7_137, %c0_138, %c0_139] : memref<9x3x128xbf16, #tpu.memory_space<vmem>>, vector<1x3x128xbf16>
    %97 = vector.shape_cast %96 : vector<1x3x128xbf16> to vector<3x128xbf16>
    %cst_140 = arith.constant dense<0.000000e+00> : vector<256x128xf32>
    %98 = tpu.matmul %95, %97, %cst_140 {dimension_numbers = #tpu.dot_dimension_numbers<[1], [0], [0], [1], [0, 0, 1, 1], [], []>} : vector<256x3xbf16>, vector<3x128xbf16>, vector<256x128xf32> -> vector<256x128xf32>
    %99 = arith.addf %93, %98 : vector<256x128xf32>
    %c0_141 = arith.constant 0 : index
    %c1_142 = arith.constant 1 : index
    %c1_143 = arith.constant 1 : index
    %c32_144 = arith.constant 32 : index
    %c0_145 = arith.constant 0 : index
    %100 = vector.load %arg1[%c0_141, %c1_142, %c1_143, %c32_144, %c0_145] : memref<1x2x2x288x3xbf16, #tpu.memory_space<vmem>>, vector<1x1x1x256x3xbf16>
    %101 = vector.shape_cast %100 : vector<1x1x1x256x3xbf16> to vector<256x3xbf16>
    %c8_146 = arith.constant 8 : index
    %c0_147 = arith.constant 0 : index
    %c0_148 = arith.constant 0 : index
    %102 = vector.load %arg2[%c8_146, %c0_147, %c0_148] : memref<9x3x128xbf16, #tpu.memory_space<vmem>>, vector<1x3x128xbf16>
    %103 = vector.shape_cast %102 : vector<1x3x128xbf16> to vector<3x128xbf16>
    %cst_149 = arith.constant dense<0.000000e+00> : vector<256x128xf32>
    %104 = tpu.matmul %101, %103, %cst_149 {dimension_numbers = #tpu.dot_dimension_numbers<[1], [0], [0], [1], [0, 0, 1, 1], [], []>} : vector<256x3xbf16>, vector<3x128xbf16>, vector<256x128xf32> -> vector<256x128xf32>
    %105 = arith.addf %99, %104 : vector<256x128xf32>
    %106 = arith.maximumf %52, %105 : vector<256x128xf32>
    %107 = vector.shape_cast %106 : vector<256x128xf32> to vector<16x16x128xf32>
    %108 = vector.extract_strided_slice %107 {offsets = [0, 0, 0], sizes = [16, 8, 128], strides = [1, 1, 1]} : vector<16x16x128xf32> to vector<16x8x128xf32>
    %109 = vector.shape_cast %108 : vector<16x8x128xf32> to vector<8x2x8x128xf32>
    %cst_150 = arith.constant dense<0xFF800000> : vector<8x8x128xf32>
    %110 = vector.multi_reduction <maximumf>, %109, %cst_150 [1] : vector<8x2x8x128xf32> to vector<8x8x128xf32>
    %c0_151 = arith.constant 0 : index
    %c0_152 = arith.constant 0 : index
    %111 = vector.load %arg3[%c0_151, %c0_152] : memref<1x128xf32, #tpu.memory_space<vmem>>, vector<1x128xf32>
    %112 = vector.shape_cast %111 : vector<1x128xf32> to vector<1x1x128xf32>
    %113 = vector.broadcast %112 : vector<1x1x128xf32> to vector<8x8x128xf32>
    %114 = arith.addf %110, %113 : vector<8x8x128xf32>
    %cst_153 = arith.constant 0.000000e+00 : f32
    %115 = vector.broadcast %cst_153 : f32 to vector<8x8x128xf32>
    %116 = arith.maximumf %114, %115 : vector<8x8x128xf32>
    %117 = arith.truncf %116 : vector<8x8x128xf32> to vector<8x8x128xbf16>
    %c0_154 = arith.constant 0 : index
    %c0_155 = arith.constant 0 : index
    %c0_156 = arith.constant 0 : index
    %c0_157 = arith.constant 0 : index
    %118 = vector.load %arg4[%c0_154, %c0_155, %c0_156, %c0_157] : memref<1x8x8x128xbf16, #tpu.memory_space<vmem>>, vector<1x8x8x128xbf16>
    %119 = vector.shape_cast %118 : vector<1x8x8x128xbf16> to vector<8x8x128xbf16>
    %120 = vector.shape_cast %117 : vector<8x8x128xbf16> to vector<1x8x8x128xbf16>
    tpu.vector_store %arg4[%c0_154, %c0_155, %c0_156, %c0_157], %120 {strides = array<i32>} : memref<1x8x8x128xbf16, #tpu.memory_space<vmem>>, vector<1x8x8x128xbf16>,
    return
  }
  func.func @transform_0(%arg0: i32) -> (i32, i32, i32, i32, i32) {
    %c0_i32 = arith.constant 0 : i32
    %c0_i32_0 = arith.constant 0 : i32
    %c0_i32_1 = arith.constant 0 : i32
    %c0_i32_2 = arith.constant 0 : i32
    %c0_i32_3 = arith.constant 0 : i32
    return %arg0, %c0_i32, %c0_i32_0, %c0_i32_1, %c0_i32_2 : i32, i32, i32, i32, i32
  }
  func.func @transform_1(%arg0: i32) -> (i32, i32, i32) {
    %c0_i32 = arith.constant 0 : i32
    %c0_i32_0 = arith.constant 0 : i32
    %c0_i32_1 = arith.constant 0 : i32
    %c0_i32_2 = arith.constant 0 : i32
    return %c0_i32, %c0_i32_0, %c0_i32_1 : i32, i32, i32
  }
  func.func @transform_2(%arg0: i32) -> (i32, i32) {
    %c0_i32 = arith.constant 0 : i32
    %c0_i32_0 = arith.constant 0 : i32
    %c0_i32_1 = arith.constant 0 : i32
    return %c0_i32, %c0_i32_0 : i32, i32
  }
  func.func @transform_3(%arg0: i32) -> (i32, i32, i32, i32) {
    %c0_i32 = arith.constant 0 : i32
    %c0_i32_0 = arith.constant 0 : i32
    %c0_i32_1 = arith.constant 0 : i32
    %c0_i32_2 = arith.constant 0 : i32
    return %arg0, %c0_i32, %c0_i32_0, %c0_i32_1 : i32, i32, i32, i32
  }
}

module attributes {stable_mosaic.version = 11 : i64} {
  func.func @_conv_pool_kernel(%arg0: i32, %arg1: memref<1x2x2x160x128xbf16, #tpu.memory_space<vmem>>, %arg2: memref<9x128x128xbf16, #tpu.memory_space<vmem>>, %arg3: memref<1x128xf32, #tpu.memory_space<vmem>>, %arg4: memref<1x4x4x128xbf16, #tpu.memory_space<vmem>>) attributes {dimension_semantics = [#tpu.dimension_semantics<parallel>], iteration_bounds = array<i64: 2>, scalar_prefetch = 0 : i64, scratch_operands = 0 : i64, tpu.core_type = #tpu.core_type<tc>, window_params = [{transform_indices = @transform_0, window_bounds = array<i64: 1, 2, 2, 160, 128>}, {pipeline_mode = #tpu.pipeline_mode<synchronous>, transform_indices = @transform_1, window_bounds = array<i64: 9, 128, 128>}, {pipeline_mode = #tpu.pipeline_mode<synchronous>, transform_indices = @transform_2, window_bounds = array<i64: 1, 128>}, {transform_indices = @transform_3, window_bounds = array<i64: 1, 4, 4, 128>}]} {
    %c0 = arith.constant 0 : index
    %c0_0 = arith.constant 0 : index
    %c0_1 = arith.constant 0 : index
    %c0_2 = arith.constant 0 : index
    %c0_3 = arith.constant 0 : index
    %0 = vector.load %arg1[%c0, %c0_0, %c0_1, %c0_2, %c0_3] : memref<1x2x2x160x128xbf16, #tpu.memory_space<vmem>>, vector<1x1x1x128x128xbf16>
    %1 = vector.shape_cast %0 : vector<1x1x1x128x128xbf16> to vector<128x128xbf16>
    %c0_4 = arith.constant 0 : index
    %c0_5 = arith.constant 0 : index
    %c0_6 = arith.constant 0 : index
    %2 = vector.load %arg2[%c0_4, %c0_5, %c0_6] : memref<9x128x128xbf16, #tpu.memory_space<vmem>>, vector<1x128x128xbf16>
    %3 = vector.shape_cast %2 : vector<1x128x128xbf16> to vector<128x128xbf16>
    %cst = arith.constant dense<0.000000e+00> : vector<128x128xf32>
    %4 = tpu.matmul %1, %3, %cst {dimension_numbers = #tpu.dot_dimension_numbers<[1], [0], [0], [1], [0, 0, 1, 1], [], []>} : vector<128x128xbf16>, vector<128x128xbf16>, vector<128x128xf32> -> vector<128x128xf32>
    %c0_7 = arith.constant 0 : index
    %c1 = arith.constant 1 : index
    %c0_8 = arith.constant 0 : index
    %c0_9 = arith.constant 0 : index
    %c0_10 = arith.constant 0 : index
    %5 = vector.load %arg1[%c0_7, %c1, %c0_8, %c0_9, %c0_10] : memref<1x2x2x160x128xbf16, #tpu.memory_space<vmem>>, vector<1x1x1x128x128xbf16>
    %6 = vector.shape_cast %5 : vector<1x1x1x128x128xbf16> to vector<128x128xbf16>
    %c1_11 = arith.constant 1 : index
    %c0_12 = arith.constant 0 : index
    %c0_13 = arith.constant 0 : index
    %7 = vector.load %arg2[%c1_11, %c0_12, %c0_13] : memref<9x128x128xbf16, #tpu.memory_space<vmem>>, vector<1x128x128xbf16>
    %8 = vector.shape_cast %7 : vector<1x128x128xbf16> to vector<128x128xbf16>
    %cst_14 = arith.constant dense<0.000000e+00> : vector<128x128xf32>
    %9 = tpu.matmul %6, %8, %cst_14 {dimension_numbers = #tpu.dot_dimension_numbers<[1], [0], [0], [1], [0, 0, 1, 1], [], []>} : vector<128x128xbf16>, vector<128x128xbf16>, vector<128x128xf32> -> vector<128x128xf32>
    %10 = arith.addf %4, %9 : vector<128x128xf32>
    %c0_15 = arith.constant 0 : index
    %c0_16 = arith.constant 0 : index
    %c1_17 = arith.constant 1 : index
    %c0_18 = arith.constant 0 : index
    %c0_19 = arith.constant 0 : index
    %11 = vector.load %arg1[%c0_15, %c0_16, %c1_17, %c0_18, %c0_19] : memref<1x2x2x160x128xbf16, #tpu.memory_space<vmem>>, vector<1x1x1x128x128xbf16>
    %12 = vector.shape_cast %11 : vector<1x1x1x128x128xbf16> to vector<128x128xbf16>
    %c2 = arith.constant 2 : index
    %c0_20 = arith.constant 0 : index
    %c0_21 = arith.constant 0 : index
    %13 = vector.load %arg2[%c2, %c0_20, %c0_21] : memref<9x128x128xbf16, #tpu.memory_space<vmem>>, vector<1x128x128xbf16>
    %14 = vector.shape_cast %13 : vector<1x128x128xbf16> to vector<128x128xbf16>
    %cst_22 = arith.constant dense<0.000000e+00> : vector<128x128xf32>
    %15 = tpu.matmul %12, %14, %cst_22 {dimension_numbers = #tpu.dot_dimension_numbers<[1], [0], [0], [1], [0, 0, 1, 1], [], []>} : vector<128x128xbf16>, vector<128x128xbf16>, vector<128x128xf32> -> vector<128x128xf32>
    %16 = arith.addf %10, %15 : vector<128x128xf32>
    %c0_23 = arith.constant 0 : index
    %c0_24 = arith.constant 0 : index
    %c0_25 = arith.constant 0 : index
    %c16 = arith.constant 16 : index
    %c0_26 = arith.constant 0 : index
    %17 = vector.load %arg1[%c0_23, %c0_24, %c0_25, %c16, %c0_26] : memref<1x2x2x160x128xbf16, #tpu.memory_space<vmem>>, vector<1x1x1x128x128xbf16>
    %18 = vector.shape_cast %17 : vector<1x1x1x128x128xbf16> to vector<128x128xbf16>
    %c3 = arith.constant 3 : index
    %c0_27 = arith.constant 0 : index
    %c0_28 = arith.constant 0 : index
    %19 = vector.load %arg2[%c3, %c0_27, %c0_28] : memref<9x128x128xbf16, #tpu.memory_space<vmem>>, vector<1x128x128xbf16>
    %20 = vector.shape_cast %19 : vector<1x128x128xbf16> to vector<128x128xbf16>
    %cst_29 = arith.constant dense<0.000000e+00> : vector<128x128xf32>
    %21 = tpu.matmul %18, %20, %cst_29 {dimension_numbers = #tpu.dot_dimension_numbers<[1], [0], [0], [1], [0, 0, 1, 1], [], []>} : vector<128x128xbf16>, vector<128x128xbf16>, vector<128x128xf32> -> vector<128x128xf32>
    %22 = arith.addf %16, %21 : vector<128x128xf32>
    %c0_30 = arith.constant 0 : index
    %c1_31 = arith.constant 1 : index
    %c0_32 = arith.constant 0 : index
    %c16_33 = arith.constant 16 : index
    %c0_34 = arith.constant 0 : index
    %23 = vector.load %arg1[%c0_30, %c1_31, %c0_32, %c16_33, %c0_34] : memref<1x2x2x160x128xbf16, #tpu.memory_space<vmem>>, vector<1x1x1x128x128xbf16>
    %24 = vector.shape_cast %23 : vector<1x1x1x128x128xbf16> to vector<128x128xbf16>
    %c4 = arith.constant 4 : index
    %c0_35 = arith.constant 0 : index
    %c0_36 = arith.constant 0 : index
    %25 = vector.load %arg2[%c4, %c0_35, %c0_36] : memref<9x128x128xbf16, #tpu.memory_space<vmem>>, vector<1x128x128xbf16>
    %26 = vector.shape_cast %25 : vector<1x128x128xbf16> to vector<128x128xbf16>
    %cst_37 = arith.constant dense<0.000000e+00> : vector<128x128xf32>
    %27 = tpu.matmul %24, %26, %cst_37 {dimension_numbers = #tpu.dot_dimension_numbers<[1], [0], [0], [1], [0, 0, 1, 1], [], []>} : vector<128x128xbf16>, vector<128x128xbf16>, vector<128x128xf32> -> vector<128x128xf32>
    %28 = arith.addf %22, %27 : vector<128x128xf32>
    %c0_38 = arith.constant 0 : index
    %c0_39 = arith.constant 0 : index
    %c1_40 = arith.constant 1 : index
    %c16_41 = arith.constant 16 : index
    %c0_42 = arith.constant 0 : index
    %29 = vector.load %arg1[%c0_38, %c0_39, %c1_40, %c16_41, %c0_42] : memref<1x2x2x160x128xbf16, #tpu.memory_space<vmem>>, vector<1x1x1x128x128xbf16>
    %30 = vector.shape_cast %29 : vector<1x1x1x128x128xbf16> to vector<128x128xbf16>
    %c5 = arith.constant 5 : index
    %c0_43 = arith.constant 0 : index
    %c0_44 = arith.constant 0 : index
    %31 = vector.load %arg2[%c5, %c0_43, %c0_44] : memref<9x128x128xbf16, #tpu.memory_space<vmem>>, vector<1x128x128xbf16>
    %32 = vector.shape_cast %31 : vector<1x128x128xbf16> to vector<128x128xbf16>
    %cst_45 = arith.constant dense<0.000000e+00> : vector<128x128xf32>
    %33 = tpu.matmul %30, %32, %cst_45 {dimension_numbers = #tpu.dot_dimension_numbers<[1], [0], [0], [1], [0, 0, 1, 1], [], []>} : vector<128x128xbf16>, vector<128x128xbf16>, vector<128x128xf32> -> vector<128x128xf32>
    %34 = arith.addf %28, %33 : vector<128x128xf32>
    %c0_46 = arith.constant 0 : index
    %c0_47 = arith.constant 0 : index
    %c0_48 = arith.constant 0 : index
    %c32 = arith.constant 32 : index
    %c0_49 = arith.constant 0 : index
    %35 = vector.load %arg1[%c0_46, %c0_47, %c0_48, %c32, %c0_49] : memref<1x2x2x160x128xbf16, #tpu.memory_space<vmem>>, vector<1x1x1x128x128xbf16>
    %36 = vector.shape_cast %35 : vector<1x1x1x128x128xbf16> to vector<128x128xbf16>
    %c6 = arith.constant 6 : index
    %c0_50 = arith.constant 0 : index
    %c0_51 = arith.constant 0 : index
    %37 = vector.load %arg2[%c6, %c0_50, %c0_51] : memref<9x128x128xbf16, #tpu.memory_space<vmem>>, vector<1x128x128xbf16>
    %38 = vector.shape_cast %37 : vector<1x128x128xbf16> to vector<128x128xbf16>
    %cst_52 = arith.constant dense<0.000000e+00> : vector<128x128xf32>
    %39 = tpu.matmul %36, %38, %cst_52 {dimension_numbers = #tpu.dot_dimension_numbers<[1], [0], [0], [1], [0, 0, 1, 1], [], []>} : vector<128x128xbf16>, vector<128x128xbf16>, vector<128x128xf32> -> vector<128x128xf32>
    %40 = arith.addf %34, %39 : vector<128x128xf32>
    %c0_53 = arith.constant 0 : index
    %c1_54 = arith.constant 1 : index
    %c0_55 = arith.constant 0 : index
    %c32_56 = arith.constant 32 : index
    %c0_57 = arith.constant 0 : index
    %41 = vector.load %arg1[%c0_53, %c1_54, %c0_55, %c32_56, %c0_57] : memref<1x2x2x160x128xbf16, #tpu.memory_space<vmem>>, vector<1x1x1x128x128xbf16>
    %42 = vector.shape_cast %41 : vector<1x1x1x128x128xbf16> to vector<128x128xbf16>
    %c7 = arith.constant 7 : index
    %c0_58 = arith.constant 0 : index
    %c0_59 = arith.constant 0 : index
    %43 = vector.load %arg2[%c7, %c0_58, %c0_59] : memref<9x128x128xbf16, #tpu.memory_space<vmem>>, vector<1x128x128xbf16>
    %44 = vector.shape_cast %43 : vector<1x128x128xbf16> to vector<128x128xbf16>
    %cst_60 = arith.constant dense<0.000000e+00> : vector<128x128xf32>
    %45 = tpu.matmul %42, %44, %cst_60 {dimension_numbers = #tpu.dot_dimension_numbers<[1], [0], [0], [1], [0, 0, 1, 1], [], []>} : vector<128x128xbf16>, vector<128x128xbf16>, vector<128x128xf32> -> vector<128x128xf32>
    %46 = arith.addf %40, %45 : vector<128x128xf32>
    %c0_61 = arith.constant 0 : index
    %c0_62 = arith.constant 0 : index
    %c1_63 = arith.constant 1 : index
    %c32_64 = arith.constant 32 : index
    %c0_65 = arith.constant 0 : index
    %47 = vector.load %arg1[%c0_61, %c0_62, %c1_63, %c32_64, %c0_65] : memref<1x2x2x160x128xbf16, #tpu.memory_space<vmem>>, vector<1x1x1x128x128xbf16>
    %48 = vector.shape_cast %47 : vector<1x1x1x128x128xbf16> to vector<128x128xbf16>
    %c8 = arith.constant 8 : index
    %c0_66 = arith.constant 0 : index
    %c0_67 = arith.constant 0 : index
    %49 = vector.load %arg2[%c8, %c0_66, %c0_67] : memref<9x128x128xbf16, #tpu.memory_space<vmem>>, vector<1x128x128xbf16>
    %50 = vector.shape_cast %49 : vector<1x128x128xbf16> to vector<128x128xbf16>
    %cst_68 = arith.constant dense<0.000000e+00> : vector<128x128xf32>
    %51 = tpu.matmul %48, %50, %cst_68 {dimension_numbers = #tpu.dot_dimension_numbers<[1], [0], [0], [1], [0, 0, 1, 1], [], []>} : vector<128x128xbf16>, vector<128x128xbf16>, vector<128x128xf32> -> vector<128x128xf32>
    %52 = arith.addf %46, %51 : vector<128x128xf32>
    %c0_69 = arith.constant 0 : index
    %c1_70 = arith.constant 1 : index
    %c0_71 = arith.constant 0 : index
    %c0_72 = arith.constant 0 : index
    %c0_73 = arith.constant 0 : index
    %53 = vector.load %arg1[%c0_69, %c1_70, %c0_71, %c0_72, %c0_73] : memref<1x2x2x160x128xbf16, #tpu.memory_space<vmem>>, vector<1x1x1x128x128xbf16>
    %54 = vector.shape_cast %53 : vector<1x1x1x128x128xbf16> to vector<128x128xbf16>
    %c0_74 = arith.constant 0 : index
    %c0_75 = arith.constant 0 : index
    %c0_76 = arith.constant 0 : index
    %55 = vector.load %arg2[%c0_74, %c0_75, %c0_76] : memref<9x128x128xbf16, #tpu.memory_space<vmem>>, vector<1x128x128xbf16>
    %56 = vector.shape_cast %55 : vector<1x128x128xbf16> to vector<128x128xbf16>
    %cst_77 = arith.constant dense<0.000000e+00> : vector<128x128xf32>
    %57 = tpu.matmul %54, %56, %cst_77 {dimension_numbers = #tpu.dot_dimension_numbers<[1], [0], [0], [1], [0, 0, 1, 1], [], []>} : vector<128x128xbf16>, vector<128x128xbf16>, vector<128x128xf32> -> vector<128x128xf32>
    %c0_78 = arith.constant 0 : index
    %c0_79 = arith.constant 0 : index
    %c1_80 = arith.constant 1 : index
    %c0_81 = arith.constant 0 : index
    %c0_82 = arith.constant 0 : index
    %58 = vector.load %arg1[%c0_78, %c0_79, %c1_80, %c0_81, %c0_82] : memref<1x2x2x160x128xbf16, #tpu.memory_space<vmem>>, vector<1x1x1x128x128xbf16>
    %59 = vector.shape_cast %58 : vector<1x1x1x128x128xbf16> to vector<128x128xbf16>
    %c1_83 = arith.constant 1 : index
    %c0_84 = arith.constant 0 : index
    %c0_85 = arith.constant 0 : index
    %60 = vector.load %arg2[%c1_83, %c0_84, %c0_85] : memref<9x128x128xbf16, #tpu.memory_space<vmem>>, vector<1x128x128xbf16>
    %61 = vector.shape_cast %60 : vector<1x128x128xbf16> to vector<128x128xbf16>
    %cst_86 = arith.constant dense<0.000000e+00> : vector<128x128xf32>
    %62 = tpu.matmul %59, %61, %cst_86 {dimension_numbers = #tpu.dot_dimension_numbers<[1], [0], [0], [1], [0, 0, 1, 1], [], []>} : vector<128x128xbf16>, vector<128x128xbf16>, vector<128x128xf32> -> vector<128x128xf32>
    %63 = arith.addf %57, %62 : vector<128x128xf32>
    %c0_87 = arith.constant 0 : index
    %c1_88 = arith.constant 1 : index
    %c1_89 = arith.constant 1 : index
    %c0_90 = arith.constant 0 : index
    %c0_91 = arith.constant 0 : index
    %64 = vector.load %arg1[%c0_87, %c1_88, %c1_89, %c0_90, %c0_91] : memref<1x2x2x160x128xbf16, #tpu.memory_space<vmem>>, vector<1x1x1x128x128xbf16>
    %65 = vector.shape_cast %64 : vector<1x1x1x128x128xbf16> to vector<128x128xbf16>
    %c2_92 = arith.constant 2 : index
    %c0_93 = arith.constant 0 : index
    %c0_94 = arith.constant 0 : index
    %66 = vector.load %arg2[%c2_92, %c0_93, %c0_94] : memref<9x128x128xbf16, #tpu.memory_space<vmem>>, vector<1x128x128xbf16>
    %67 = vector.shape_cast %66 : vector<1x128x128xbf16> to vector<128x128xbf16>
    %cst_95 = arith.constant dense<0.000000e+00> : vector<128x128xf32>
    %68 = tpu.matmul %65, %67, %cst_95 {dimension_numbers = #tpu.dot_dimension_numbers<[1], [0], [0], [1], [0, 0, 1, 1], [], []>} : vector<128x128xbf16>, vector<128x128xbf16>, vector<128x128xf32> -> vector<128x128xf32>
    %69 = arith.addf %63, %68 : vector<128x128xf32>
    %c0_96 = arith.constant 0 : index
    %c1_97 = arith.constant 1 : index
    %c0_98 = arith.constant 0 : index
    %c16_99 = arith.constant 16 : index
    %c0_100 = arith.constant 0 : index
    %70 = vector.load %arg1[%c0_96, %c1_97, %c0_98, %c16_99, %c0_100] : memref<1x2x2x160x128xbf16, #tpu.memory_space<vmem>>, vector<1x1x1x128x128xbf16>
    %71 = vector.shape_cast %70 : vector<1x1x1x128x128xbf16> to vector<128x128xbf16>
    %c3_101 = arith.constant 3 : index
    %c0_102 = arith.constant 0 : index
    %c0_103 = arith.constant 0 : index
    %72 = vector.load %arg2[%c3_101, %c0_102, %c0_103] : memref<9x128x128xbf16, #tpu.memory_space<vmem>>, vector<1x128x128xbf16>
    %73 = vector.shape_cast %72 : vector<1x128x128xbf16> to vector<128x128xbf16>
    %cst_104 = arith.constant dense<0.000000e+00> : vector<128x128xf32>
    %74 = tpu.matmul %71, %73, %cst_104 {dimension_numbers = #tpu.dot_dimension_numbers<[1], [0], [0], [1], [0, 0, 1, 1], [], []>} : vector<128x128xbf16>, vector<128x128xbf16>, vector<128x128xf32> -> vector<128x128xf32>
    %75 = arith.addf %69, %74 : vector<128x128xf32>
    %c0_105 = arith.constant 0 : index
    %c0_106 = arith.constant 0 : index
    %c1_107 = arith.constant 1 : index
    %c16_108 = arith.constant 16 : index
    %c0_109 = arith.constant 0 : index
    %76 = vector.load %arg1[%c0_105, %c0_106, %c1_107, %c16_108, %c0_109] : memref<1x2x2x160x128xbf16, #tpu.memory_space<vmem>>, vector<1x1x1x128x128xbf16>
    %77 = vector.shape_cast %76 : vector<1x1x1x128x128xbf16> to vector<128x128xbf16>
    %c4_110 = arith.constant 4 : index
    %c0_111 = arith.constant 0 : index
    %c0_112 = arith.constant 0 : index
    %78 = vector.load %arg2[%c4_110, %c0_111, %c0_112] : memref<9x128x128xbf16, #tpu.memory_space<vmem>>, vector<1x128x128xbf16>
    %79 = vector.shape_cast %78 : vector<1x128x128xbf16> to vector<128x128xbf16>
    %cst_113 = arith.constant dense<0.000000e+00> : vector<128x128xf32>
    %80 = tpu.matmul %77, %79, %cst_113 {dimension_numbers = #tpu.dot_dimension_numbers<[1], [0], [0], [1], [0, 0, 1, 1], [], []>} : vector<128x128xbf16>, vector<128x128xbf16>, vector<128x128xf32> -> vector<128x128xf32>
    %81 = arith.addf %75, %80 : vector<128x128xf32>
    %c0_114 = arith.constant 0 : index
    %c1_115 = arith.constant 1 : index
    %c1_116 = arith.constant 1 : index
    %c16_117 = arith.constant 16 : index
    %c0_118 = arith.constant 0 : index
    %82 = vector.load %arg1[%c0_114, %c1_115, %c1_116, %c16_117, %c0_118] : memref<1x2x2x160x128xbf16, #tpu.memory_space<vmem>>, vector<1x1x1x128x128xbf16>
    %83 = vector.shape_cast %82 : vector<1x1x1x128x128xbf16> to vector<128x128xbf16>
    %c5_119 = arith.constant 5 : index
    %c0_120 = arith.constant 0 : index
    %c0_121 = arith.constant 0 : index
    %84 = vector.load %arg2[%c5_119, %c0_120, %c0_121] : memref<9x128x128xbf16, #tpu.memory_space<vmem>>, vector<1x128x128xbf16>
    %85 = vector.shape_cast %84 : vector<1x128x128xbf16> to vector<128x128xbf16>
    %cst_122 = arith.constant dense<0.000000e+00> : vector<128x128xf32>
    %86 = tpu.matmul %83, %85, %cst_122 {dimension_numbers = #tpu.dot_dimension_numbers<[1], [0], [0], [1], [0, 0, 1, 1], [], []>} : vector<128x128xbf16>, vector<128x128xbf16>, vector<128x128xf32> -> vector<128x128xf32>
    %87 = arith.addf %81, %86 : vector<128x128xf32>
    %c0_123 = arith.constant 0 : index
    %c1_124 = arith.constant 1 : index
    %c0_125 = arith.constant 0 : index
    %c32_126 = arith.constant 32 : index
    %c0_127 = arith.constant 0 : index
    %88 = vector.load %arg1[%c0_123, %c1_124, %c0_125, %c32_126, %c0_127] : memref<1x2x2x160x128xbf16, #tpu.memory_space<vmem>>, vector<1x1x1x128x128xbf16>
    %89 = vector.shape_cast %88 : vector<1x1x1x128x128xbf16> to vector<128x128xbf16>
    %c6_128 = arith.constant 6 : index
    %c0_129 = arith.constant 0 : index
    %c0_130 = arith.constant 0 : index
    %90 = vector.load %arg2[%c6_128, %c0_129, %c0_130] : memref<9x128x128xbf16, #tpu.memory_space<vmem>>, vector<1x128x128xbf16>
    %91 = vector.shape_cast %90 : vector<1x128x128xbf16> to vector<128x128xbf16>
    %cst_131 = arith.constant dense<0.000000e+00> : vector<128x128xf32>
    %92 = tpu.matmul %89, %91, %cst_131 {dimension_numbers = #tpu.dot_dimension_numbers<[1], [0], [0], [1], [0, 0, 1, 1], [], []>} : vector<128x128xbf16>, vector<128x128xbf16>, vector<128x128xf32> -> vector<128x128xf32>
    %93 = arith.addf %87, %92 : vector<128x128xf32>
    %c0_132 = arith.constant 0 : index
    %c0_133 = arith.constant 0 : index
    %c1_134 = arith.constant 1 : index
    %c32_135 = arith.constant 32 : index
    %c0_136 = arith.constant 0 : index
    %94 = vector.load %arg1[%c0_132, %c0_133, %c1_134, %c32_135, %c0_136] : memref<1x2x2x160x128xbf16, #tpu.memory_space<vmem>>, vector<1x1x1x128x128xbf16>
    %95 = vector.shape_cast %94 : vector<1x1x1x128x128xbf16> to vector<128x128xbf16>
    %c7_137 = arith.constant 7 : index
    %c0_138 = arith.constant 0 : index
    %c0_139 = arith.constant 0 : index
    %96 = vector.load %arg2[%c7_137, %c0_138, %c0_139] : memref<9x128x128xbf16, #tpu.memory_space<vmem>>, vector<1x128x128xbf16>
    %97 = vector.shape_cast %96 : vector<1x128x128xbf16> to vector<128x128xbf16>
    %cst_140 = arith.constant dense<0.000000e+00> : vector<128x128xf32>
    %98 = tpu.matmul %95, %97, %cst_140 {dimension_numbers = #tpu.dot_dimension_numbers<[1], [0], [0], [1], [0, 0, 1, 1], [], []>} : vector<128x128xbf16>, vector<128x128xbf16>, vector<128x128xf32> -> vector<128x128xf32>
    %99 = arith.addf %93, %98 : vector<128x128xf32>
    %c0_141 = arith.constant 0 : index
    %c1_142 = arith.constant 1 : index
    %c1_143 = arith.constant 1 : index
    %c32_144 = arith.constant 32 : index
    %c0_145 = arith.constant 0 : index
    %100 = vector.load %arg1[%c0_141, %c1_142, %c1_143, %c32_144, %c0_145] : memref<1x2x2x160x128xbf16, #tpu.memory_space<vmem>>, vector<1x1x1x128x128xbf16>
    %101 = vector.shape_cast %100 : vector<1x1x1x128x128xbf16> to vector<128x128xbf16>
    %c8_146 = arith.constant 8 : index
    %c0_147 = arith.constant 0 : index
    %c0_148 = arith.constant 0 : index
    %102 = vector.load %arg2[%c8_146, %c0_147, %c0_148] : memref<9x128x128xbf16, #tpu.memory_space<vmem>>, vector<1x128x128xbf16>
    %103 = vector.shape_cast %102 : vector<1x128x128xbf16> to vector<128x128xbf16>
    %cst_149 = arith.constant dense<0.000000e+00> : vector<128x128xf32>
    %104 = tpu.matmul %101, %103, %cst_149 {dimension_numbers = #tpu.dot_dimension_numbers<[1], [0], [0], [1], [0, 0, 1, 1], [], []>} : vector<128x128xbf16>, vector<128x128xbf16>, vector<128x128xf32> -> vector<128x128xf32>
    %105 = arith.addf %99, %104 : vector<128x128xf32>
    %106 = arith.maximumf %52, %105 : vector<128x128xf32>
    %107 = vector.shape_cast %106 : vector<128x128xf32> to vector<8x16x128xf32>
    %108 = vector.extract_strided_slice %107 {offsets = [0, 0, 0], sizes = [8, 4, 128], strides = [1, 1, 1]} : vector<8x16x128xf32> to vector<8x4x128xf32>
    %109 = vector.shape_cast %108 : vector<8x4x128xf32> to vector<4x2x4x128xf32>
    %cst_150 = arith.constant dense<0xFF800000> : vector<4x4x128xf32>
    %110 = vector.multi_reduction <maximumf>, %109, %cst_150 [1] : vector<4x2x4x128xf32> to vector<4x4x128xf32>
    %c0_151 = arith.constant 0 : index
    %c0_152 = arith.constant 0 : index
    %111 = vector.load %arg3[%c0_151, %c0_152] : memref<1x128xf32, #tpu.memory_space<vmem>>, vector<1x128xf32>
    %112 = vector.shape_cast %111 : vector<1x128xf32> to vector<1x1x128xf32>
    %113 = vector.broadcast %112 : vector<1x1x128xf32> to vector<4x4x128xf32>
    %114 = arith.addf %110, %113 : vector<4x4x128xf32>
    %cst_153 = arith.constant 0.000000e+00 : f32
    %115 = vector.broadcast %cst_153 : f32 to vector<4x4x128xf32>
    %116 = arith.maximumf %114, %115 : vector<4x4x128xf32>
    %117 = arith.truncf %116 : vector<4x4x128xf32> to vector<4x4x128xbf16>
    %c0_154 = arith.constant 0 : index
    %c0_155 = arith.constant 0 : index
    %c0_156 = arith.constant 0 : index
    %c0_157 = arith.constant 0 : index
    %118 = vector.load %arg4[%c0_154, %c0_155, %c0_156, %c0_157] : memref<1x4x4x128xbf16, #tpu.memory_space<vmem>>, vector<1x4x4x128xbf16>
    %119 = vector.shape_cast %118 : vector<1x4x4x128xbf16> to vector<4x4x128xbf16>
    %120 = vector.shape_cast %117 : vector<4x4x128xbf16> to vector<1x4x4x128xbf16>
    tpu.vector_store %arg4[%c0_154, %c0_155, %c0_156, %c0_157], %120 {strides = array<i32>} : memref<1x4x4x128xbf16, #tpu.memory_space<vmem>>, vector<1x4x4x128xbf16>,
    return
  }
  func.func @transform_0(%arg0: i32) -> (i32, i32, i32, i32, i32) {
    %c0_i32 = arith.constant 0 : i32
    %c0_i32_0 = arith.constant 0 : i32
    %c0_i32_1 = arith.constant 0 : i32
    %c0_i32_2 = arith.constant 0 : i32
    %c0_i32_3 = arith.constant 0 : i32
    return %arg0, %c0_i32, %c0_i32_0, %c0_i32_1, %c0_i32_2 : i32, i32, i32, i32, i32
  }
  func.func @transform_1(%arg0: i32) -> (i32, i32, i32) {
    %c0_i32 = arith.constant 0 : i32
    %c0_i32_0 = arith.constant 0 : i32
    %c0_i32_1 = arith.constant 0 : i32
    %c0_i32_2 = arith.constant 0 : i32
    return %c0_i32, %c0_i32_0, %c0_i32_1 : i32, i32, i32
  }
  func.func @transform_2(%arg0: i32) -> (i32, i32) {
    %c0_i32 = arith.constant 0 : i32
    %c0_i32_0 = arith.constant 0 : i32
    %c0_i32_1 = arith.constant 0 : i32
    return %c0_i32, %c0_i32_0 : i32, i32
  }
  func.func @transform_3(%arg0: i32) -> (i32, i32, i32, i32) {
    %c0_i32 = arith.constant 0 : i32
    %c0_i32_0 = arith.constant 0 : i32
    %c0_i32_1 = arith.constant 0 : i32
    %c0_i32_2 = arith.constant 0 : i32
    return %arg0, %c0_i32, %c0_i32_0, %c0_i32_1 : i32, i32, i32, i32
  }
}

module attributes {stable_mosaic.version = 11 : i64} {
  func.func @_matmul_kernel(%arg0: i32, %arg1: i32, %arg2: i32, %arg3: memref<8x128xbf16, #tpu.memory_space<vmem>>, %arg4: memref<128x128xbf16, #tpu.memory_space<vmem>>, %arg5: memref<1x128xf32, #tpu.memory_space<vmem>>, %arg6: memref<8x128xbf16, #tpu.memory_space<vmem>>, %arg7: memref<8x128xf32, #tpu.memory_space<vmem>>) attributes {dimension_semantics = [#tpu.dimension_semantics<parallel>, #tpu.dimension_semantics<parallel>, #tpu.dimension_semantics<arbitrary>], iteration_bounds = array<i64: 1, 1, 1>, scalar_prefetch = 0 : i64, scratch_operands = 1 : i64, tpu.core_type = #tpu.core_type<tc>, window_params = [{transform_indices = @transform_0, window_bounds = array<i64: 8, 128>}, {transform_indices = @transform_1, window_bounds = array<i64: 128, 128>}, {transform_indices = @transform_2, window_bounds = array<i64: 1, 128>}, {transform_indices = @transform_3, window_bounds = array<i64: 8, 128>}]} {
    %c0_i32 = arith.constant 0 : i32
    %0 = arith.cmpi eq, %arg2, %c0_i32 : i32
    %1 = arith.extui %0 : i1 to i32
    %c0_i32_0 = arith.constant 0 : i32
    %2 = arith.cmpi ne, %1, %c0_i32_0 : i32
    scf.if %2 {
      %cst_10 = arith.constant 0.000000e+00 : f32
      %12 = vector.broadcast %cst_10 : f32 to vector<8x128xf32>
      %c0_11 = arith.constant 0 : index
      %c0_12 = arith.constant 0 : index
      %13 = vector.load %arg7[%c0_11, %c0_12] : memref<8x128xf32, #tpu.memory_space<vmem>>, vector<8x128xf32>
      tpu.vector_store %arg7[%c0_11, %c0_12], %12 {strides = array<i32>} : memref<8x128xf32, #tpu.memory_space<vmem>>, vector<8x128xf32>,
    } else {
    }
    %c0 = arith.constant 0 : index
    %c0_1 = arith.constant 0 : index
    %3 = vector.load %arg7[%c0, %c0_1] : memref<8x128xf32, #tpu.memory_space<vmem>>, vector<8x128xf32>
    %c0_2 = arith.constant 0 : index
    %c0_3 = arith.constant 0 : index
    %4 = vector.load %arg3[%c0_2, %c0_3] : memref<8x128xbf16, #tpu.memory_space<vmem>>, vector<8x128xbf16>
    %c0_4 = arith.constant 0 : index
    %c0_5 = arith.constant 0 : index
    %5 = vector.load %arg4[%c0_4, %c0_5] : memref<128x128xbf16, #tpu.memory_space<vmem>>, vector<128x128xbf16>
    %cst = arith.constant dense<0.000000e+00> : vector<8x128xf32>
    %6 = tpu.matmul %4, %5, %cst {dimension_numbers = #tpu.dot_dimension_numbers<[1], [0], [0], [1], [0, 0, 1, 1], [], []>} : vector<8x128xbf16>, vector<128x128xbf16>, vector<8x128xf32> -> vector<8x128xf32>
    %7 = arith.addf %3, %6 : vector<8x128xf32>
    %c0_6 = arith.constant 0 : index
    %c0_7 = arith.constant 0 : index
    %8 = vector.load %arg7[%c0_6, %c0_7] : memref<8x128xf32, #tpu.memory_space<vmem>>, vector<8x128xf32>
    tpu.vector_store %arg7[%c0_6, %c0_7], %7 {strides = array<i32>} : memref<8x128xf32, #tpu.memory_space<vmem>>, vector<8x128xf32>,
    %c0_i32_8 = arith.constant 0 : i32
    %9 = arith.cmpi eq, %arg2, %c0_i32_8 : i32
    %10 = arith.extui %9 : i1 to i32
    %c0_i32_9 = arith.constant 0 : i32
    %11 = arith.cmpi ne, %10, %c0_i32_9 : i32
    scf.if %11 {
      %c0_10 = arith.constant 0 : index
      %c0_11 = arith.constant 0 : index
      %12 = vector.load %arg7[%c0_10, %c0_11] : memref<8x128xf32, #tpu.memory_space<vmem>>, vector<8x128xf32>
      %c0_12 = arith.constant 0 : index
      %c0_13 = arith.constant 0 : index
      %13 = vector.load %arg5[%c0_12, %c0_13] : memref<1x128xf32, #tpu.memory_space<vmem>>, vector<1x128xf32>
      %14 = vector.broadcast %13 : vector<1x128xf32> to vector<8x128xf32>
      %15 = arith.addf %12, %14 : vector<8x128xf32>
      %16 = arith.truncf %15 : vector<8x128xf32> to vector<8x128xbf16>
      %c0_14 = arith.constant 0 : index
      %c0_15 = arith.constant 0 : index
      %17 = vector.load %arg6[%c0_14, %c0_15] : memref<8x128xbf16, #tpu.memory_space<vmem>>, vector<8x128xbf16>
      tpu.vector_store %arg6[%c0_14, %c0_15], %16 {strides = array<i32>} : memref<8x128xbf16, #tpu.memory_space<vmem>>, vector<8x128xbf16>,
    } else {
    }
    return
  }
  func.func @transform_0(%arg0: i32, %arg1: i32, %arg2: i32) -> (i32, i32) {
    %c0_i32 = arith.constant 0 : i32
    return %arg0, %arg2 : i32, i32
  }
  func.func @transform_1(%arg0: i32, %arg1: i32, %arg2: i32) -> (i32, i32) {
    %c0_i32 = arith.constant 0 : i32
    return %arg2, %arg1 : i32, i32
  }
  func.func @transform_2(%arg0: i32, %arg1: i32, %arg2: i32) -> (i32, i32) {
    %c0_i32 = arith.constant 0 : i32
    %c0_i32_0 = arith.constant 0 : i32
    return %c0_i32, %arg1 : i32, i32
  }
  func.func @transform_3(%arg0: i32, %arg1: i32, %arg2: i32) -> (i32, i32) {
    %c0_i32 = arith.constant 0 : i32
    return %arg0, %arg1 : i32, i32
  }
}

module attributes {stable_mosaic.version = 11 : i64} {
  func.func @_matmul_kernel(%arg0: i32, %arg1: i32, %arg2: i32, %arg3: memref<8x128xbf16, #tpu.memory_space<vmem>>, %arg4: memref<128x128xbf16, #tpu.memory_space<vmem>>, %arg5: memref<1x128xf32, #tpu.memory_space<vmem>>, %arg6: memref<8x128xbf16, #tpu.memory_space<vmem>>, %arg7: memref<8x128xf32, #tpu.memory_space<vmem>>) attributes {dimension_semantics = [#tpu.dimension_semantics<parallel>, #tpu.dimension_semantics<parallel>, #tpu.dimension_semantics<arbitrary>], iteration_bounds = array<i64: 1, 1, 1>, scalar_prefetch = 0 : i64, scratch_operands = 1 : i64, tpu.core_type = #tpu.core_type<tc>, window_params = [{transform_indices = @transform_0, window_bounds = array<i64: 8, 128>}, {transform_indices = @transform_1, window_bounds = array<i64: 128, 128>}, {transform_indices = @transform_2, window_bounds = array<i64: 1, 128>}, {transform_indices = @transform_3, window_bounds = array<i64: 8, 128>}]} {
    %c0_i32 = arith.constant 0 : i32
    %0 = arith.cmpi eq, %arg2, %c0_i32 : i32
    %1 = arith.extui %0 : i1 to i32
    %c0_i32_0 = arith.constant 0 : i32
    %2 = arith.cmpi ne, %1, %c0_i32_0 : i32
    scf.if %2 {
      %cst_10 = arith.constant 0.000000e+00 : f32
      %12 = vector.broadcast %cst_10 : f32 to vector<8x128xf32>
      %c0_11 = arith.constant 0 : index
      %c0_12 = arith.constant 0 : index
      %13 = vector.load %arg7[%c0_11, %c0_12] : memref<8x128xf32, #tpu.memory_space<vmem>>, vector<8x128xf32>
      tpu.vector_store %arg7[%c0_11, %c0_12], %12 {strides = array<i32>} : memref<8x128xf32, #tpu.memory_space<vmem>>, vector<8x128xf32>,
    } else {
    }
    %c0 = arith.constant 0 : index
    %c0_1 = arith.constant 0 : index
    %3 = vector.load %arg7[%c0, %c0_1] : memref<8x128xf32, #tpu.memory_space<vmem>>, vector<8x128xf32>
    %c0_2 = arith.constant 0 : index
    %c0_3 = arith.constant 0 : index
    %4 = vector.load %arg3[%c0_2, %c0_3] : memref<8x128xbf16, #tpu.memory_space<vmem>>, vector<8x128xbf16>
    %c0_4 = arith.constant 0 : index
    %c0_5 = arith.constant 0 : index
    %5 = vector.load %arg4[%c0_4, %c0_5] : memref<128x128xbf16, #tpu.memory_space<vmem>>, vector<128x128xbf16>
    %cst = arith.constant dense<0.000000e+00> : vector<8x128xf32>
    %6 = tpu.matmul %4, %5, %cst {dimension_numbers = #tpu.dot_dimension_numbers<[1], [0], [0], [1], [0, 0, 1, 1], [], []>} : vector<8x128xbf16>, vector<128x128xbf16>, vector<8x128xf32> -> vector<8x128xf32>
    %7 = arith.addf %3, %6 : vector<8x128xf32>
    %c0_6 = arith.constant 0 : index
    %c0_7 = arith.constant 0 : index
    %8 = vector.load %arg7[%c0_6, %c0_7] : memref<8x128xf32, #tpu.memory_space<vmem>>, vector<8x128xf32>
    tpu.vector_store %arg7[%c0_6, %c0_7], %7 {strides = array<i32>} : memref<8x128xf32, #tpu.memory_space<vmem>>, vector<8x128xf32>,
    %c0_i32_8 = arith.constant 0 : i32
    %9 = arith.cmpi eq, %arg2, %c0_i32_8 : i32
    %10 = arith.extui %9 : i1 to i32
    %c0_i32_9 = arith.constant 0 : i32
    %11 = arith.cmpi ne, %10, %c0_i32_9 : i32
    scf.if %11 {
      %c0_10 = arith.constant 0 : index
      %c0_11 = arith.constant 0 : index
      %12 = vector.load %arg7[%c0_10, %c0_11] : memref<8x128xf32, #tpu.memory_space<vmem>>, vector<8x128xf32>
      %c0_12 = arith.constant 0 : index
      %c0_13 = arith.constant 0 : index
      %13 = vector.load %arg5[%c0_12, %c0_13] : memref<1x128xf32, #tpu.memory_space<vmem>>, vector<1x128xf32>
      %14 = vector.broadcast %13 : vector<1x128xf32> to vector<8x128xf32>
      %15 = arith.addf %12, %14 : vector<8x128xf32>
      %cst_14 = arith.constant 0.000000e+00 : f32
      %16 = vector.broadcast %cst_14 : f32 to vector<8x128xf32>
      %17 = arith.maximumf %15, %16 : vector<8x128xf32>
      %18 = arith.truncf %17 : vector<8x128xf32> to vector<8x128xbf16>
      %c0_15 = arith.constant 0 : index
      %c0_16 = arith.constant 0 : index
      %19 = vector.load %arg6[%c0_15, %c0_16] : memref<8x128xbf16, #tpu.memory_space<vmem>>, vector<8x128xbf16>
      tpu.vector_store %arg6[%c0_15, %c0_16], %18 {strides = array<i32>} : memref<8x128xbf16, #tpu.memory_space<vmem>>, vector<8x128xbf16>,
    } else {
    }
    return
  }
  func.func @transform_0(%arg0: i32, %arg1: i32, %arg2: i32) -> (i32, i32) {
    %c0_i32 = arith.constant 0 : i32
    return %arg0, %arg2 : i32, i32
  }
  func.func @transform_1(%arg0: i32, %arg1: i32, %arg2: i32) -> (i32, i32) {
    %c0_i32 = arith.constant 0 : i32
    return %arg2, %arg1 : i32, i32
  }
  func.func @transform_2(%arg0: i32, %arg1: i32, %arg2: i32) -> (i32, i32) {
    %c0_i32 = arith.constant 0 : i32
    %c0_i32_0 = arith.constant 0 : i32
    return %c0_i32, %arg1 : i32, i32
  }
  func.func @transform_3(%arg0: i32, %arg1: i32, %arg2: i32) -> (i32, i32) {
    %c0_i32 = arith.constant 0 : i32
    return %arg0, %arg1 : i32, i32
  }
}

module attributes {stable_mosaic.version = 11 : i64} {
  func.func @_matmul_kernel(%arg0: i32, %arg1: i32, %arg2: i32, %arg3: memref<32x128xbf16, #tpu.memory_space<vmem>>, %arg4: memref<128x128xbf16, #tpu.memory_space<vmem>>, %arg5: memref<1x128xf32, #tpu.memory_space<vmem>>, %arg6: memref<32x128xbf16, #tpu.memory_space<vmem>>, %arg7: memref<32x128xf32, #tpu.memory_space<vmem>>) attributes {dimension_semantics = [#tpu.dimension_semantics<parallel>, #tpu.dimension_semantics<parallel>, #tpu.dimension_semantics<arbitrary>], iteration_bounds = array<i64: 1, 1, 1>, scalar_prefetch = 0 : i64, scratch_operands = 1 : i64, tpu.core_type = #tpu.core_type<tc>, window_params = [{transform_indices = @transform_0, window_bounds = array<i64: 32, 128>}, {transform_indices = @transform_1, window_bounds = array<i64: 128, 128>}, {transform_indices = @transform_2, window_bounds = array<i64: 1, 128>}, {transform_indices = @transform_3, window_bounds = array<i64: 32, 128>}]} {
    %c0_i32 = arith.constant 0 : i32
    %0 = arith.cmpi eq, %arg2, %c0_i32 : i32
    %1 = arith.extui %0 : i1 to i32
    %c0_i32_0 = arith.constant 0 : i32
    %2 = arith.cmpi ne, %1, %c0_i32_0 : i32
    scf.if %2 {
      %cst_10 = arith.constant 0.000000e+00 : f32
      %12 = vector.broadcast %cst_10 : f32 to vector<32x128xf32>
      %c0_11 = arith.constant 0 : index
      %c0_12 = arith.constant 0 : index
      %13 = vector.load %arg7[%c0_11, %c0_12] : memref<32x128xf32, #tpu.memory_space<vmem>>, vector<32x128xf32>
      tpu.vector_store %arg7[%c0_11, %c0_12], %12 {strides = array<i32>} : memref<32x128xf32, #tpu.memory_space<vmem>>, vector<32x128xf32>,
    } else {
    }
    %c0 = arith.constant 0 : index
    %c0_1 = arith.constant 0 : index
    %3 = vector.load %arg7[%c0, %c0_1] : memref<32x128xf32, #tpu.memory_space<vmem>>, vector<32x128xf32>
    %c0_2 = arith.constant 0 : index
    %c0_3 = arith.constant 0 : index
    %4 = vector.load %arg3[%c0_2, %c0_3] : memref<32x128xbf16, #tpu.memory_space<vmem>>, vector<32x128xbf16>
    %c0_4 = arith.constant 0 : index
    %c0_5 = arith.constant 0 : index
    %5 = vector.load %arg4[%c0_4, %c0_5] : memref<128x128xbf16, #tpu.memory_space<vmem>>, vector<128x128xbf16>
    %cst = arith.constant dense<0.000000e+00> : vector<32x128xf32>
    %6 = tpu.matmul %4, %5, %cst {dimension_numbers = #tpu.dot_dimension_numbers<[1], [0], [0], [1], [0, 0, 1, 1], [], []>} : vector<32x128xbf16>, vector<128x128xbf16>, vector<32x128xf32> -> vector<32x128xf32>
    %7 = arith.addf %3, %6 : vector<32x128xf32>
    %c0_6 = arith.constant 0 : index
    %c0_7 = arith.constant 0 : index
    %8 = vector.load %arg7[%c0_6, %c0_7] : memref<32x128xf32, #tpu.memory_space<vmem>>, vector<32x128xf32>
    tpu.vector_store %arg7[%c0_6, %c0_7], %7 {strides = array<i32>} : memref<32x128xf32, #tpu.memory_space<vmem>>, vector<32x128xf32>,
    %c0_i32_8 = arith.constant 0 : i32
    %9 = arith.cmpi eq, %arg2, %c0_i32_8 : i32
    %10 = arith.extui %9 : i1 to i32
    %c0_i32_9 = arith.constant 0 : i32
    %11 = arith.cmpi ne, %10, %c0_i32_9 : i32
    scf.if %11 {
      %c0_10 = arith.constant 0 : index
      %c0_11 = arith.constant 0 : index
      %12 = vector.load %arg7[%c0_10, %c0_11] : memref<32x128xf32, #tpu.memory_space<vmem>>, vector<32x128xf32>
      %c0_12 = arith.constant 0 : index
      %c0_13 = arith.constant 0 : index
      %13 = vector.load %arg5[%c0_12, %c0_13] : memref<1x128xf32, #tpu.memory_space<vmem>>, vector<1x128xf32>
      %14 = vector.broadcast %13 : vector<1x128xf32> to vector<32x128xf32>
      %15 = arith.addf %12, %14 : vector<32x128xf32>
      %cst_14 = arith.constant 0.000000e+00 : f32
      %16 = vector.broadcast %cst_14 : f32 to vector<32x128xf32>
      %17 = arith.maximumf %15, %16 : vector<32x128xf32>
      %18 = arith.truncf %17 : vector<32x128xf32> to vector<32x128xbf16>
      %c0_15 = arith.constant 0 : index
      %c0_16 = arith.constant 0 : index
      %19 = vector.load %arg6[%c0_15, %c0_16] : memref<32x128xbf16, #tpu.memory_space<vmem>>, vector<32x128xbf16>
      tpu.vector_store %arg6[%c0_15, %c0_16], %18 {strides = array<i32>} : memref<32x128xbf16, #tpu.memory_space<vmem>>, vector<32x128xbf16>,
    } else {
    }
    return
  }
  func.func @transform_0(%arg0: i32, %arg1: i32, %arg2: i32) -> (i32, i32) {
    %c0_i32 = arith.constant 0 : i32
    return %arg0, %arg2 : i32, i32
  }
  func.func @transform_1(%arg0: i32, %arg1: i32, %arg2: i32) -> (i32, i32) {
    %c0_i32 = arith.constant 0 : i32
    return %arg2, %arg1 : i32, i32
  }
  func.func @transform_2(%arg0: i32, %arg1: i32, %arg2: i32) -> (i32, i32) {
    %c0_i32 = arith.constant 0 : i32
    %c0_i32_0 = arith.constant 0 : i32
    return %c0_i32, %arg1 : i32, i32
  }
  func.func @transform_3(%arg0: i32, %arg1: i32, %arg2: i32) -> (i32, i32) {
    %c0_i32 = arith.constant 0 : i32
    return %arg0, %arg1 : i32, i32
  }
}

module attributes {stable_mosaic.version = 11 : i64} {
  func.func @_matmul_kernel(%arg0: i32, %arg1: i32, %arg2: i32, %arg3: memref<128x128xbf16, #tpu.memory_space<vmem>>, %arg4: memref<128x128xbf16, #tpu.memory_space<vmem>>, %arg5: memref<1x128xf32, #tpu.memory_space<vmem>>, %arg6: memref<128x128xf32, #tpu.memory_space<vmem>>, %arg7: memref<128x128xf32, #tpu.memory_space<vmem>>) attributes {dimension_semantics = [#tpu.dimension_semantics<parallel>, #tpu.dimension_semantics<parallel>, #tpu.dimension_semantics<arbitrary>], iteration_bounds = array<i64: 1, 1, 1>, scalar_prefetch = 0 : i64, scratch_operands = 1 : i64, tpu.core_type = #tpu.core_type<tc>, window_params = [{transform_indices = @transform_0, window_bounds = array<i64: 128, 128>}, {transform_indices = @transform_1, window_bounds = array<i64: 128, 128>}, {transform_indices = @transform_2, window_bounds = array<i64: 1, 128>}, {transform_indices = @transform_3, window_bounds = array<i64: 128, 128>}]} {
    %c0_i32 = arith.constant 0 : i32
    %0 = arith.cmpi eq, %arg2, %c0_i32 : i32
    %1 = arith.extui %0 : i1 to i32
    %c0_i32_0 = arith.constant 0 : i32
    %2 = arith.cmpi ne, %1, %c0_i32_0 : i32
    scf.if %2 {
      %cst_10 = arith.constant 0.000000e+00 : f32
      %12 = vector.broadcast %cst_10 : f32 to vector<128x128xf32>
      %c0_11 = arith.constant 0 : index
      %c0_12 = arith.constant 0 : index
      %13 = vector.load %arg7[%c0_11, %c0_12] : memref<128x128xf32, #tpu.memory_space<vmem>>, vector<128x128xf32>
      tpu.vector_store %arg7[%c0_11, %c0_12], %12 {strides = array<i32>} : memref<128x128xf32, #tpu.memory_space<vmem>>, vector<128x128xf32>,
    } else {
    }
    %c0 = arith.constant 0 : index
    %c0_1 = arith.constant 0 : index
    %3 = vector.load %arg7[%c0, %c0_1] : memref<128x128xf32, #tpu.memory_space<vmem>>, vector<128x128xf32>
    %c0_2 = arith.constant 0 : index
    %c0_3 = arith.constant 0 : index
    %4 = vector.load %arg3[%c0_2, %c0_3] : memref<128x128xbf16, #tpu.memory_space<vmem>>, vector<128x128xbf16>
    %c0_4 = arith.constant 0 : index
    %c0_5 = arith.constant 0 : index
    %5 = vector.load %arg4[%c0_4, %c0_5] : memref<128x128xbf16, #tpu.memory_space<vmem>>, vector<128x128xbf16>
    %cst = arith.constant dense<0.000000e+00> : vector<128x128xf32>
    %6 = tpu.matmul %4, %5, %cst {dimension_numbers = #tpu.dot_dimension_numbers<[1], [0], [0], [1], [0, 0, 1, 1], [], []>} : vector<128x128xbf16>, vector<128x128xbf16>, vector<128x128xf32> -> vector<128x128xf32>
    %7 = arith.addf %3, %6 : vector<128x128xf32>
    %c0_6 = arith.constant 0 : index
    %c0_7 = arith.constant 0 : index
    %8 = vector.load %arg7[%c0_6, %c0_7] : memref<128x128xf32, #tpu.memory_space<vmem>>, vector<128x128xf32>
    tpu.vector_store %arg7[%c0_6, %c0_7], %7 {strides = array<i32>} : memref<128x128xf32, #tpu.memory_space<vmem>>, vector<128x128xf32>,
    %c0_i32_8 = arith.constant 0 : i32
    %9 = arith.cmpi eq, %arg2, %c0_i32_8 : i32
    %10 = arith.extui %9 : i1 to i32
    %c0_i32_9 = arith.constant 0 : i32
    %11 = arith.cmpi ne, %10, %c0_i32_9 : i32
    scf.if %11 {
      %c0_10 = arith.constant 0 : index
      %c0_11 = arith.constant 0 : index
      %12 = vector.load %arg7[%c0_10, %c0_11] : memref<128x128xf32, #tpu.memory_space<vmem>>, vector<128x128xf32>
      %c0_12 = arith.constant 0 : index
      %c0_13 = arith.constant 0 : index
      %13 = vector.load %arg5[%c0_12, %c0_13] : memref<1x128xf32, #tpu.memory_space<vmem>>, vector<1x128xf32>
      %14 = vector.broadcast %13 : vector<1x128xf32> to vector<128x128xf32>
      %15 = arith.addf %12, %14 : vector<128x128xf32>
      %16 = arith.negf %15 : vector<128x128xf32>
      %17 = math.exp %16 : vector<128x128xf32>
      %cst_14 = arith.constant 1.000000e+00 : f32
      %18 = vector.broadcast %cst_14 : f32 to vector<128x128xf32>
      %19 = arith.addf %18, %17 : vector<128x128xf32>
      %20 = arith.divf %18, %19 : vector<128x128xf32>
      %c0_15 = arith.constant 0 : index
      %c0_16 = arith.constant 0 : index
      %21 = vector.load %arg6[%c0_15, %c0_16] : memref<128x128xf32, #tpu.memory_space<vmem>>, vector<128x128xf32>
      tpu.vector_store %arg6[%c0_15, %c0_16], %20 {strides = array<i32>} : memref<128x128xf32, #tpu.memory_space<vmem>>, vector<128x128xf32>,
    } else {
    }
    return
  }
  func.func @transform_0(%arg0: i32, %arg1: i32, %arg2: i32) -> (i32, i32) {
    %c0_i32 = arith.constant 0 : i32
    return %arg0, %arg2 : i32, i32
  }
  func.func @transform_1(%arg0: i32, %arg1: i32, %arg2: i32) -> (i32, i32) {
    %c0_i32 = arith.constant 0 : i32
    return %arg2, %arg1 : i32, i32
  }
  func.func @transform_2(%arg0: i32, %arg1: i32, %arg2: i32) -> (i32, i32) {
    %c0_i32 = arith.constant 0 : i32
    %c0_i32_0 = arith.constant 0 : i32
    return %c0_i32, %arg1 : i32, i32
  }
  func.func @transform_3(%arg0: i32, %arg1: i32, %arg2: i32) -> (i32, i32) {
    %c0_i32 = arith.constant 0 : i32
    return %arg0, %arg1 : i32, i32
  }
}

</mosaic_0001>

<bundles_post_ra>
// kernel: conv_autoencoder_forward.8
= control target key start
LH: loop header
LB: loop body
LE: loop exit
PB: predicated region body
PF: predicated region fallthrough
CT: control target
= control target key end

     0   :  { %v195_v0 = vmov 0.0   ;;  %vm196_vm0 = vmmov 0   ;;  %s250_s1 = inlined_call_operand.vmem [shape: bf16[128,128], index: 1, kind: input, shape index: {}]   ;;  %s251_s0 = inlined_call_operand.vmem [shape: bf16[8,128], index: 0, kind: input, shape index: {}]   ;;  %s252_s2 = inlined_call_operand.vmem [shape: f32[1,128], index: 2, kind: input, shape index: {}]   ;;  %s253_s3 = inlined_call_operand.vmem [shape: bf16[8,128], index: 3, kind: output, shape index: {}]  }
   0x1   :  { %165 = vmatprep.subr.bf16.mxu0 %v195_v0  ;;  %v187_v1 = vld [vmem:[%s250_s1 + $0x38] sm:$0xff]   ;;  %181 = vmatprep.mubr.msk.bf16.mxu0 %vm196_vm0, %v195_v0  ;;  %v188_v2 = vld [vmem:[%s250_s1 + $0x30] sm:$0xff]   ;;  %v189_v3 = vld [vmem:[%s250_s1 + $0x28] sm:$0xff]  }
   0x2   :  { %166 = vmatpush3.bf16.msra.mxu0 %v187_v1  ;;  %v190_v4 = vld [vmem:[%s250_s1 + $0x20] sm:$0xff]   ;;  %v191_v5 = vld [vmem:[%s250_s1 + $0x18] sm:$0xff]   ;;  %v192_v6 = vld [vmem:[%s250_s1 + $0x10] sm:$0xff]  }
   0x3   :  { %167 = vmatprep.subr.bf16.mxu0 %v195_v0  ;;  %v193_v7 = vld [vmem:[%s250_s1 + $0x8] sm:$0xff]   ;;  %v194_v8 = vld [vmem:[%s250_s1] sm:$0xff]  }
   0x4   :  { %v21_v9 = vld [vmem:[%s251_s0] sm:$0xf] }
   0x5   :  { %v155_v10 = vld [vmem:[%s252_s2] ss:$0 sm:$0xff] }
   0x6   :  { %168 = vmatpush3.bf16.msra.mxu0 %v188_v2 }
   0x7   :  { %169 = vmatprep.subr.bf16.mxu0 %v195_v0 }
   0xa   :  { %170 = vmatpush3.bf16.msra.mxu0 %v189_v3 }
   0xb   :  { %171 = vmatprep.subr.bf16.mxu0 %v195_v0 }
   0xe   :  { %172 = vmatpush3.bf16.msra.mxu0 %v190_v4 }
   0xf   :  { %173 = vmatprep.subr.bf16.mxu0 %v195_v0 }
  0x12   :  { %174 = vmatpush3.bf16.msra.mxu0 %v191_v5 }
  0x13   :  { %175 = vmatprep.subr.bf16.mxu0 %v195_v0 }
  0x16   :  { %176 = vmatpush3.bf16.msra.mxu0 %v192_v6 }
  0x17   :  { %177 = vmatprep.subr.bf16.mxu0 %v195_v0 }
  0x1a   :  { %178 = vmatpush3.bf16.msra.mxu0 %v193_v7 }
  0x1b   :  { %179 = vmatprep.subr.bf16.mxu0 %v195_v0 }
  0x1e   :  { %180 = vmatpush3.bf16.msra.mxu0 %v194_v8 }
  0x21   :  { %182 = vmatmul.mubr.bf16.vlgmr.msra.gmra.mxu0 %v21_v9 }
  0xe1   :  { %v120_v11 = vpop.f32.mrf.mxu0 }
  0xe2   :  { %v139_v12 = vadd.f32 %v155_v10, %v120_v11 }
  0xe3   :  { %v183_v13 = vpop.f32.mrf.mxu0 }
  0xe4   :  { %v140_v14 = vmax.f32 %v139_v12, 0.0 }
  0xe5   :  { %v123_v15 = vpop.f32.mrf.mxu0 }
  0xe6   :  { %v141_v16 = vpack.c.bf16 %v140_v14, %v140_v14 }
  0xe7   :  { %v184_v17 = vpop.f32.mrf.mxu0 }
  0xe8   :  { %142 = vst [vmem:[%s253_s3] sm:$0xf] %v141_v16 }

// kernel: conv_autoencoder_forward.9
= control target key start
LH: loop header
LB: loop body
LE: loop exit
PB: predicated region body
PF: predicated region fallthrough
CT: control target
= control target key end

     0   :  { %v194_v0 = vmov 0.0   ;;  %vm195_vm0 = vmmov 0   ;;  %s249_s1 = inlined_call_operand.vmem [shape: bf16[128,128], index: 1, kind: input, shape index: {}]   ;;  %s250_s0 = inlined_call_operand.vmem [shape: bf16[8,128], index: 0, kind: input, shape index: {}]   ;;  %s251_s2 = inlined_call_operand.vmem [shape: f32[1,128], index: 2, kind: input, shape index: {}]   ;;  %s252_s3 = inlined_call_operand.vmem [shape: bf16[8,128], index: 3, kind: output, shape index: {}]  }
   0x1   :  { %164 = vmatprep.subr.bf16.mxu0 %v194_v0  ;;  %v186_v1 = vld [vmem:[%s249_s1 + $0x38] sm:$0xff]   ;;  %180 = vmatprep.mubr.msk.bf16.mxu0 %vm195_vm0, %v194_v0  ;;  %v187_v2 = vld [vmem:[%s249_s1 + $0x30] sm:$0xff]   ;;  %v188_v3 = vld [vmem:[%s249_s1 + $0x28] sm:$0xff]  }
   0x2   :  { %165 = vmatpush3.bf16.msra.mxu0 %v186_v1  ;;  %v189_v4 = vld [vmem:[%s249_s1 + $0x20] sm:$0xff]   ;;  %v190_v5 = vld [vmem:[%s249_s1 + $0x18] sm:$0xff]   ;;  %v191_v6 = vld [vmem:[%s249_s1 + $0x10] sm:$0xff]  }
   0x3   :  { %166 = vmatprep.subr.bf16.mxu0 %v194_v0  ;;  %v192_v7 = vld [vmem:[%s249_s1 + $0x8] sm:$0xff]   ;;  %v193_v8 = vld [vmem:[%s249_s1] sm:$0xff]  }
   0x4   :  { %v21_v9 = vld [vmem:[%s250_s0] sm:$0xf] }
   0x5   :  { %v154_v10 = vld [vmem:[%s251_s2] ss:$0 sm:$0xff] }
   0x6   :  { %167 = vmatpush3.bf16.msra.mxu0 %v187_v2 }
   0x7   :  { %168 = vmatprep.subr.bf16.mxu0 %v194_v0 }
   0xa   :  { %169 = vmatpush3.bf16.msra.mxu0 %v188_v3 }
   0xb   :  { %170 = vmatprep.subr.bf16.mxu0 %v194_v0 }
   0xe   :  { %171 = vmatpush3.bf16.msra.mxu0 %v189_v4 }
   0xf   :  { %172 = vmatprep.subr.bf16.mxu0 %v194_v0 }
  0x12   :  { %173 = vmatpush3.bf16.msra.mxu0 %v190_v5 }
  0x13   :  { %174 = vmatprep.subr.bf16.mxu0 %v194_v0 }
  0x16   :  { %175 = vmatpush3.bf16.msra.mxu0 %v191_v6 }
  0x17   :  { %176 = vmatprep.subr.bf16.mxu0 %v194_v0 }
  0x1a   :  { %177 = vmatpush3.bf16.msra.mxu0 %v192_v7 }
  0x1b   :  { %178 = vmatprep.subr.bf16.mxu0 %v194_v0 }
  0x1e   :  { %179 = vmatpush3.bf16.msra.mxu0 %v193_v8 }
  0x21   :  { %181 = vmatmul.mubr.bf16.vlgmr.msra.gmra.mxu0 %v21_v9 }
  0xe1   :  { %v120_v11 = vpop.f32.mrf.mxu0 }
  0xe2   :  { %v139_v12 = vadd.f32 %v154_v10, %v120_v11 }
  0xe3   :  { %v182_v13 = vpop.f32.mrf.mxu0 }
  0xe4   :  { %v140_v14 = vpack.c.bf16 %v139_v12, %v139_v12 }
  0xe5   :  { %v123_v15 = vpop.f32.mrf.mxu0 }
  0xe6   :  { %141 = vst [vmem:[%s252_s3] sm:$0xf] %v140_v14 }
  0xe7   :  { %v183_v16 = vpop.f32.mrf.mxu0 }

// kernel: conv_autoencoder_forward.10
= control target key start
LH: loop header
LB: loop body
LE: loop exit
PB: predicated region body
PF: predicated region fallthrough
CT: control target
= control target key end

     0   :  { %s339_s1 = inlined_call_operand.vmem [shape: bf16[128,128], index: 1, kind: input, shape index: {}]   ;;  %s340_s0 = inlined_call_operand.vmem [shape: bf16[32,128], index: 0, kind: input, shape index: {}]   ;;  %s341_s2 = inlined_call_operand.vmem [shape: f32[1,128], index: 2, kind: input, shape index: {}]   ;;  %s342_s3 = inlined_call_operand.vmem [shape: bf16[32,128], index: 3, kind: output, shape index: {}]  }
   0x1   :  { %v270_v0 = vld [vmem:[%s339_s1 + $0x38] sm:$0xff]   ;;  %v271_v1 = vld [vmem:[%s339_s1 + $0x30] sm:$0xff]   ;;  %v272_v2 = vld [vmem:[%s339_s1 + $0x28] sm:$0xff]  }
   0x2   :  { %250 = vmatprep.subr.bf16.mxu0 %v270_v0  ;;  %v273_v3 = vld [vmem:[%s339_s1 + $0x20] sm:$0xff]   ;;  %v274_v5 = vld [vmem:[%s339_s1 + $0x18] sm:$0xff]   ;;  %v275_v6 = vld [vmem:[%s339_s1 + $0x10] sm:$0xff]  }
   0x3   :  { %251 = vmatpush3.bf16.msra.mxu0 %v270_v0  ;;  %v278_v4 = vld [vmem:[%s340_s0] sm:$0xff]   ;;  %v276_v7 = vld [vmem:[%s339_s1 + $0x8] sm:$0xff]  }
   0x4   :  { %252 = vmatprep.subr.bf16.mxu0 %v271_v1  ;;  %266 = vmatprep.mubr.bf16.mxu0 %v278_v4  ;;  %v277_v8 = vld [vmem:[%s339_s1] sm:$0xff]   ;;  %v279_v9 = vld [vmem:[%s340_s0 + $0x8] sm:$0xff]  }
   0x5   :  { %v220_v11 = vld [vmem:[%s341_s2] ss:$0 sm:$0xff] }
   0x7   :  { %253 = vmatpush3.bf16.msra.mxu0 %v271_v1 }
   0x8   :  { %254 = vmatprep.subr.bf16.mxu0 %v272_v2 }
   0xb   :  { %255 = vmatpush3.bf16.msra.mxu0 %v272_v2 }
   0xc   :  { %256 = vmatprep.subr.bf16.mxu0 %v273_v3 }
   0xf   :  { %257 = vmatpush3.bf16.msra.mxu0 %v273_v3 }
  0x10   :  { %258 = vmatprep.subr.bf16.mxu0 %v274_v5 }
  0x13   :  { %259 = vmatpush3.bf16.msra.mxu0 %v274_v5 }
  0x14   :  { %260 = vmatprep.subr.bf16.mxu0 %v275_v6 }
  0x17   :  { %261 = vmatpush3.bf16.msra.mxu0 %v275_v6 }
  0x18   :  { %262 = vmatprep.subr.bf16.mxu0 %v276_v7 }
  0x1b   :  { %263 = vmatpush3.bf16.msra.mxu0 %v276_v7 }
  0x1c   :  { %264 = vmatprep.subr.bf16.mxu0 %v277_v8 }
  0x1f   :  { %265 = vmatpush3.bf16.msra.mxu0 %v277_v8 }
  0x22   :  { %267 = vmatmul.mubr.bf16.vlgmr.msra.gmra.mxu0 %v279_v9 }
  0xe2   :  { %v268_v10 = vpop.f32.mrf.mxu0 }
  0xe3   :  { %v180_v13 = vadd.f32 %v268_v10, %v220_v11 }
  0xe4   :  { %v141_v12 = vpop.f32.mrf.mxu0 }
  0xe5   :  { %v178_v15 = vadd.f32 %v220_v11, %v141_v12  ;;  %v184_v18 = vmax.f32 %v180_v13, 0.0 }
  0xe6   :  { %v269_v14 = vpop.f32.mrf.mxu0 }
  0xe7   :  { %v181_v16 = vadd.f32 %v269_v14, %v220_v11  ;;  %v182_v21 = vmax.f32 %v178_v15, 0.0 }
  0xe8   :  { %v144_v17 = vpop.f32.mrf.mxu0 }
  0xe9   :  { %v185_v19 = vmax.f32 %v181_v16, 0.0  ;;  %v179_v20 = vadd.f32 %v220_v11, %v144_v17 }
  0xeb   :  { %v237_v22 = vpack.c.bf16 %v185_v19, %v184_v18  ;;  %v183_v23 = vmax.f32 %v179_v20, 0.0 }
  0xed   :  { %239 = vst [vmem:[%s342_s3 + $0x8] sm:$0xff] %v237_v22   ;;  %v232_v24 = vpack.c.bf16 %v183_v23, %v182_v21 }
  0xef   :  { %233 = vst [vmem:[%s342_s3] sm:$0xff] %v232_v24  }

// kernel: conv_autoencoder_forward.6
= control target key start
LH: loop header
LB: loop body
LE: loop exit
PB: predicated region body
PF: predicated region fallthrough
CT: control target
= control target key end

     0   :  { %s7150_s12 = smov 0   ;;  %s8322_s0 = inlined_call_operand.vmem [shape: bf16[2,2,2,288,3], index: 0, kind: input, shape index: {}]   ;;  %s8323_s1 = inlined_call_operand.vmem [shape: bf16[9,3,128], index: 1, kind: input, shape index: {}]   ;;  %s8324_s2 = inlined_call_operand.vmem [shape: f32[1,128], index: 2, kind: input, shape index: {}]   ;;  %s8325_s3 = inlined_call_operand.vmem [shape: bf16[2,8,8,128], index: 3, kind: output, shape index: {}]  }
   0x1 LB: > { %s5096_s13 = sadd.s32 4294967295, %s7127_s12   ;;  %p5100_p0 = scmp.ge.s32.totalorder %s7127_s12, 1  ;;  %s7127_s12 = sphi %s7150_s12, %s13_s12  }
   0x2   : > { %p137_p1 = scmp.lt.s32.totalorder %s7127_s12, 3 }
   0x4   : > { %p138_p2 = pnand %p5100_p0, %p137_p1 }
   0x5   : > { %p161_p3 = scmp.lt.s32.totalorder (!%p138_p2), %s5096_s13, 1 }
   0x6   : > { %141 = sbr.rel (%p138_p2) target bundleno = 798 (0x31e), region = 32 }
   0xb   : > { %v5136_v0 = vld [vmem:[%s8323_s1 + $0x2] sm:$0x3]  ;;  %vm369_vm0 = vcmask 1040384   ;;  %vm370_vm1 = vcmask 1041408   ;;  %v7129_v1 = vmov 65535   ;;  %s8327_s13 = smov (!%p161_p3, %s5096_s13), 1 }
   0xc   : > { %v371_v2 = vsel %vm369_vm0, 4294967295, %v7129_v1  ;;  %v204_v3 = vld [vmem:[%s8323_s1] sm:$0x3]  ;;  %v5233_v4 = vld [vmem:[%s8323_s1 + $0x4] sm:$0x3]  ;;  %s6825_s22 = smul.u32 576, %s8327_s13 }
   0xd   : > { %v7167_v5 = vsel %vm370_vm1, %v371_v2, 0  ;;  %v5266_v6 = vld [vmem:[%s8323_s1 + $0x6] sm:$0x3]  ;;  %vm320_vm2 = vcmask 23552   ;;  %v5331_v11 = vld [vmem:[%s8323_s1 + $0x8] sm:$0x3] }
   0xe   : > { %v7175_v7 = vand.u32 %v5136_v0, %v7167_v5  ;;  %v7178_v8 = vand.u32 %v7167_v5, %v204_v3  ;;  %v7181_v9 = vand.u32 %v5233_v4, %v7167_v5  ;;  %v7184_v10 = vand.u32 %v5266_v6, %v7167_v5  ;;  %s7194_s25 = scalar_lea.vmem %s8322_s0, %s6825_s22  ;;  %v5396_v12 = vld [vmem:[%s8323_s1 + $0xa] sm:$0x3]  ;;  %v5429_v49 = vld [vmem:[%s8323_s1 + $0xc] sm:$0x3]  ;;  %v5494_v55 = vld [vmem:[%s8323_s1 + $0xe] sm:$0x3] }
   0xf   : > { %v6835_v13 = vld [vmem:[%s7194_s25 + $0x120] sm:$0xff]   ;;  %v6837_v15 = vld [vmem:[%s7194_s25 + $0x128] sm:$0xff]   ;;  %v7211_v17 = vand.u32 %v5331_v11, %v7167_v5  ;;  %v6839_v18 = vld [vmem:[%s7194_s25 + $0x130] sm:$0xff]   ;;  %v7216_v19 = vand.u32 %v5396_v12, %v7167_v5  ;;  %v7290_v54 = vand.u32 %v5429_v49, %v7167_v5  ;;  %v7299_v56 = vand.u32 %v5494_v55, %v7167_v5  ;;  %s5883_s11 = sshll.u32 %s8327_s13, 5 }
  0x10   : > { %6213 = vmatprep.subr.bf16.mxu0 %v7175_v7  ;;  %6247 = vmatprep.subr.bf16.mxu1 %v7178_v8  ;;  %v6836_v14 = vld [vmem:[%s7194_s25] sm:$0xff]   ;;  %v6838_v16 = vld [vmem:[%s7194_s25 + $0x8] sm:$0xff]   ;;  %v6840_v20 = vld [vmem:[%s7194_s25 + $0x10] sm:$0xff]   ;;  %s8278_s13 = scalar_lea.vmem %s8325_s3, %s5883_s11 }
  0x11   : > { %6214 = vmatpush3.bf16.msra.mxu0 %v7175_v7  ;;  %6248 = vmatpush3.bf16.msra.mxu1 %v7178_v8  ;;  %v6841_v21 = vld [vmem:[%s7194_s25 + $0x138] sm:$0xff]   ;;  %v6843_v23 = vld [vmem:[%s7194_s25 + $0x140] sm:$0xff]   ;;  %v6845_v25 = vld [vmem:[%s7194_s25 + $0x148] sm:$0xff]  }
  0x12   : > { %6281 = vmatprep.subr.bf16.mxu0 %v7181_v9  ;;  %6315 = vmatprep.subr.bf16.mxu1 %v7184_v10  ;;  %v6842_v22 = vld [vmem:[%s7194_s25 + $0x18] sm:$0xff]   ;;  %v6844_v24 = vld [vmem:[%s7194_s25 + $0x20] sm:$0xff]   ;;  %v6846_v26 = vld [vmem:[%s7194_s25 + $0x28] sm:$0xff]  }
  0x13   : > { %6215 = vmatprep.mubr.msk.bf16.mxu0 %vm320_vm2, %v6835_v13  ;;  %6249 = vmatprep.mubr.msk.bf16.mxu1 %vm320_vm2, %v6836_v14  ;;  %v6847_v27 = vld [vmem:[%s7194_s25 + $0x150] sm:$0xff]   ;;  %v6849_v29 = vld [vmem:[%s7194_s25 + $0x158] sm:$0xff]   ;;  %v6851_v31 = vld [vmem:[%s7194_s25 + $0x160] sm:$0xff]  }
  0x14   : > { %6216 = vmatmul.mubr.msk.bf16.vlgmr.msra.gmra.mxu0 %vm320_vm2, %v6837_v15  ;;  %6250 = vmatmul.mubr.msk.bf16.vlgmr.msra.gmra.mxu1 %vm320_vm2, %v6838_v16  ;;  %v6848_v28 = vld [vmem:[%s7194_s25 + $0x30] sm:$0xff]   ;;  %v6850_v30 = vld [vmem:[%s7194_s25 + $0x38] sm:$0xff]   ;;  %v6852_v32 = vld [vmem:[%s7194_s25 + $0x40] sm:$0xff]  }
  0x15   : > { %6282 = vmatpush3.bf16.msra.mxu0 %v7181_v9  ;;  %6316 = vmatpush3.bf16.msra.mxu1 %v7184_v10  ;;  %v6853_v33 = vld [vmem:[%s7194_s25 + $0x168] sm:$0xff]   ;;  %v6855_v35 = vld [vmem:[%s7194_s25 + $0x170] sm:$0xff]   ;;  %v6857_v37 = vld [vmem:[%s7194_s25 + $0x178] sm:$0xff]  }
  0x16   : > { %6219 = vmatprep.mubr.msk.bf16.mxu0 %vm320_vm2, %v6839_v18  ;;  %6253 = vmatprep.mubr.msk.bf16.mxu1 %vm320_vm2, %v6840_v20  ;;  %v6854_v34 = vld [vmem:[%s7194_s25 + $0x48] sm:$0xff]   ;;  %v6856_v36 = vld [vmem:[%s7194_s25 + $0x50] sm:$0xff]   ;;  %v6858_v38 = vld [vmem:[%s7194_s25 + $0x58] sm:$0xff]  }
  0x17   : > { %6349 = vmatprep.subr.bf16.mxu0 %v7211_v17  ;;  %6383 = vmatprep.subr.bf16.mxu1 %v7216_v19  ;;  %v6859_v39 = vld [vmem:[%s7194_s25 + $0x180] sm:$0xff]   ;;  %v6861_v41 = vld [vmem:[%s7194_s25 + $0x188] sm:$0xff]   ;;  %v6863_v43 = vld [vmem:[%s7194_s25 + $0x190] sm:$0xff]  }
  0x18   : > { %v6860_v40 = vld [vmem:[%s7194_s25 + $0x60] sm:$0xff]   ;;  %v6862_v42 = vld [vmem:[%s7194_s25 + $0x68] sm:$0xff]   ;;  %v6864_v44 = vld [vmem:[%s7194_s25 + $0x70] sm:$0xff]  }
  0x19   : > { %v6865_v45 = vld [vmem:[%s7194_s25 + $0x198] sm:$0xff]   ;;  %v6867_v47 = vld [vmem:[%s7194_s25 + $0x90] sm:$0xff]   ;;  %v6868_v48 = vld [vmem:[%s7194_s25 + $0x8] sm:$0xff]  }
  0x1a   : > { %v6866_v46 = vld [vmem:[%s7194_s25 + $0x78] sm:$0xff]   ;;  %v6870_v51 = vld [vmem:[%s7194_s25 + $0x10] sm:$0xff]   ;;  %v6871_v52 = vld [vmem:[%s7194_s25 + $0xa0] sm:$0xff]  }
  0x1b   : > { %v6869_v50 = vld [vmem:[%s7194_s25 + $0x98] sm:$0xff]   ;;  %v6873_v57 = vld [vmem:[%s7194_s25 + $0xa8] sm:$0xff]   ;;  %v6874_v58 = vld [vmem:[%s7194_s25 + $0x20] sm:$0xff]  }
  0x1c   : > { %6220 = vmatmul.mubr.msk.bf16.gmra.mxu0 %vm320_vm2, %v6841_v21  ;;  %6254 = vmatmul.mubr.msk.bf16.gmra.mxu1 %vm320_vm2, %v6842_v22  ;;  %v6872_v53 = vld [vmem:[%s7194_s25 + $0x18] sm:$0xff]   ;;  %v6875_v59 = vld [vmem:[%s7194_s25 + $0xb0] sm:$0xff]   ;;  %v6876_v60 = vld [vmem:[%s7194_s25 + $0x28] sm:$0xff]  }
  0x1d   : > { %6223 = vmatprep.mubr.msk.bf16.mxu0 %vm320_vm2, %v6843_v23  ;;  %6257 = vmatprep.mubr.msk.bf16.mxu1 %vm320_vm2, %v6844_v24  ;;  %v6877_v61 = vld [vmem:[%s7194_s25 + $0xb8] sm:$0xff]   ;;  %v6878_v62 = vld [vmem:[%s7194_s25 + $0x30] sm:$0xff]   ;;  %v6879_v63 = vld [vmem:[%s7194_s25 + $0xc0] sm:$0xff]  }
  0x1e   : > { %v6880_v0 = vld [vmem:[%s7194_s25 + $0x38] sm:$0xff]   ;;  %v6881_v1 = vld [vmem:[%s7194_s25 + $0xc8] sm:$0xff]   ;;  %v6882_v2 = vld [vmem:[%s7194_s25 + $0x40] sm:$0xff]  }
  0x1f   : > { %v6883_v3 = vld [vmem:[%s7194_s25 + $0xd0] sm:$0xff]   ;;  %v6884_v4 = vld [vmem:[%s7194_s25 + $0x48] sm:$0xff]   ;;  %v6885_v6 = vld [vmem:[%s7194_s25 + $0xd8] sm:$0xff]  }
  0x20   : > { %v6886_v11 = vld [vmem:[%s7194_s25 + $0x50] sm:$0xff]   ;;  %v6887_v12 = vld [vmem:[%s7194_s25 + $0xe0] sm:$0xff]   ;;  %v6888_v13 = vld [vmem:[%s7194_s25 + $0x58] sm:$0xff]  }
  0x21   : > { %v6889_v14 = vld [vmem:[%s7194_s25 + $0xe8] sm:$0xff]   ;;  %v6890_v15 = vld [vmem:[%s7194_s25 + $0x60] sm:$0xff]   ;;  %v6891_v16 = vld [vmem:[%s7194_s25 + $0xf0] sm:$0xff]  }
  0x22   : > { %v6892_v18 = vld [vmem:[%s7194_s25 + $0x68] sm:$0xff]   ;;  %v6893_v20 = vld [vmem:[%s7194_s25 + $0xf8] sm:$0xff]   ;;  %v6894_v21 = vld [vmem:[%s7194_s25 + $0x70] sm:$0xff]  }
  0x23   : > { %v7349_v22 = vld [vmem:[%s7194_s25 + $0x100] sm:$0xff]   ;;  %v6896_v23 = vld [vmem:[%s7194_s25 + $0x78] sm:$0xff]   ;;  %v7358_v24 = vld [vmem:[%s7194_s25 + $0x108] sm:$0xff]  }
  0x24   : > { %6224 = vmatmul.mubr.msk.bf16.gmra.mxu0 %vm320_vm2, %v6845_v25  ;;  %6258 = vmatmul.mubr.msk.bf16.gmra.mxu1 %vm320_vm2, %v6846_v26  ;;  %v6898_v25 = vld [vmem:[%s7194_s25 + $0x80] sm:$0xff]   ;;  %v6899_v26 = vld [vmem:[%s7194_s25 + $0x128] sm:$0xff]  }
  0x25   : > { %6227 = vmatprep.mubr.msk.bf16.mxu0 %vm320_vm2, %v6847_v27  ;;  %6261 = vmatprep.mubr.msk.bf16.mxu1 %vm320_vm2, %v6848_v28  ;;  %v6900_v27 = vld [vmem:[%s7194_s25 + $0x98] sm:$0xff]   ;;  %v6901_v28 = vld [vmem:[%s7194_s25 + $0x130] sm:$0xff]   ;;  %v6921_v49 = vld [vmem:[%s7194_s25 + $0x180] sm:$0xff]  }
  0x26   : > { %v6926_v55 = vld [vmem:[%s7194_s25 + $0x100] sm:$0xff]  }
  0x2c   : > { %6228 = vmatmul.mubr.msk.bf16.gmra.mxu0 %vm320_vm2, %v6849_v29  ;;  %6262 = vmatmul.mubr.msk.bf16.gmra.mxu1 %vm320_vm2, %v6850_v30  ;;  %v6902_v29 = vld [vmem:[%s7194_s25 + $0xa0] sm:$0xff]   ;;  %v5559_v30 = vld [vmem:[%s8323_s1 + $0x10] sm:$0x3] }
  0x2d   : > { %6231 = vmatprep.mubr.msk.bf16.mxu0 %vm320_vm2, %v6851_v31  ;;  %6265 = vmatprep.mubr.msk.bf16.mxu1 %vm320_vm2, %v6852_v32  ;;  %v6903_v31 = vld [vmem:[%s7194_s25 + $0x138] sm:$0xff]   ;;  %v6904_v32 = vld [vmem:[%s7194_s25 + $0xa8] sm:$0xff]  }
  0x34   : > { %6232 = vmatmul.mubr.msk.bf16.gmra.mxu0 %vm320_vm2, %v6853_v33  ;;  %6266 = vmatmul.mubr.msk.bf16.gmra.mxu1 %vm320_vm2, %v6854_v34  ;;  %v7376_v33 = vand.u32 %v5559_v30, %v7167_v5  ;;  %v6905_v34 = vld [vmem:[%s7194_s25 + $0x140] sm:$0xff]   ;;  %v6907_v5 = vld [vmem:[%s7194_s25 + $0x148] sm:$0xff]  }
  0x35   : > { %6235 = vmatprep.mubr.msk.bf16.mxu0 %vm320_vm2, %v6855_v35  ;;  %6269 = vmatprep.mubr.msk.bf16.mxu1 %vm320_vm2, %v6856_v36  ;;  %v6906_v35 = vld [vmem:[%s7194_s25 + $0xb0] sm:$0xff]   ;;  %v6908_v36 = vld [vmem:[%s7194_s25 + $0xb8] sm:$0xff]  }
  0x3c   : > { %6236 = vmatmul.mubr.msk.bf16.gmra.mxu0 %vm320_vm2, %v6857_v37  ;;  %6270 = vmatmul.mubr.msk.bf16.gmra.mxu1 %vm320_vm2, %v6858_v38  ;;  %v6909_v37 = vld [vmem:[%s7194_s25 + $0x150] sm:$0xff]   ;;  %v6910_v38 = vld [vmem:[%s7194_s25 + $0xc0] sm:$0xff]  }
  0x3d   : > { %6239 = vmatprep.mubr.msk.bf16.mxu0 %vm320_vm2, %v6859_v39  ;;  %6273 = vmatprep.mubr.msk.bf16.mxu1 %vm320_vm2, %v6860_v40  ;;  %v6911_v39 = vld [vmem:[%s7194_s25 + $0x158] sm:$0xff]   ;;  %v6912_v40 = vld [vmem:[%s7194_s25 + $0xc8] sm:$0xff]  }
  0x44   : > { %6240 = vmatmul.mubr.msk.bf16.gmra.mxu0 %vm320_vm2, %v6861_v41  ;;  %6274 = vmatmul.mubr.msk.bf16.gmra.mxu1 %vm320_vm2, %v6862_v42  ;;  %v6913_v41 = vld [vmem:[%s7194_s25 + $0x160] sm:$0xff]   ;;  %v6914_v42 = vld [vmem:[%s7194_s25 + $0xd0] sm:$0xff]  }
  0x45   : > { %6243 = vmatprep.mubr.msk.bf16.mxu0 %vm320_vm2, %v6863_v43  ;;  %6277 = vmatprep.mubr.msk.bf16.mxu1 %vm320_vm2, %v6864_v44  ;;  %v6915_v43 = vld [vmem:[%s7194_s25 + $0x168] sm:$0xff]   ;;  %v6916_v44 = vld [vmem:[%s7194_s25 + $0xd8] sm:$0xff]  }
  0x4c   : > { %6244 = vmatmul.mubr.msk.bf16.gmra.mxu0 %vm320_vm2, %v6865_v45  ;;  %6278 = vmatmul.mubr.msk.bf16.gmra.mxu1 %vm320_vm2, %v6866_v46  ;;  %v6917_v45 = vld [vmem:[%s7194_s25 + $0x170] sm:$0xff]   ;;  %v6918_v46 = vld [vmem:[%s7194_s25 + $0xe0] sm:$0xff]  }
  0x4d   : > { %6283 = vmatprep.mubr.msk.bf16.mxu0 %vm320_vm2, %v6867_v47  ;;  %6317 = vmatprep.mubr.msk.bf16.mxu1 %vm320_vm2, %v6868_v48  ;;  %v6919_v47 = vld [vmem:[%s7194_s25 + $0x178] sm:$0xff]   ;;  %v6920_v48 = vld [vmem:[%s7194_s25 + $0xe8] sm:$0xff]  }
  0x54   : > { %6284 = vmatmul.mubr.msk.bf16.vlgmr.msra.gmra.mxu0 %vm320_vm2, %v6869_v50  ;;  %6318 = vmatmul.mubr.msk.bf16.vlgmr.msra.gmra.mxu1 %vm320_vm2, %v6870_v51  ;;  %v6922_v50 = vld [vmem:[%s7194_s25 + $0xf0] sm:$0xff]   ;;  %v6923_v51 = vld [vmem:[%s7194_s25 + $0x188] sm:$0xff]  }
  0x55   : > { %6350 = vmatpush3.bf16.msra.mxu0 %v7211_v17  ;;  %6384 = vmatpush3.bf16.msra.mxu1 %v7216_v19 }
  0x56   : > { %6287 = vmatprep.mubr.msk.bf16.mxu0 %vm320_vm2, %v6871_v52  ;;  %6321 = vmatprep.mubr.msk.bf16.mxu1 %vm320_vm2, %v6872_v53  ;;  %v6924_v52 = vld [vmem:[%s7194_s25 + $0xf8] sm:$0xff]   ;;  %v6925_v53 = vld [vmem:[%s7194_s25 + $0x190] sm:$0xff]  }
  0x57   : > { %6417 = vmatprep.subr.bf16.mxu0 %v7290_v54  ;;  %6451 = vmatprep.subr.bf16.mxu1 %v7299_v56 }
  0x5c   : > { %6288 = vmatmul.mubr.msk.bf16.gmra.mxu0 %vm320_vm2, %v6873_v57  ;;  %6322 = vmatmul.mubr.msk.bf16.gmra.mxu1 %vm320_vm2, %v6874_v58  ;;  %v6927_v57 = vld [vmem:[%s7194_s25 + $0x198] sm:$0xff]   ;;  %v6928_v58 = vld [vmem:[%s7194_s25 + $0x108] sm:$0xff]  }
  0x5d   : > { %6291 = vmatprep.mubr.msk.bf16.mxu0 %vm320_vm2, %v6875_v59  ;;  %6325 = vmatprep.mubr.msk.bf16.mxu1 %vm320_vm2, %v6876_v60  ;;  %v6929_v59 = vld [vmem:[%s7194_s25 + $0x1a0] sm:$0xff]   ;;  %v6930_v60 = vld [vmem:[%s7194_s25 + $0x110] sm:$0xff]  }
  0x64   : > { %6292 = vmatmul.mubr.msk.bf16.gmra.mxu0 %vm320_vm2, %v6877_v61  ;;  %6326 = vmatmul.mubr.msk.bf16.gmra.mxu1 %vm320_vm2, %v6878_v62  ;;  %v6931_v61 = vld [vmem:[%s7194_s25 + $0x10] sm:$0xff]  }
  0x65   : > { %6295 = vmatprep.mubr.msk.bf16.mxu0 %vm320_vm2, %v6879_v63  ;;  %6329 = vmatprep.mubr.msk.bf16.mxu1 %vm320_vm2, %v6880_v0  ;;  %v6932_v62 = vld [vmem:[%s7194_s25 + $0x130] sm:$0xff]   ;;  %v6933_v63 = vld [vmem:[%s7194_s25 + $0x18] sm:$0xff]  }
  0x66   : > { %v6934_v0 = vld [vmem:[%s7194_s25 + $0x138] sm:$0xff]  }
  0x6c   : > { %6296 = vmatmul.mubr.msk.bf16.gmra.mxu0 %vm320_vm2, %v6881_v1  ;;  %6330 = vmatmul.mubr.msk.bf16.gmra.mxu1 %vm320_vm2, %v6882_v2  ;;  %v6935_v1 = vld [vmem:[%s7194_s25 + $0x20] sm:$0xff]  }
  0x6d   : > { %6299 = vmatprep.mubr.msk.bf16.mxu0 %vm320_vm2, %v6883_v3  ;;  %6333 = vmatprep.mubr.msk.bf16.mxu1 %vm320_vm2, %v6884_v4  ;;  %v6936_v2 = vld [vmem:[%s7194_s25 + $0x140] sm:$0xff]  }
  0x74   : > { %6300 = vmatmul.mubr.msk.bf16.gmra.mxu0 %vm320_vm2, %v6885_v6  ;;  %6334 = vmatmul.mubr.msk.bf16.gmra.mxu1 %vm320_vm2, %v6886_v11 }
  0x75   : > { %6303 = vmatprep.mubr.msk.bf16.mxu0 %vm320_vm2, %v6887_v12  ;;  %6337 = vmatprep.mubr.msk.bf16.mxu1 %vm320_vm2, %v6888_v13 }
  0x7c   : > { %6304 = vmatmul.mubr.msk.bf16.gmra.mxu0 %vm320_vm2, %v6889_v14  ;;  %6338 = vmatmul.mubr.msk.bf16.gmra.mxu1 %vm320_vm2, %v6890_v15  ;;  %v6937_v15 = vld [vmem:[%s7194_s25 + $0x28] sm:$0xff]  }
  0x7d   : > { %6307 = vmatprep.mubr.msk.bf16.mxu0 %vm320_vm2, %v6891_v16  ;;  %6341 = vmatprep.mubr.msk.bf16.mxu1 %vm320_vm2, %v6892_v18  ;;  %v6938_v18 = vld [vmem:[%s7194_s25 + $0x148] sm:$0xff]  }
  0x84   : > { %6308 = vmatmul.mubr.msk.bf16.gmra.mxu0 %vm320_vm2, %v6893_v20  ;;  %6342 = vmatmul.mubr.msk.bf16.gmra.mxu1 %vm320_vm2, %v6894_v21  ;;  %v6939_v20 = vld [vmem:[%s7194_s25 + $0x30] sm:$0xff]  }
  0x85   : > { %6311 = vmatprep.mubr.msk.bf16.mxu0 %vm320_vm2, %v7349_v22  ;;  %6345 = vmatprep.mubr.msk.bf16.mxu1 %vm320_vm2, %v6896_v23 }
  0x8c   : > { %6312 = vmatmul.mubr.msk.bf16.gmra.mxu0 %vm320_vm2, %v7358_v24  ;;  %6346 = vmatmul.mubr.msk.bf16.gmra.mxu1 %vm320_vm2, %v6898_v25 }
  0x8d   : > { %6351 = vmatprep.mubr.msk.bf16.mxu0 %vm320_vm2, %v6899_v26  ;;  %6385 = vmatprep.mubr.msk.bf16.mxu1 %vm320_vm2, %v6900_v27 }
  0x94   : > { %6352 = vmatmul.mubr.msk.bf16.vlgmr.msra.gmra.mxu0 %vm320_vm2, %v6901_v28  ;;  %6386 = vmatmul.mubr.msk.bf16.vlgmr.msra.gmra.mxu1 %vm320_vm2, %v6902_v29 }
  0x95   : > { %6418 = vmatpush3.bf16.msra.mxu0 %v7290_v54  ;;  %6452 = vmatpush3.bf16.msra.mxu1 %v7299_v56 }
  0x96   : > { %6355 = vmatprep.mubr.msk.bf16.mxu0 %vm320_vm2, %v6903_v31  ;;  %6389 = vmatprep.mubr.msk.bf16.mxu1 %vm320_vm2, %v6904_v32  ;;  %v6941_v32 = vld [vmem:[%s7194_s25 + $0x38] sm:$0xff]  }
  0x97   : > { %6485 = vmatprep.subr.bf16.mxu0 %v7376_v33  ;;  %6519 = vmatprep.subr.bf16.mxu1 %v7175_v7 }
  0x9c   : > { %6356 = vmatmul.mubr.msk.bf16.gmra.mxu0 %vm320_vm2, %v6905_v34  ;;  %6390 = vmatmul.mubr.msk.bf16.gmra.mxu1 %vm320_vm2, %v6906_v35  ;;  %v6942_v35 = vld [vmem:[%s7194_s25 + $0x158] sm:$0xff]  }
  0x9d   : > { %6359 = vmatprep.mubr.msk.bf16.mxu0 %vm320_vm2, %v6907_v5  ;;  %6393 = vmatprep.mubr.msk.bf16.mxu1 %vm320_vm2, %v6908_v36  ;;  %v6943_v5 = vld [vmem:[%s7194_s25 + $0x40] sm:$0xff]  }
  0xa4   : > { %6360 = vmatmul.mubr.msk.bf16.gmra.mxu0 %vm320_vm2, %v6909_v37  ;;  %6394 = vmatmul.mubr.msk.bf16.gmra.mxu1 %vm320_vm2, %v6910_v38  ;;  %v6944_v37 = vld [vmem:[%s7194_s25 + $0x160] sm:$0xff]  }
  0xa5   : > { %6363 = vmatprep.mubr.msk.bf16.mxu0 %vm320_vm2, %v6911_v39  ;;  %6397 = vmatprep.mubr.msk.bf16.mxu1 %vm320_vm2, %v6912_v40 }
  0xac   : > { %6364 = vmatmul.mubr.msk.bf16.gmra.mxu0 %vm320_vm2, %v6913_v41  ;;  %6398 = vmatmul.mubr.msk.bf16.gmra.mxu1 %vm320_vm2, %v6914_v42 }
  0xad   : > { %6367 = vmatprep.mubr.msk.bf16.mxu0 %vm320_vm2, %v6915_v43  ;;  %6401 = vmatprep.mubr.msk.bf16.mxu1 %vm320_vm2, %v6916_v44 }
  0xb4   : > { %6368 = vmatmul.mubr.msk.bf16.gmra.mxu0 %vm320_vm2, %v6917_v45  ;;  %6402 = vmatmul.mubr.msk.bf16.gmra.mxu1 %vm320_vm2, %v6918_v46  ;;  %v6945_v46 = vld [vmem:[%s7194_s25 + $0x48] sm:$0xff]  }
  0xb5   : > { %6371 = vmatprep.mubr.msk.bf16.mxu0 %vm320_vm2, %v6919_v47  ;;  %6405 = vmatprep.mubr.msk.bf16.mxu1 %vm320_vm2, %v6920_v48  ;;  %v6946_v48 = vld [vmem:[%s7194_s25 + $0x168] sm:$0xff]  }
  0xbc   : > { %6372 = vmatmul.mubr.msk.bf16.gmra.mxu0 %vm320_vm2, %v6921_v49  ;;  %6406 = vmatmul.mubr.msk.bf16.gmra.mxu1 %vm320_vm2, %v6922_v50  ;;  %v6947_v49 = vld [vmem:[%s7194_s25 + $0x50] sm:$0xff]  }
  0xbd   : > { %6375 = vmatprep.mubr.msk.bf16.mxu0 %vm320_vm2, %v6923_v51  ;;  %6409 = vmatprep.mubr.msk.bf16.mxu1 %vm320_vm2, %v6924_v52  ;;  %v6948_v51 = vld [vmem:[%s7194_s25 + $0x170] sm:$0xff]  }
  0xc4   : > { %6376 = vmatmul.mubr.msk.bf16.gmra.mxu0 %vm320_vm2, %v6925_v53  ;;  %6410 = vmatmul.mubr.msk.bf16.gmra.mxu1 %vm320_vm2, %v6926_v55 }
  0xc5   : > { %6379 = vmatprep.mubr.msk.bf16.mxu0 %vm320_vm2, %v6927_v57  ;;  %6413 = vmatprep.mubr.msk.bf16.mxu1 %vm320_vm2, %v6928_v58 }
  0xcc   : > { %6380 = vmatmul.mubr.msk.bf16.gmra.mxu0 %vm320_vm2, %v6929_v59  ;;  %6414 = vmatmul.mubr.msk.bf16.gmra.mxu1 %vm320_vm2, %v6930_v60 }
  0xcd   : > { %6419 = vmatprep.mubr.msk.bf16.mxu0 %vm320_vm2, %v6931_v61  ;;  %6453 = vmatprep.mubr.msk.bf16.mxu1 %vm320_vm2, %v6932_v62  ;;  %v6949_v62 = vld [vmem:[%s7194_s25 + $0x58] sm:$0xff]  }
  0xd4   : > { %v6217_v3 = vpop.f32.mrf.mxu0  ;;  %6420 = vmatmul.mubr.msk.bf16.vlgmr.msra.gmra.mxu0 %vm320_vm2, %v6933_v63  ;;  %v6251_v4 = vpop.f32.mrf.mxu1  ;;  %6454 = vmatmul.mubr.msk.bf16.vlgmr.msra.gmra.mxu1 %vm320_vm2, %v6934_v0  ;;  %v6950_v0 = vld [vmem:[%s7194_s25 + $0x178] sm:$0xff]  }
  0xd5   : > { %6486 = vmatpush3.bf16.msra.mxu0 %v7376_v33  ;;  %v7449_v6 = vadd.f32 %v6251_v4, %v6217_v3  ;;  %6520 = vmatpush3.bf16.msra.mxu1 %v7175_v7  ;;  %v6940_v7 = vld [vmem:[%s7194_s25 + $0x150] sm:$0xff]   ;;  %v6952_v3 = vld [vmem:[%s7194_s25 + $0x180] sm:$0xff]  }
  0xd6   : > { %v410_v11 = vpop.f32.mrf.mxu0  ;;  %6423 = vmatprep.mubr.msk.bf16.mxu0 %vm320_vm2, %v6935_v1  ;;  %v686_v12 = vpop.f32.mrf.mxu1  ;;  %6457 = vmatprep.mubr.msk.bf16.mxu1 %vm320_vm2, %v6936_v2  ;;  %v6951_v1 = vld [vmem:[%s7194_s25 + $0x60] sm:$0xff]  }
  0xd7   : > { %6553 = vmatprep.subr.bf16.mxu0 %v7178_v8  ;;  %v7455_v13 = vadd.f32 %v686_v12, %v410_v11  ;;  %6587 = vmatprep.subr.bf16.mxu1 %v7181_v9 }
  0xd8   : > { %v6218_v14 = vpop.f32.mrf.mxu0  ;;  %v6252_v16 = vpop.f32.mrf.mxu1 }
  0xda   : > { %v413_v21 = vpop.f32.mrf.mxu0  ;;  %v689_v23 = vpop.f32.mrf.mxu1 }
  0xdb   : > { %v6953_v21 = vld [vmem:[%s7194_s25 + $0x68] sm:$0xff]  }
  0xdc   : > { %v6221_v25 = vpop.f32.mrf.mxu0  ;;  %6424 = vmatmul.mubr.msk.bf16.gmra.mxu0 %vm320_vm2, %v6937_v15  ;;  %v6255_v26 = vpop.f32.mrf.mxu1  ;;  %6458 = vmatmul.mubr.msk.bf16.gmra.mxu1 %vm320_vm2, %v6938_v18  ;;  %v6954_v23 = vld [vmem:[%s7194_s25 + $0x188] sm:$0xff]  }
  0xdd   : > { %6427 = vmatprep.mubr.msk.bf16.mxu0 %vm320_vm2, %v6939_v20  ;;  %v7465_v27 = vadd.f32 %v6255_v26, %v6221_v25  ;;  %6461 = vmatprep.mubr.msk.bf16.mxu1 %vm320_vm2, %v6940_v7  ;;  %v6955_v25 = vld [vmem:[%s7194_s25 + $0x70] sm:$0xff]  }
  0xde   : > { %v424_v28 = vpop.f32.mrf.mxu0  ;;  %v700_v29 = vpop.f32.mrf.mxu1 }
  0xdf   : > { %v7468_v30 = vadd.f32 %v700_v29, %v424_v28  ;;  %v6956_v28 = vld [vmem:[%s7194_s25 + $0x190] sm:$0xff]  }
  0xe0   : > { %v6222_v31 = vpop.f32.mrf.mxu0  ;;  %v6256_v34 = vpop.f32.mrf.mxu1 }
  0xe2   : > { %v427_v36 = vpop.f32.mrf.mxu0  ;;  %v703_v38 = vpop.f32.mrf.mxu1 }
  0xe3   : > { %v6957_v38 = vld [vmem:[%s7194_s25 + $0x78] sm:$0xff]  }
  0xe4   : > { %v6225_v39 = vpop.f32.mrf.mxu0  ;;  %6428 = vmatmul.mubr.msk.bf16.gmra.mxu0 %vm320_vm2, %v6941_v32  ;;  %v6259_v40 = vpop.f32.mrf.mxu1  ;;  %6462 = vmatmul.mubr.msk.bf16.gmra.mxu1 %vm320_vm2, %v6942_v35 }
  0xe5   : > { %6431 = vmatprep.mubr.msk.bf16.mxu0 %vm320_vm2, %v6943_v5  ;;  %v7477_v41 = vadd.f32 %v6259_v40, %v6225_v39  ;;  %6465 = vmatprep.mubr.msk.bf16.mxu1 %vm320_vm2, %v6944_v37  ;;  %v6958_v40 = vld [vmem:[%s7194_s25 + $0x198] sm:$0xff]  }
  0xe6   : > { %v438_v42 = vpop.f32.mrf.mxu0  ;;  %v714_v43 = vpop.f32.mrf.mxu1 }
  0xe7   : > { %v7480_v44 = vadd.f32 %v714_v43, %v438_v42  ;;  %v6959_v42 = vld [vmem:[%s7194_s25 + $0x80] sm:$0xff]  }
  0xe8   : > { %v6226_v45 = vpop.f32.mrf.mxu0  ;;  %v6260_v47 = vpop.f32.mrf.mxu1 }
  0xe9   : > { %v6960_v45 = vld [vmem:[%s7194_s25 + $0x1a0] sm:$0xff]  }
  0xea   : > { %v441_v50 = vpop.f32.mrf.mxu0  ;;  %v717_v52 = vpop.f32.mrf.mxu1 }
  0xec   : > { %v6229_v53 = vpop.f32.mrf.mxu0  ;;  %6432 = vmatmul.mubr.msk.bf16.gmra.mxu0 %vm320_vm2, %v6945_v46  ;;  %v6263_v55 = vpop.f32.mrf.mxu1  ;;  %6466 = vmatmul.mubr.msk.bf16.gmra.mxu1 %vm320_vm2, %v6946_v48 }
  0xed   : > { %6435 = vmatprep.mubr.msk.bf16.mxu0 %vm320_vm2, %v6947_v49  ;;  %v7489_v57 = vadd.f32 %v6263_v55, %v6229_v53  ;;  %6469 = vmatprep.mubr.msk.bf16.mxu1 %vm320_vm2, %v6948_v51  ;;  %v6961_v55 = vld [vmem:[%s7194_s25 + $0x88] sm:$0xff]  }
  0xee   : > { %v452_v58 = vpop.f32.mrf.mxu0  ;;  %v728_v59 = vpop.f32.mrf.mxu1 }
  0xef   : > { %v7492_v60 = vadd.f32 %v728_v59, %v452_v58  ;;  %v6962_v59 = vld [vmem:[%s7194_s25 + $0x1a8] sm:$0xff]  }
  0xf0   : > { %v6230_v61 = vpop.f32.mrf.mxu0  ;;  %v6264_v63 = vpop.f32.mrf.mxu1 }
  0xf1   : > { %v6963_v61 = vld [vmem:[%s7194_s25 + $0xa0] sm:$0xff]  }
  0xf2   : > { %v455_v2 = vpop.f32.mrf.mxu0  ;;  %v731_v4 = vpop.f32.mrf.mxu1 }
  0xf3   : > { %v7027_v4 = vld [vmem:[%s7194_s25 + $0x90] sm:$0xff]  }
  0xf4   : > { %v6233_v11 = vpop.f32.mrf.mxu0  ;;  %6436 = vmatmul.mubr.msk.bf16.gmra.mxu0 %vm320_vm2, %v6949_v62  ;;  %v6267_v12 = vpop.f32.mrf.mxu1  ;;  %6470 = vmatmul.mubr.msk.bf16.gmra.mxu1 %vm320_vm2, %v6950_v0 }
  0xf5   : > { %6439 = vmatprep.mubr.msk.bf16.mxu0 %vm320_vm2, %v6951_v1  ;;  %v7501_v14 = vadd.f32 %v6267_v12, %v6233_v11  ;;  %6473 = vmatprep.mubr.msk.bf16.mxu1 %vm320_vm2, %v6952_v3 }
  0xf6   : > { %v466_v15 = vpop.f32.mrf.mxu0  ;;  %v742_v16 = vpop.f32.mrf.mxu1 }
  0xf7   : > { %v7504_v18 = vadd.f32 %v742_v16, %v466_v15  ;;  %v6964_v16 = vld [vmem:[%s7194_s25 + $0xa8] sm:$0xff]  }
  0xf8   : > { %v6234_v20 = vpop.f32.mrf.mxu0  ;;  %v6268_v7 = vpop.f32.mrf.mxu1 }
  0xf9   : > { %v6965_v7 = vld [vmem:[%s7194_s25 + $0xb0] sm:$0xff]  }
  0xfa   : > { %v469_v26 = vpop.f32.mrf.mxu0  ;;  %v745_v29 = vpop.f32.mrf.mxu1 }
  0xfb   : > { %v7028_v29 = vld [vmem:[%s7194_s25 + $0x98] sm:$0xff]  }
  0xfc   : > { %v6237_v31 = vpop.f32.mrf.mxu0  ;;  %6440 = vmatmul.mubr.msk.bf16.gmra.mxu0 %vm320_vm2, %v6953_v21  ;;  %v6271_v32 = vpop.f32.mrf.mxu1  ;;  %6474 = vmatmul.mubr.msk.bf16.gmra.mxu1 %vm320_vm2, %v6954_v23 }
  0xfd   : > { %6443 = vmatprep.mubr.msk.bf16.mxu0 %vm320_vm2, %v6955_v25  ;;  %v7513_v34 = vadd.f32 %v6271_v32, %v6237_v31  ;;  %6477 = vmatprep.mubr.msk.bf16.mxu1 %vm320_vm2, %v6956_v28 }
  0xfe   : > { %v480_v35 = vpop.f32.mrf.mxu0  ;;  %v756_v5 = vpop.f32.mrf.mxu1 }
  0xff   : > { %v7516_v36 = vadd.f32 %v756_v5, %v480_v35 }
 0x100   : > { %v6238_v37 = vpop.f32.mrf.mxu0  ;;  %v6272_v39 = vpop.f32.mrf.mxu1 }
 0x101   : > { %v7029_v37 = vld [vmem:[%s7194_s25 + $0xa0] sm:$0xff]  }
 0x102   : > { %v483_v43 = vpop.f32.mrf.mxu0  ;;  %v759_v46 = vpop.f32.mrf.mxu1  ;;  %v6967_v39 = vld [vmem:[%s7194_s25 + $0xc0] sm:$0xff]  }
 0x103   : > { %v7030_v46 = vld [vmem:[%s7194_s25 + $0xa8] sm:$0xff]  }
 0x104   : > { %v6241_v47 = vpop.f32.mrf.mxu0  ;;  %6444 = vmatmul.mubr.msk.bf16.gmra.mxu0 %vm320_vm2, %v6957_v38  ;;  %v6275_v48 = vpop.f32.mrf.mxu1  ;;  %6478 = vmatmul.mubr.msk.bf16.gmra.mxu1 %vm320_vm2, %v6958_v40  ;;  %v6966_v38 = vld [vmem:[%s7194_s25 + $0xb8] sm:$0xff]  }
 0x105   : > { %6447 = vmatprep.mubr.msk.bf16.mxu0 %vm320_vm2, %v6959_v42  ;;  %v7525_v49 = vadd.f32 %v6275_v48, %v6241_v47  ;;  %6481 = vmatprep.mubr.msk.bf16.mxu1 %vm320_vm2, %v6960_v45  ;;  %v7031_v48 = vld [vmem:[%s7194_s25 + $0xb0] sm:$0xff]  }
 0x106   : > { %v494_v50 = vpop.f32.mrf.mxu0  ;;  %v770_v51 = vpop.f32.mrf.mxu1 }
 0x107   : > { %v7528_v52 = vadd.f32 %v770_v51, %v494_v50 }
 0x108   : > { %v6242_v53 = vpop.f32.mrf.mxu0  ;;  %v6276_v58 = vpop.f32.mrf.mxu1 }
 0x109   : > { %v6968_v58 = vld [vmem:[%s7194_s25 + $0xc8] sm:$0xff]  }
 0x10a   : > { %v497_v62 = vpop.f32.mrf.mxu0  ;;  %v773_v63 = vpop.f32.mrf.mxu1 }
 0x10c   : > { %v6245_v0 = vpop.f32.mrf.mxu0  ;;  %6448 = vmatmul.mubr.msk.bf16.gmra.mxu0 %vm320_vm2, %v6961_v55  ;;  %v6279_v1 = vpop.f32.mrf.mxu1  ;;  %6482 = vmatmul.mubr.msk.bf16.gmra.mxu1 %vm320_vm2, %v6962_v59 }
 0x10d   : > { %6487 = vmatprep.mubr.msk.bf16.mxu0 %vm320_vm2, %v6963_v61  ;;  %v7536_v2 = vadd.f32 %v6279_v1, %v6245_v0  ;;  %6521 = vmatprep.mubr.msk.bf16.mxu1 %vm320_vm2, %v7027_v4  ;;  %v6969_v61 = vld [vmem:[%s7194_s25 + $0xd0] sm:$0xff]   ;;  %v7032_v4 = vld [vmem:[%s7194_s25 + $0xb8] sm:$0xff]  }
 0x10e   : > { %v508_v3 = vpop.f32.mrf.mxu0  ;;  %v784_v11 = vpop.f32.mrf.mxu1 }
 0x10f   : > { %v7540_v12 = vadd.f32 %v784_v11, %v508_v3  ;;  %v7033_v11 = vld [vmem:[%s7194_s25 + $0xc0] sm:$0xff]  }
 0x110   : > { %v6246_v15 = vpop.f32.mrf.mxu0  ;;  %v6280_v20 = vpop.f32.mrf.mxu1 }
 0x112   : > { %v511_v21 = vpop.f32.mrf.mxu0  ;;  %v787_v23 = vpop.f32.mrf.mxu1 }
 0x114   : > { %v6285_v25 = vpop.f32.mrf.mxu0  ;;  %6488 = vmatmul.mubr.msk.bf16.vlgmr.msra.gmra.mxu0 %vm320_vm2, %v6964_v16  ;;  %v6319_v28 = vpop.f32.mrf.mxu1  ;;  %6522 = vmatmul.mubr.msk.bf16.vlgmr.msra.gmra.mxu1 %vm320_vm2, %v7028_v29 }
 0x115   : > { %v1109_v26 = vadd.f32 %v6285_v25, %v7449_v6  ;;  %6554 = vmatpush3.bf16.msra.mxu0 %v7178_v8  ;;  %6588 = vmatpush3.bf16.msra.mxu1 %v7181_v9  ;;  %v6971_v25 = vld [vmem:[%s7194_s25 + $0xe0] sm:$0xff]  }
 0x116   : > { %v997_v31 = vpop.f32.mrf.mxu0  ;;  %6491 = vmatprep.mubr.msk.bf16.mxu0 %vm320_vm2, %v6965_v7  ;;  %v1323_v5 = vpop.f32.mrf.mxu1  ;;  %6525 = vmatprep.mubr.msk.bf16.mxu1 %vm320_vm2, %v7029_v37  ;;  %v6970_v7 = vld [vmem:[%s7194_s25 + $0xd8] sm:$0xff]   ;;  %v7035_v37 = vld [vmem:[%s7194_s25 + $0xd0] sm:$0xff]  }
 0x117   : > { %v7551_v32 = vadd.f32 %v6319_v28, %v1109_v26  ;;  %v1108_v35 = vadd.f32 %v997_v31, %v7455_v13  ;;  %6621 = vmatprep.subr.bf16.mxu0 %v7184_v10  ;;  %6655 = vmatprep.subr.bf16.mxu1 %v7211_v17 }
 0x118   : > { %v6286_v6 = vpop.f32.mrf.mxu0  ;;  %v6320_v9 = vpop.f32.mrf.mxu1 }
 0x119   : > { %v7559_v8 = vadd.f32 %v1323_v5, %v1108_v35  ;;  %v7034_v5 = vld [vmem:[%s7194_s25 + $0xc8] sm:$0xff]  }
 0x11a   : > { %v1000_v40 = vpop.f32.mrf.mxu0  ;;  %v1326_v42 = vpop.f32.mrf.mxu1 }
 0x11b   : > { %v6972_v40 = vld [vmem:[%s7194_s25 + $0xe8] sm:$0xff]  }
 0x11c   : > { %v6289_v13 = vpop.f32.mrf.mxu0  ;;  %6492 = vmatmul.mubr.msk.bf16.gmra.mxu0 %vm320_vm2, %v6966_v38  ;;  %v6323_v45 = vpop.f32.mrf.mxu1  ;;  %6526 = vmatmul.mubr.msk.bf16.gmra.mxu1 %vm320_vm2, %v7030_v46 }
 0x11d   : > { %v1111_v43 = vadd.f32 %v6289_v13, %v7465_v27  ;;  %6495 = vmatprep.mubr.msk.bf16.mxu0 %vm320_vm2, %v6967_v39  ;;  %6529 = vmatprep.mubr.msk.bf16.mxu1 %vm320_vm2, %v7031_v48  ;;  %v6973_v13 = vld [vmem:[%s7194_s25 + $0xf0] sm:$0xff]  }
 0x11e   : > { %v1011_v47 = vpop.f32.mrf.mxu0  ;;  %v1337_v53 = vpop.f32.mrf.mxu1 }
 0x11f   : > { %v7569_v50 = vadd.f32 %v6323_v45, %v1111_v43  ;;  %v1110_v51 = vadd.f32 %v1011_v47, %v7468_v30 }
 0x120   : > { %v6290_v55 = vpop.f32.mrf.mxu0  ;;  %v6324_v59 = vpop.f32.mrf.mxu1 }
 0x121   : > { %v7573_v27 = vadd.f32 %v1337_v53, %v1110_v51  ;;  %v7036_v51 = vld [vmem:[%s7194_s25 + $0xd8] sm:$0xff]   ;;  %v7037_v53 = vld [vmem:[%s7194_s25 + $0xe0] sm:$0xff]  }
 0x122   : > { %v1014_v62 = vpop.f32.mrf.mxu0  ;;  %v1340_v63 = vpop.f32.mrf.mxu1 }
 0x123   : > { %v6974_v62 = vld [vmem:[%s7194_s25 + $0xf8] sm:$0xff]  }
 0x124   : > { %v6293_v0 = vpop.f32.mrf.mxu0  ;;  %6496 = vmatmul.mubr.msk.bf16.gmra.mxu0 %vm320_vm2, %v6968_v58  ;;  %v6327_v3 = vpop.f32.mrf.mxu1  ;;  %6530 = vmatmul.mubr.msk.bf16.gmra.mxu1 %vm320_vm2, %v7032_v4 }
 0x125   : > { %v1113_v1 = vadd.f32 %v6293_v0, %v7477_v41  ;;  %6499 = vmatprep.mubr.msk.bf16.mxu0 %vm320_vm2, %v6969_v61  ;;  %6533 = vmatprep.mubr.msk.bf16.mxu1 %vm320_vm2, %v7033_v11  ;;  %v6975_v0 = vld [vmem:[%s7194_s25 + $0x100] sm:$0xff]  }
 0x126   : > { %v1025_v30 = vpop.f32.mrf.mxu0  ;;  %v1351_v20 = vpop.f32.mrf.mxu1 }
 0x127   : > { %v7583_v15 = vadd.f32 %v6327_v3, %v1113_v1  ;;  %v1112_v16 = vadd.f32 %v1025_v30, %v7480_v44 }
 0x128   : > { %v6294_v21 = vpop.f32.mrf.mxu0  ;;  %v6328_v23 = vpop.f32.mrf.mxu1 }
 0x129   : > { %v7587_v41 = vadd.f32 %v1351_v20, %v1112_v16  ;;  %v7038_v16 = vld [vmem:[%s7194_s25 + $0xe8] sm:$0xff]   ;;  %v7039_v20 = vld [vmem:[%s7194_s25 + $0xf0] sm:$0xff]  }
 0x12a   : > { %v1028_v26 = vpop.f32.mrf.mxu0  ;;  %v1354_v28 = vpop.f32.mrf.mxu1 }
 0x12b   : > { %v6976_v26 = vld [vmem:[%s7194_s25 + $0x108] sm:$0xff]  }
 0x12c   : > { %v6297_v29 = vpop.f32.mrf.mxu0  ;;  %6500 = vmatmul.mubr.msk.bf16.gmra.mxu0 %vm320_vm2, %v6970_v7  ;;  %v6331_v35 = vpop.f32.mrf.mxu1  ;;  %6534 = vmatmul.mubr.msk.bf16.gmra.mxu1 %vm320_vm2, %v7034_v5 }
 0x12d   : > { %v1115_v31 = vadd.f32 %v6297_v29, %v7489_v57  ;;  %6503 = vmatprep.mubr.msk.bf16.mxu0 %vm320_vm2, %v6971_v25  ;;  %6537 = vmatprep.mubr.msk.bf16.mxu1 %vm320_vm2, %v7035_v37  ;;  %v6977_v29 = vld [vmem:[%s7194_s25 + $0x110] sm:$0xff]  }
 0x12e   : > { %v1039_v44 = vpop.f32.mrf.mxu0  ;;  %v1365_v9 = vpop.f32.mrf.mxu1 }
 0x12f   : > { %v7597_v6 = vadd.f32 %v6331_v35, %v1115_v31  ;;  %v1114_v38 = vadd.f32 %v1039_v44, %v7492_v60 }
 0x130   : > { %v6298_v39 = vpop.f32.mrf.mxu0  ;;  %v6332_v42 = vpop.f32.mrf.mxu1 }
 0x131   : > { %v7601_v57 = vadd.f32 %v1365_v9, %v1114_v38  ;;  %v7040_v38 = vld [vmem:[%s7194_s25 + $0xf8] sm:$0xff]  }
 0x132   : > { %v1042_v43 = vpop.f32.mrf.mxu0  ;;  %v1368_v45 = vpop.f32.mrf.mxu1 }
 0x134   : > { %v6301_v46 = vpop.f32.mrf.mxu0  ;;  %6504 = vmatmul.mubr.msk.bf16.gmra.mxu0 %vm320_vm2, %v6972_v40  ;;  %v6335_v48 = vpop.f32.mrf.mxu1  ;;  %6538 = vmatmul.mubr.msk.bf16.gmra.mxu1 %vm320_vm2, %v7036_v51 }
 0x135   : > { %v1117_v47 = vadd.f32 %v6301_v46, %v7501_v14  ;;  %6507 = vmatprep.mubr.msk.bf16.mxu0 %vm320_vm2, %v6973_v13  ;;  %6541 = vmatprep.mubr.msk.bf16.mxu1 %vm320_vm2, %v7037_v53  ;;  %v6978_v13 = vld [vmem:[%s7194_s25 + $0x118] sm:$0xff]   ;;  %v6979_v46 = vld [vmem:[%s7194_s25 + $0x1b0] sm:$0xff]  }
 0x136   : > { %v1053_v60 = vpop.f32.mrf.mxu0  ;;  %v1379_v59 = vpop.f32.mrf.mxu1 }
 0x137   : > { %v7611_v55 = vadd.f32 %v6335_v48, %v1117_v47  ;;  %v1116_v58 = vadd.f32 %v1053_v60, %v7504_v18 }
 0x138   : > { %v6302_v61 = vpop.f32.mrf.mxu0  ;;  %v6336_v63 = vpop.f32.mrf.mxu1 }
 0x139   : > { %v7615_v14 = vadd.f32 %v1379_v59, %v1116_v58  ;;  %v6980_v63 = vld [vmem:[%s7194_s25 + $0x1b8] sm:$0xff]  }
 0x13a   : > { %v1056_v1 = vpop.f32.mrf.mxu0  ;;  %v1382_v3 = vpop.f32.mrf.mxu1 }
 0x13b   : > { %v6981_v1 = vld [vmem:[%s7194_s25 + $0x1c0] sm:$0xff]  }
 0x13c   : > { %v6305_v4 = vpop.f32.mrf.mxu0  ;;  %6508 = vmatmul.mubr.msk.bf16.gmra.mxu0 %vm320_vm2, %v6974_v62  ;;  %v6339_v11 = vpop.f32.mrf.mxu1  ;;  %6542 = vmatmul.mubr.msk.bf16.gmra.mxu1 %vm320_vm2, %v7038_v16  ;;  %v7043_v16 = vld [vmem:[%s7194_s25 + $0x130] sm:$0xff]  }
 0x13d   : > { %v1119_v30 = vadd.f32 %v6305_v4, %v7513_v34  ;;  %6511 = vmatprep.mubr.msk.bf16.mxu0 %vm320_vm2, %v6975_v0  ;;  %6545 = vmatprep.mubr.msk.bf16.mxu1 %vm320_vm2, %v7039_v20  ;;  %v7042_v4 = vld [vmem:[%s7194_s25 + $0x128] sm:$0xff]  }
 0x13e   : > { %v1067_v18 = vpop.f32.mrf.mxu0  ;;  %v1393_v23 = vpop.f32.mrf.mxu1 }
 0x13f   : > { %v7625_v21 = vadd.f32 %v6339_v11, %v1119_v30  ;;  %v1118_v7 = vadd.f32 %v1067_v18, %v7516_v36 }
 0x140   : > { %v6306_v25 = vpop.f32.mrf.mxu0  ;;  %v6340_v34 = vpop.f32.mrf.mxu1 }
 0x141   : > { %v7629_v28 = vadd.f32 %v1393_v23, %v1118_v7  ;;  %v6982_v23 = vld [vmem:[%s7194_s25 + $0x1c8] sm:$0xff]  }
 0x142   : > { %v1070_v31 = vpop.f32.mrf.mxu0  ;;  %v1396_v35 = vpop.f32.mrf.mxu1 }
 0x143   : > { %v7044_v31 = vld [vmem:[%s7194_s25 + $0x138] sm:$0xff]  }
 0x144   : > { %v6309_v5 = vpop.f32.mrf.mxu0  ;;  %6512 = vmatmul.mubr.msk.bf16.gmra.mxu0 %vm320_vm2, %v6976_v26  ;;  %v6343_v37 = vpop.f32.mrf.mxu1  ;;  %6546 = vmatmul.mubr.msk.bf16.gmra.mxu1 %vm320_vm2, %v7040_v38  ;;  %v6983_v26 = vld [vmem:[%s7194_s25 + $0x1d0] sm:$0xff]  }
 0x145   : > { %v1121_v44 = vadd.f32 %v6309_v5, %v7525_v49  ;;  %6515 = vmatprep.mubr.msk.bf16.mxu0 %vm320_vm2, %v6977_v29  ;;  %6549 = vmatprep.mubr.msk.bf16.mxu1 %vm320_vm2, %v7349_v22  ;;  %v7045_v5 = vld [vmem:[%s7194_s25 + $0x140] sm:$0xff]  }
 0x146   : > { %v1081_v36 = vpop.f32.mrf.mxu0  ;;  %v1407_v40 = vpop.f32.mrf.mxu1 }
 0x147   : > { %v7639_v9 = vadd.f32 %v6343_v37, %v1121_v44  ;;  %v1120_v39 = vadd.f32 %v1081_v36, %v7528_v52  ;;  %v7041_v52 = vld [vmem:[%s7194_s25 + $0x120] sm:$0xff]  }
 0x148   : > { %v6310_v42 = vpop.f32.mrf.mxu0  ;;  %v6344_v49 = vpop.f32.mrf.mxu1 }
 0x149   : > { %v7643_v43 = vadd.f32 %v1407_v40, %v1120_v39  ;;  %v6984_v42 = vld [vmem:[%s7194_s25 + $0x1d8] sm:$0xff]   ;;  %v6985_v49 = vld [vmem:[%s7194_s25 + $0x1e0] sm:$0xff]  }
 0x14a   : > { %v1084_v45 = vpop.f32.mrf.mxu0  ;;  %v1410_v47 = vpop.f32.mrf.mxu1 }
 0x14b   : > { %v7046_v47 = vld [vmem:[%s7194_s25 + $0x148] sm:$0xff]  }
 0x14c   : > { %v6313_v48 = vpop.f32.mrf.mxu0  ;;  %6516 = vmatmul.mubr.msk.bf16.gmra.mxu0 %vm320_vm2, %v6978_v13  ;;  %v6347_v51 = vpop.f32.mrf.mxu1  ;;  %6550 = vmatmul.mubr.msk.bf16.gmra.mxu1 %vm320_vm2, %v7358_v24 }
 0x14d   : > { %v1123_v22 = vadd.f32 %v6313_v48, %v7536_v2  ;;  %6555 = vmatprep.mubr.msk.bf16.mxu0 %vm320_vm2, %v7041_v52  ;;  %6589 = vmatprep.mubr.msk.bf16.mxu1 %vm320_vm2, %v6979_v46 }
 0x14e   : > { %v1095_v60 = vpop.f32.mrf.mxu0  ;;  %v1421_v59 = vpop.f32.mrf.mxu1 }
 0x14f   : > { %v7653_v53 = vadd.f32 %v6347_v51, %v1123_v22  ;;  %v1122_v58 = vadd.f32 %v1095_v60, %v7540_v12 }
 0x150   : > { %v6314_v61 = vpop.f32.mrf.mxu0  ;;  %v6348_v62 = vpop.f32.mrf.mxu1 }
 0x151   : > { %v7656_v2 = vadd.f32 %v1421_v59, %v1122_v58  ;;  %v6986_v62 = vld [vmem:[%s7194_s25 + $0x1e8] sm:$0xff]  }
 0x152   : > { %v1098_v0 = vpop.f32.mrf.mxu0  ;;  %v1424_v24 = vpop.f32.mrf.mxu1 }
 0x153   : > { %v6987_v0 = vld [vmem:[%s7194_s25 + $0x1f0] sm:$0xff]  }
 0x154   : > { %v6353_v3 = vpop.f32.mrf.mxu0  ;;  %6556 = vmatmul.mubr.msk.bf16.vlgmr.msra.gmra.mxu0 %vm320_vm2, %v7042_v4  ;;  %v6387_v11 = vpop.f32.mrf.mxu1  ;;  %6590 = vmatmul.mubr.msk.bf16.vlgmr.msra.gmra.mxu1 %vm320_vm2, %v6980_v63 }
 0x155   : > { %v1761_v30 = vadd.f32 %v6353_v3, %v7551_v32  ;;  %6622 = vmatpush3.bf16.msra.mxu0 %v7184_v10  ;;  %6656 = vmatpush3.bf16.msra.mxu1 %v7211_v17  ;;  %v7048_v3 = vld [vmem:[%s7194_s25 + $0x158] sm:$0xff]  }
 0x156   : > { %v1649_v12 = vpop.f32.mrf.mxu0  ;;  %6559 = vmatprep.mubr.msk.bf16.mxu0 %vm320_vm2, %v7043_v16  ;;  %v1975_v7 = vpop.f32.mrf.mxu1  ;;  %6593 = vmatprep.mubr.msk.bf16.mxu1 %vm320_vm2, %v6981_v1 }
 0x157   : > { %v7668_v18 = vadd.f32 %v6387_v11, %v1761_v30  ;;  %v1760_v20 = vadd.f32 %v1649_v12, %v7559_v8  ;;  %6689 = vmatprep.subr.bf16.mxu0 %v7216_v19  ;;  %6723 = vmatprep.subr.bf16.mxu1 %v7290_v54 }
 0x158   : > { %v6354_v32 = vpop.f32.mrf.mxu0  ;;  %v6388_v17 = vpop.f32.mrf.mxu1 }
 0x159   : > { %v7674_v10 = vadd.f32 %v1975_v7, %v1760_v20  ;;  %v6988_v17 = vld [vmem:[%s7194_s25 + $0x1f8] sm:$0xff]  }
 0x15a   : > { %v1652_v25 = vpop.f32.mrf.mxu0  ;;  %v1978_v34 = vpop.f32.mrf.mxu1 }
 0x15b   : > { %v6989_v25 = vld [vmem:[%s7194_s25 + $0x200] sm:$0xff]  }
 0x15c   : > { %v6357_v29 = vpop.f32.mrf.mxu0  ;;  %6560 = vmatmul.mubr.msk.bf16.gmra.mxu0 %vm320_vm2, %v7044_v31  ;;  %v6391_v35 = vpop.f32.mrf.mxu1  ;;  %6594 = vmatmul.mubr.msk.bf16.gmra.mxu1 %vm320_vm2, %v6982_v23 }
 0x15d   : > { %v1763_v8 = vadd.f32 %v6357_v29, %v7569_v50  ;;  %6563 = vmatprep.mubr.msk.bf16.mxu0 %vm320_vm2, %v7045_v5  ;;  %6597 = vmatprep.mubr.msk.bf16.mxu1 %vm320_vm2, %v6983_v26  ;;  %v7050_v29 = vld [vmem:[%s7194_s25 + $0x168] sm:$0xff]  }
 0x15e   : > { %v1663_v44 = vpop.f32.mrf.mxu0  ;;  %v1989_v36 = vpop.f32.mrf.mxu1 }
 0x15f   : > { %v7685_v37 = vadd.f32 %v6391_v35, %v1763_v8  ;;  %v1762_v38 = vadd.f32 %v1663_v44, %v7573_v27  ;;  %v7047_v27 = vld [vmem:[%s7194_s25 + $0x150] sm:$0xff]  }
 0x160   : > { %v6358_v39 = vpop.f32.mrf.mxu0  ;;  %v6392_v50 = vpop.f32.mrf.mxu1 }
 0x161   : > { %v7688_v40 = vadd.f32 %v1989_v36, %v1762_v38  ;;  %v6990_v50 = vld [vmem:[%s7194_s25 + $0x208] sm:$0xff]  }
 0x162   : > { %v1666_v13 = vpop.f32.mrf.mxu0  ;;  %v1992_v45 = vpop.f32.mrf.mxu1 }
 0x163   : > { %v6991_v13 = vld [vmem:[%s7194_s25 + $0x210] sm:$0xff]  }
 0x164   : > { %v6361_v46 = vpop.f32.mrf.mxu0  ;;  %6564 = vmatmul.mubr.msk.bf16.gmra.mxu0 %vm320_vm2, %v7046_v47  ;;  %v6395_v22 = vpop.f32.mrf.mxu1  ;;  %6598 = vmatmul.mubr.msk.bf16.gmra.mxu1 %vm320_vm2, %v6984_v42 }
 0x165   : > { %v1765_v48 = vadd.f32 %v6361_v46, %v7583_v15  ;;  %6567 = vmatprep.mubr.msk.bf16.mxu0 %vm320_vm2, %v7047_v27  ;;  %6601 = vmatprep.mubr.msk.bf16.mxu1 %vm320_vm2, %v6985_v49  ;;  %v7052_v46 = vld [vmem:[%s7194_s25 + $0x178] sm:$0xff]  }
 0x166   : > { %v1677_v51 = vpop.f32.mrf.mxu0  ;;  %v2003_v58 = vpop.f32.mrf.mxu1 }
 0x167   : > { %v7699_v52 = vadd.f32 %v6395_v22, %v1765_v48  ;;  %v1764_v60 = vadd.f32 %v1677_v51, %v7587_v41  ;;  %v7049_v41 = vld [vmem:[%s7194_s25 + $0x160] sm:$0xff]  }
 0x168   : > { %v6362_v59 = vpop.f32.mrf.mxu0  ;;  %v6396_v15 = vpop.f32.mrf.mxu1 }
 0x169   : > { %v7702_v61 = vadd.f32 %v2003_v58, %v1764_v60  ;;  %v6992_v15 = vld [vmem:[%s7194_s25 + $0x218] sm:$0xff]  }
 0x16a   : > { %v1680_v63 = vpop.f32.mrf.mxu0  ;;  %v2006_v24 = vpop.f32.mrf.mxu1 }
 0x16b   : > { %v6993_v63 = vld [vmem:[%s7194_s25 + $0x220] sm:$0xff]  }
 0x16c   : > { %v6365_v1 = vpop.f32.mrf.mxu0  ;;  %6568 = vmatmul.mubr.msk.bf16.gmra.mxu0 %vm320_vm2, %v7048_v3  ;;  %v6399_v30 = vpop.f32.mrf.mxu1  ;;  %6602 = vmatmul.mubr.msk.bf16.gmra.mxu1 %vm320_vm2, %v6986_v62 }
 0x16d   : > { %v1767_v4 = vadd.f32 %v6365_v1, %v7597_v6  ;;  %6571 = vmatprep.mubr.msk.bf16.mxu0 %vm320_vm2, %v7049_v41  ;;  %6605 = vmatprep.mubr.msk.bf16.mxu1 %vm320_vm2, %v6987_v0  ;;  %v7054_v1 = vld [vmem:[%s7194_s25 + $0x188] sm:$0xff]  }
 0x16e   : > { %v1691_v11 = vpop.f32.mrf.mxu0  ;;  %v2017_v20 = vpop.f32.mrf.mxu1 }
 0x16f   : > { %v7713_v12 = vadd.f32 %v6399_v30, %v1767_v4  ;;  %v1766_v16 = vadd.f32 %v1691_v11, %v7601_v57  ;;  %v7051_v57 = vld [vmem:[%s7194_s25 + $0x170] sm:$0xff]  }
 0x170   : > { %v6366_v7 = vpop.f32.mrf.mxu0  ;;  %v6400_v6 = vpop.f32.mrf.mxu1 }
 0x171   : > { %v7716_v32 = vadd.f32 %v2017_v20, %v1766_v16  ;;  %v6994_v6 = vld [vmem:[%s7194_s25 + $0x228] sm:$0xff]  }
 0x172   : > { %v1694_v23 = vpop.f32.mrf.mxu0  ;;  %v2020_v26 = vpop.f32.mrf.mxu1 }
 0x173   : > { %v7056_v26 = vld [vmem:[%s7194_s25 + $0x198] sm:$0xff]  }
 0x174   : > { %v6369_v34 = vpop.f32.mrf.mxu0  ;;  %6572 = vmatmul.mubr.msk.bf16.gmra.mxu0 %vm320_vm2, %v7050_v29  ;;  %v6403_v8 = vpop.f32.mrf.mxu1  ;;  %6606 = vmatmul.mubr.msk.bf16.gmra.mxu1 %vm320_vm2, %v6988_v17 }
 0x175   : > { %v1769_v31 = vadd.f32 %v6369_v34, %v7611_v55  ;;  %6575 = vmatprep.mubr.msk.bf16.mxu0 %vm320_vm2, %v7051_v57  ;;  %6609 = vmatprep.mubr.msk.bf16.mxu1 %vm320_vm2, %v6989_v25 }
 0x176   : > { %v1705_v35 = vpop.f32.mrf.mxu0  ;;  %v2031_v38 = vpop.f32.mrf.mxu1 }
 0x177   : > { %v7727_v5 = vadd.f32 %v6403_v8, %v1769_v31  ;;  %v1768_v44 = vadd.f32 %v1705_v35, %v7615_v14  ;;  %v7053_v14 = vld [vmem:[%s7194_s25 + $0x180] sm:$0xff]   ;;  %v7058_v8 = vld [vmem:[%s7194_s25 + $0x98] sm:$0xff]  }
 0x178   : > { %v6370_v36 = vpop.f32.mrf.mxu0  ;;  %v6404_v55 = vpop.f32.mrf.mxu1 }
 0x179   : > { %v7730_v39 = vadd.f32 %v2031_v38, %v1768_v44 }
 0x17a   : > { %v1708_v42 = vpop.f32.mrf.mxu0  ;;  %v2034_v49 = vpop.f32.mrf.mxu1 }
 0x17c   : > { %v6373_v45 = vpop.f32.mrf.mxu0  ;;  %6576 = vmatmul.mubr.msk.bf16.gmra.mxu0 %vm320_vm2, %v7052_v46  ;;  %v6407_v48 = vpop.f32.mrf.mxu1  ;;  %6610 = vmatmul.mubr.msk.bf16.gmra.mxu1 %vm320_vm2, %v6990_v50  ;;  %v7060_v46 = vld [vmem:[%s7194_s25 + $0xa0] sm:$0xff]  }
 0x17d   : > { %v1771_v47 = vadd.f32 %v6373_v45, %v7625_v21  ;;  %6579 = vmatprep.mubr.msk.bf16.mxu0 %vm320_vm2, %v7053_v14  ;;  %6613 = vmatprep.mubr.msk.bf16.mxu1 %vm320_vm2, %v6991_v13  ;;  %v7059_v13 = vld [vmem:[%s7194_s25 + $0x130] sm:$0xff]  }
 0x17e   : > { %v1719_v22 = vpop.f32.mrf.mxu0  ;;  %v2045_v60 = vpop.f32.mrf.mxu1 }
 0x17f   : > { %v7741_v27 = vadd.f32 %v6407_v48, %v1771_v47  ;;  %v1770_v51 = vadd.f32 %v1719_v22, %v7629_v28  ;;  %v7055_v28 = vld [vmem:[%s7194_s25 + $0x190] sm:$0xff]   ;;  %v7061_v47 = vld [vmem:[%s7194_s25 + $0x138] sm:$0xff]  }
 0x180   : > { %v6374_v58 = vpop.f32.mrf.mxu0  ;;  %v6408_v21 = vpop.f32.mrf.mxu1 }
 0x181   : > { %v7744_v59 = vadd.f32 %v2045_v60, %v1770_v51 }
 0x182   : > { %v1722_v62 = vpop.f32.mrf.mxu0  ;;  %v2048_v0 = vpop.f32.mrf.mxu1 }
 0x183   : > { %v7065_v0 = vld [vmem:[%s7194_s25 + $0x148] sm:$0xff]  }
 0x184   : > { %v6377_v24 = vpop.f32.mrf.mxu0  ;;  %6580 = vmatmul.mubr.msk.bf16.gmra.mxu0 %vm320_vm2, %v7054_v1  ;;  %v6411_v4 = vpop.f32.mrf.mxu1  ;;  %6614 = vmatmul.mubr.msk.bf16.gmra.mxu1 %vm320_vm2, %v6992_v15  ;;  %v7063_v15 = vld [vmem:[%s7194_s25 + $0x140] sm:$0xff]   ;;  %v7066_v1 = vld [vmem:[%s7194_s25 + $0xb8] sm:$0xff]  }
 0x185   : > { %v1773_v3 = vadd.f32 %v6377_v24, %v7639_v9  ;;  %6583 = vmatprep.mubr.msk.bf16.mxu0 %vm320_vm2, %v7055_v28  ;;  %6617 = vmatprep.mubr.msk.bf16.mxu1 %vm320_vm2, %v6993_v63  ;;  %v7064_v63 = vld [vmem:[%s7194_s25 + $0xb0] sm:$0xff]  }
 0x186   : > { %v1733_v30 = vpop.f32.mrf.mxu0  ;;  %v2059_v16 = vpop.f32.mrf.mxu1 }
 0x187   : > { %v7755_v41 = vadd.f32 %v6411_v4, %v1773_v3  ;;  %v1772_v11 = vadd.f32 %v1733_v30, %v7643_v43  ;;  %v7057_v43 = vld [vmem:[%s7194_s25 + $0x128] sm:$0xff]  }
 0x188   : > { %v6378_v20 = vpop.f32.mrf.mxu0  ;;  %v6412_v9 = vpop.f32.mrf.mxu1 }
 0x189   : > { %v7758_v7 = vadd.f32 %v2059_v16, %v1772_v11 }
 0x18a   : > { %v1736_v17 = vpop.f32.mrf.mxu0  ;;  %v2062_v23 = vpop.f32.mrf.mxu1 }
 0x18c   : > { %v6381_v25 = vpop.f32.mrf.mxu0  ;;  %6584 = vmatmul.mubr.msk.bf16.gmra.mxu0 %vm320_vm2, %v7056_v26  ;;  %v6415_v29 = vpop.f32.mrf.mxu1  ;;  %6618 = vmatmul.mubr.msk.bf16.gmra.mxu1 %vm320_vm2, %v6994_v6  ;;  %v7067_v6 = vld [vmem:[%s7194_s25 + $0x150] sm:$0xff]  }
 0x18d   : > { %v1775_v34 = vadd.f32 %v6381_v25, %v7653_v53  ;;  %6623 = vmatprep.mubr.msk.bf16.mxu0 %vm320_vm2, %v7057_v43  ;;  %6657 = vmatprep.mubr.msk.bf16.mxu1 %vm320_vm2, %v7058_v8  ;;  %v7068_v25 = vld [vmem:[%s7194_s25 + $0xc0] sm:$0xff]  }
 0x18e   : > { %v1747_v31 = vpop.f32.mrf.mxu0  ;;  %v2073_v44 = vpop.f32.mrf.mxu1 }
 0x18f   : > { %v7769_v57 = vadd.f32 %v6415_v29, %v1775_v34  ;;  %v1774_v35 = vadd.f32 %v1747_v31, %v7656_v2  ;;  %v7070_v34 = vld [vmem:[%s7194_s25 + $0xc8] sm:$0xff]  }
 0x190   : > { %v6382_v38 = vpop.f32.mrf.mxu0  ;;  %v6416_v36 = vpop.f32.mrf.mxu1 }
 0x191   : > { %v7772_v53 = vadd.f32 %v2073_v44, %v1774_v35 }
 0x192   : > { %v1750_v55 = vpop.f32.mrf.mxu0  ;;  %v2076_v50 = vpop.f32.mrf.mxu1 }
 0x193   : > { %v7071_v55 = vld [vmem:[%s7194_s25 + $0x160] sm:$0xff]  }
 0x194   : > { %v6421_v42 = vpop.f32.mrf.mxu0  ;;  %6624 = vmatmul.mubr.msk.bf16.vlgmr.msra.gmra.mxu0 %vm320_vm2, %v7059_v13  ;;  %v6455_v45 = vpop.f32.mrf.mxu1  ;;  %6658 = vmatmul.mubr.msk.bf16.vlgmr.msra.gmra.mxu1 %vm320_vm2, %v7060_v46  ;;  %v7072_v13 = vld [vmem:[%s7194_s25 + $0xd0] sm:$0xff]  }
 0x195   : > { %v2413_v49 = vadd.f32 %v6421_v42, %v7668_v18  ;;  %6690 = vmatpush3.bf16.msra.mxu0 %v7216_v19  ;;  %6724 = vmatpush3.bf16.msra.mxu1 %v7290_v54  ;;  %v7062_v18 = vld [vmem:[%s7194_s25 + $0xa8] sm:$0xff]  }
 0x196   : > { %v2301_v2 = vpop.f32.mrf.mxu0  ;;  %6627 = vmatprep.mubr.msk.bf16.mxu0 %vm320_vm2, %v7061_v47  ;;  %v2627_v22 = vpop.f32.mrf.mxu1  ;;  %6661 = vmatprep.mubr.msk.bf16.mxu1 %vm320_vm2, %v7062_v18 }
 0x197   : > { %v7783_v48 = vadd.f32 %v6455_v45, %v2413_v49  ;;  %v2412_v14 = vadd.f32 %v2301_v2, %v7674_v10  ;;  %6757 = vmatprep.subr.bf16.mxu0 %v7299_v56  ;;  %6791 = vmatprep.subr.bf16.mxu1 %v7376_v33  ;;  %v7074_v45 = vld [vmem:[%s7194_s25 + $0xd8] sm:$0xff]  }
 0x198   : > { %v6422_v19 = vpop.f32.mrf.mxu0  ;;  %v6456_v51 = vpop.f32.mrf.mxu1 }
 0x199   : > { %v7790_v54 = vadd.f32 %v2627_v22, %v2412_v14 }
 0x19a   : > { %v2304_v60 = vpop.f32.mrf.mxu0  ;;  %v2630_v58 = vpop.f32.mrf.mxu1 }
 0x19b   : > { %v7075_v60 = vld [vmem:[%s7194_s25 + $0x170] sm:$0xff]  }
 0x19c   : > { %v6425_v21 = vpop.f32.mrf.mxu0  ;;  %6628 = vmatmul.mubr.msk.bf16.gmra.mxu0 %vm320_vm2, %v7063_v15  ;;  %v6459_v62 = vpop.f32.mrf.mxu1  ;;  %6662 = vmatmul.mubr.msk.bf16.gmra.mxu1 %vm320_vm2, %v7064_v63  ;;  %v7076_v15 = vld [vmem:[%s7194_s25 + $0xe0] sm:$0xff]  }
 0x19d   : > { %v2415_v10 = vadd.f32 %v6425_v21, %v7685_v37  ;;  %6631 = vmatprep.mubr.msk.bf16.mxu0 %vm320_vm2, %v7065_v0  ;;  %6665 = vmatprep.mubr.msk.bf16.mxu1 %vm320_vm2, %v7066_v1 }
 0x19e   : > { %v2315_v24 = vpop.f32.mrf.mxu0  ;;  %v2641_v28 = vpop.f32.mrf.mxu1 }
 0x19f   : > { %v7801_v3 = vadd.f32 %v6459_v62, %v2415_v10  ;;  %v2414_v4 = vadd.f32 %v2315_v24, %v7688_v40  ;;  %v7069_v40 = vld [vmem:[%s7194_s25 + $0x158] sm:$0xff]   ;;  %v7078_v62 = vld [vmem:[%s7194_s25 + $0xe8] sm:$0xff]  }
 0x1a0   : > { %v6426_v37 = vpop.f32.mrf.mxu0  ;;  %v6460_v11 = vpop.f32.mrf.mxu1 }
 0x1a1   : > { %v7804_v30 = vadd.f32 %v2641_v28, %v2414_v4 }
 0x1a2   : > { %v2318_v16 = vpop.f32.mrf.mxu0  ;;  %v2644_v20 = vpop.f32.mrf.mxu1 }
 0x1a3   : > { %v7079_v16 = vld [vmem:[%s7194_s25 + $0x180] sm:$0xff]  }
 0x1a4   : > { %v6429_v9 = vpop.f32.mrf.mxu0  ;;  %6632 = vmatmul.mubr.msk.bf16.gmra.mxu0 %vm320_vm2, %v7067_v6  ;;  %v6463_v23 = vpop.f32.mrf.mxu1  ;;  %6666 = vmatmul.mubr.msk.bf16.gmra.mxu1 %vm320_vm2, %v7068_v25  ;;  %v7080_v6 = vld [vmem:[%s7194_s25 + $0xf0] sm:$0xff]  }
 0x1a5   : > { %v2417_v17 = vadd.f32 %v6429_v9, %v7699_v52  ;;  %6635 = vmatprep.mubr.msk.bf16.mxu0 %vm320_vm2, %v7069_v40  ;;  %6669 = vmatprep.mubr.msk.bf16.mxu1 %vm320_vm2, %v7070_v34 }
 0x1a6   : > { %v2329_v26 = vpop.f32.mrf.mxu0  ;;  %v2655_v31 = vpop.f32.mrf.mxu1 }
 0x1a7   : > { %v7815_v29 = vadd.f32 %v6463_v23, %v2417_v17  ;;  %v2416_v43 = vadd.f32 %v2329_v26, %v7702_v61  ;;  %v7073_v61 = vld [vmem:[%s7194_s25 + $0x168] sm:$0xff]   ;;  %v7082_v23 = vld [vmem:[%s7194_s25 + $0xf8] sm:$0xff]  }
 0x1a8   : > { %v6430_v52 = vpop.f32.mrf.mxu0  ;;  %v6464_v35 = vpop.f32.mrf.mxu1 }
 0x1a9   : > { %v7818_v8 = vadd.f32 %v2655_v31, %v2416_v43 }
 0x1aa   : > { %v2332_v44 = vpop.f32.mrf.mxu0  ;;  %v2658_v38 = vpop.f32.mrf.mxu1 }
 0x1ab   : > { %v7083_v44 = vld [vmem:[%s7194_s25 + $0x190] sm:$0xff]  }
 0x1ac   : > { %v6433_v36 = vpop.f32.mrf.mxu0  ;;  %6636 = vmatmul.mubr.msk.bf16.gmra.mxu0 %vm320_vm2, %v7071_v55  ;;  %v6467_v42 = vpop.f32.mrf.mxu1  ;;  %6670 = vmatmul.mubr.msk.bf16.gmra.mxu1 %vm320_vm2, %v7072_v13  ;;  %v7084_v55 = vld [vmem:[%s7194_s25 + $0x100] sm:$0xff]  }
 0x1ad   : > { %v2419_v50 = vadd.f32 %v6433_v36, %v7713_v12  ;;  %6639 = vmatprep.mubr.msk.bf16.mxu0 %vm320_vm2, %v7073_v61  ;;  %6673 = vmatprep.mubr.msk.bf16.mxu1 %vm320_vm2, %v7074_v45 }
 0x1ae   : > { %v2343_v49 = vpop.f32.mrf.mxu0  ;;  %v2669_v47 = vpop.f32.mrf.mxu1 }
 0x1af   : > { %v7829_v46 = vadd.f32 %v6467_v42, %v2419_v50  ;;  %v2418_v2 = vadd.f32 %v2343_v49, %v7716_v32  ;;  %v7077_v32 = vld [vmem:[%s7194_s25 + $0x178] sm:$0xff]   ;;  %v7086_v42 = vld [vmem:[%s7194_s25 + $0x108] sm:$0xff]  }
 0x1b0   : > { %v6434_v12 = vpop.f32.mrf.mxu0  ;;  %v6468_v22 = vpop.f32.mrf.mxu1 }
 0x1b1   : > { %v7832_v14 = vadd.f32 %v2669_v47, %v2418_v2  ;;  %v6995_v47 = vld [vmem:[%s7194_s25 + $0x1b8] sm:$0xff]  }
 0x1b2   : > { %v2346_v18 = vpop.f32.mrf.mxu0  ;;  %v2672_v19 = vpop.f32.mrf.mxu1 }
 0x1b3   : > { %v7087_v19 = vld [vmem:[%s7194_s25 + $0x1a0] sm:$0xff]  }
 0x1b4   : > { %v6437_v51 = vpop.f32.mrf.mxu0  ;;  %6640 = vmatmul.mubr.msk.bf16.gmra.mxu0 %vm320_vm2, %v7075_v60  ;;  %v6471_v21 = vpop.f32.mrf.mxu1  ;;  %6674 = vmatmul.mubr.msk.bf16.gmra.mxu1 %vm320_vm2, %v7076_v15 }
 0x1b5   : > { %v2421_v58 = vadd.f32 %v6437_v51, %v7727_v5  ;;  %6643 = vmatprep.mubr.msk.bf16.mxu0 %vm320_vm2, %v7077_v32  ;;  %6677 = vmatprep.mubr.msk.bf16.mxu1 %vm320_vm2, %v7078_v62 }
 0x1b6   : > { %v2357_v10 = vpop.f32.mrf.mxu0  ;;  %v2683_v24 = vpop.f32.mrf.mxu1 }
 0x1b7   : > { %v7843_v63 = vadd.f32 %v6471_v21, %v2421_v58  ;;  %v2420_v0 = vadd.f32 %v2357_v10, %v7730_v39  ;;  %v7081_v39 = vld [vmem:[%s7194_s25 + $0x188] sm:$0xff]   ;;  %v7088_v58 = vld [vmem:[%s7194_s25 + $0x110] sm:$0xff]  }
 0x1b8   : > { %v6438_v5 = vpop.f32.mrf.mxu0  ;;  %v6472_v4 = vpop.f32.mrf.mxu1  ;;  %v7089_v21 = vld [vmem:[%s7194_s25 + $0x130] sm:$0xff]  }
 0x1b9   : > { %v7846_v1 = vadd.f32 %v2683_v24, %v2420_v0  ;;  %v6996_v0 = vld [vmem:[%s7194_s25 + $0x1c0] sm:$0xff]   ;;  %v6997_v4 = vld [vmem:[%s7194_s25 + $0x1c8] sm:$0xff]  }
 0x1ba   : > { %v2360_v28 = vpop.f32.mrf.mxu0  ;;  %v2686_v37 = vpop.f32.mrf.mxu1 }
 0x1bc   : > { %v6441_v11 = vpop.f32.mrf.mxu0  ;;  %6644 = vmatmul.mubr.msk.bf16.gmra.mxu0 %vm320_vm2, %v7079_v16  ;;  %v6475_v9 = vpop.f32.mrf.mxu1  ;;  %6678 = vmatmul.mubr.msk.bf16.gmra.mxu1 %vm320_vm2, %v7080_v6 }
 0x1bd   : > { %v2423_v20 = vadd.f32 %v6441_v11, %v7741_v27  ;;  %6647 = vmatprep.mubr.msk.bf16.mxu0 %vm320_vm2, %v7081_v39  ;;  %6681 = vmatprep.mubr.msk.bf16.mxu1 %vm320_vm2, %v7082_v23 }
 0x1be   : > { %v2371_v17 = vpop.f32.mrf.mxu0  ;;  %v2697_v26 = vpop.f32.mrf.mxu1 }
 0x1bf   : > { %v7857_v25 = vadd.f32 %v6475_v9, %v2423_v20  ;;  %v2422_v40 = vadd.f32 %v2371_v17, %v7744_v59  ;;  %v7085_v59 = vld [vmem:[%s7194_s25 + $0x198] sm:$0xff]   ;;  %v6998_v17 = vld [vmem:[%s7194_s25 + $0x1d0] sm:$0xff]  }
 0x1c0   : > { %v6442_v27 = vpop.f32.mrf.mxu0  ;;  %v6476_v43 = vpop.f32.mrf.mxu1 }
 0x1c1   : > { %v7860_v34 = vadd.f32 %v2697_v26, %v2422_v40  ;;  %v6999_v40 = vld [vmem:[%s7194_s25 + $0x1d8] sm:$0xff]   ;;  %v7092_v43 = vld [vmem:[%s7194_s25 + $0x148] sm:$0xff]  }
 0x1c2   : > { %v2374_v31 = vpop.f32.mrf.mxu0  ;;  %v2700_v52 = vpop.f32.mrf.mxu1 }
 0x1c3   : > { %v7093_v52 = vld [vmem:[%s7194_s25 + $0x150] sm:$0xff]  }
 0x1c4   : > { %v6445_v35 = vpop.f32.mrf.mxu0  ;;  %6648 = vmatmul.mubr.msk.bf16.gmra.mxu0 %vm320_vm2, %v7083_v44  ;;  %v6479_v36 = vpop.f32.mrf.mxu1  ;;  %6682 = vmatmul.mubr.msk.bf16.gmra.mxu1 %vm320_vm2, %v7084_v55  ;;  %v7001_v55 = vld [vmem:[%s7194_s25 + $0x1e8] sm:$0xff]  }
 0x1c5   : > { %v2425_v38 = vadd.f32 %v6445_v35, %v7755_v41  ;;  %6651 = vmatprep.mubr.msk.bf16.mxu0 %vm320_vm2, %v7085_v59  ;;  %6685 = vmatprep.mubr.msk.bf16.mxu1 %vm320_vm2, %v7086_v42 }
 0x1c6   : > { %v2385_v50 = vpop.f32.mrf.mxu0  ;;  %v2711_v49 = vpop.f32.mrf.mxu1 }
 0x1c7   : > { %v7871_v13 = vadd.f32 %v6479_v36, %v2425_v38  ;;  %v2424_v61 = vadd.f32 %v2385_v50, %v7758_v7  ;;  %v7000_v38 = vld [vmem:[%s7194_s25 + $0x1e0] sm:$0xff]  }
 0x1c8   : > { %v6446_v41 = vpop.f32.mrf.mxu0  ;;  %v6480_v2 = vpop.f32.mrf.mxu1 }
 0x1c9   : > { %v7874_v45 = vadd.f32 %v2711_v49, %v2424_v61  ;;  %v7095_v2 = vld [vmem:[%s7194_s25 + $0x160] sm:$0xff]  }
 0x1ca   : > { %v2388_v12 = vpop.f32.mrf.mxu0  ;;  %v2714_v22 = vpop.f32.mrf.mxu1 }
 0x1cb   : > { %v7002_v22 = vld [vmem:[%s7194_s25 + $0x1f0] sm:$0xff]  }
 0x1cc   : > { %v6449_v18 = vpop.f32.mrf.mxu0  ;;  %6652 = vmatmul.mubr.msk.bf16.gmra.mxu0 %vm320_vm2, %v7087_v19  ;;  %v6483_v60 = vpop.f32.mrf.mxu1  ;;  %6686 = vmatmul.mubr.msk.bf16.gmra.mxu1 %vm320_vm2, %v7088_v58  ;;  %v7003_v19 = vld [vmem:[%s7194_s25 + $0x1f8] sm:$0xff]  }
 0x1cd   : > { %v2427_v51 = vadd.f32 %v6449_v18, %v7769_v57  ;;  %6691 = vmatprep.mubr.msk.bf16.mxu0 %vm320_vm2, %v6995_v47  ;;  %6725 = vmatprep.mubr.msk.bf16.mxu1 %vm320_vm2, %v7089_v21 }
 0x1ce   : > { %v2399_v7 = vpop.f32.mrf.mxu0  ;;  %v2725_v10 = vpop.f32.mrf.mxu1 }
 0x1cf   : > { %v7885_v15 = vadd.f32 %v6483_v60, %v2427_v51  ;;  %v2426_v32 = vadd.f32 %v2399_v7, %v7772_v53  ;;  %v7090_v53 = vld [vmem:[%s7194_s25 + $0x138] sm:$0xff]  }
 0x1d0   : > { %v6450_v62 = vpop.f32.mrf.mxu0  ;;  %v6484_v24 = vpop.f32.mrf.mxu1 }
 0x1d1   : > { %v7889_v57 = vadd.f32 %v2725_v10, %v2426_v32  ;;  %v7097_v10 = vld [vmem:[%s7194_s25 + $0x170] sm:$0xff]   ;;  %v7004_v24 = vld [vmem:[%s7194_s25 + $0x200] sm:$0xff]  }
 0x1d2   : > { %v2402_v5 = vpop.f32.mrf.mxu0  ;;  %v2728_v28 = vpop.f32.mrf.mxu1 }
 0x1d4   : > { %v6489_v37 = vpop.f32.mrf.mxu0  ;;  %6692 = vmatmul.mubr.msk.bf16.vlgmr.msra.gmra.mxu0 %vm320_vm2, %v6996_v0  ;;  %v7896_v16 = vpop.f32.mrf.mxu1  ;;  %6726 = vmatmul.mubr.msk.bf16.vlgmr.msra.gmra.mxu1 %vm320_vm2, %v7090_v53 }
 0x1d5   : > { %v7894_v11 = vadd.f32 %v6489_v37, %v7783_v48  ;;  %6758 = vmatpush3.bf16.msra.mxu0 %v7299_v56  ;;  %6792 = vmatpush3.bf16.msra.mxu1 %v7376_v33  ;;  %v7091_v48 = vld [vmem:[%s7194_s25 + $0x140] sm:$0xff]  }
 0x1d6   : > { %v2953_v20 = vpop.f32.mrf.mxu0  ;;  %6695 = vmatprep.mubr.msk.bf16.mxu0 %vm320_vm2, %v6997_v4  ;;  %v7906_v6 = vpop.f32.mrf.mxu1  ;;  %6729 = vmatprep.mubr.msk.bf16.mxu1 %vm320_vm2, %v7091_v48  ;;  %v7005_v4 = vld [vmem:[%s7194_s25 + $0x208] sm:$0xff]  }
 0x1d7   : > { %v7904_v9 = vadd.f32 %v2953_v20, %v7790_v54 }
 0x1d8   : > { %v6490_v39 = vpop.f32.mrf.mxu0  ;;  %v6524_v23 = vpop.f32.mrf.mxu1 }
 0x1da   : > { %v2956_v56 = vpop.f32.mrf.mxu0  ;;  %v3117_v26 = vpop.f32.mrf.mxu1 }
 0x1db   : > { %v7006_v56 = vld [vmem:[%s7194_s25 + $0x210] sm:$0xff]  }
 0x1dc   : > { %v6493_v33 = vpop.f32.mrf.mxu0  ;;  %6696 = vmatmul.mubr.msk.bf16.gmra.mxu0 %vm320_vm2, %v6998_v17  ;;  %v7916_v27 = vpop.f32.mrf.mxu1  ;;  %6730 = vmatmul.mubr.msk.bf16.gmra.mxu1 %vm320_vm2, %v7092_v43  ;;  %v7099_v17 = vld [vmem:[%s7194_s25 + $0x180] sm:$0xff]  }
 0x1dd   : > { %v7914_v54 = vadd.f32 %v6493_v33, %v7801_v3  ;;  %6699 = vmatprep.mubr.msk.bf16.mxu0 %vm320_vm2, %v6999_v40  ;;  %6733 = vmatprep.mubr.msk.bf16.mxu1 %vm320_vm2, %v7093_v52  ;;  %v7007_v33 = vld [vmem:[%s7194_s25 + $0x218] sm:$0xff]  }
 0x1de   : > { %v2967_v31 = vpop.f32.mrf.mxu0  ;;  %v7926_v44 = vpop.f32.mrf.mxu1 }
 0x1df   : > { %v7924_v35 = vadd.f32 %v2967_v31, %v7804_v30  ;;  %v7094_v30 = vld [vmem:[%s7194_s25 + $0x158] sm:$0xff]  }
 0x1e0   : > { %v6494_v3 = vpop.f32.mrf.mxu0  ;;  %v6528_v36 = vpop.f32.mrf.mxu1 }
 0x1e2   : > { %v2970_v59 = vpop.f32.mrf.mxu0  ;;  %v3131_v50 = vpop.f32.mrf.mxu1 }
 0x1e4   : > { %v6497_v42 = vpop.f32.mrf.mxu0  ;;  %6700 = vmatmul.mubr.msk.bf16.gmra.mxu0 %vm320_vm2, %v7000_v38  ;;  %v7934_v49 = vpop.f32.mrf.mxu1  ;;  %6734 = vmatmul.mubr.msk.bf16.gmra.mxu1 %vm320_vm2, %v7094_v30 }
 0x1e5   : > { %v7932_v61 = vadd.f32 %v6497_v42, %v7815_v29  ;;  %6703 = vmatprep.mubr.msk.bf16.mxu0 %vm320_vm2, %v7001_v55  ;;  %6737 = vmatprep.mubr.msk.bf16.mxu1 %vm320_vm2, %v7095_v2  ;;  %v7101_v55 = vld [vmem:[%s7194_s25 + $0x190] sm:$0xff]   ;;  %v7008_v42 = vld [vmem:[%s7194_s25 + $0x220] sm:$0xff]  }
 0x1e6   : > { %v2981_v41 = vpop.f32.mrf.mxu0  ;;  %v7944_v12 = vpop.f32.mrf.mxu1 }
 0x1e7   : > { %v7942_v47 = vadd.f32 %v2981_v41, %v7818_v8  ;;  %v7096_v8 = vld [vmem:[%s7194_s25 + $0x168] sm:$0xff]  }
 0x1e8   : > { %v6498_v29 = vpop.f32.mrf.mxu0  ;;  %v6532_v18 = vpop.f32.mrf.mxu1  ;;  %v7009_v41 = vld [vmem:[%s7194_s25 + $0x228] sm:$0xff]  }
 0x1ea   : > { %v2984_v51 = vpop.f32.mrf.mxu0  ;;  %v3145_v60 = vpop.f32.mrf.mxu1 }
 0x1eb   : > { %v7103_v60 = vld [vmem:[%s7194_s25 + $0x1a0] sm:$0xff]  }
 0x1ec   : > { %v6501_v58 = vpop.f32.mrf.mxu0  ;;  %6704 = vmatmul.mubr.msk.bf16.gmra.mxu0 %vm320_vm2, %v7002_v22  ;;  %v7952_v21 = vpop.f32.mrf.mxu1  ;;  %6738 = vmatmul.mubr.msk.bf16.gmra.mxu1 %vm320_vm2, %v7096_v8 }
 0x1ed   : > { %v7950_v7 = vadd.f32 %v6501_v58, %v7829_v46  ;;  %6707 = vmatprep.mubr.msk.bf16.mxu0 %vm320_vm2, %v7003_v19  ;;  %6741 = vmatprep.mubr.msk.bf16.mxu1 %vm320_vm2, %v7097_v10 }
 0x1ee   : > { %v2995_v32 = vpop.f32.mrf.mxu0  ;;  %v7962_v0 = vpop.f32.mrf.mxu1 }
 0x1ef   : > { %v7960_v62 = vadd.f32 %v2995_v32, %v7832_v14  ;;  %v7098_v14 = vld [vmem:[%s7194_s25 + $0x178] sm:$0xff]   ;;  %v7010_v32 = vld [vmem:[%s7194_s25 + $0x230] sm:$0xff]  }
 0x1f0   : > { %v6502_v46 = vpop.f32.mrf.mxu0  ;;  %v6536_v5 = vpop.f32.mrf.mxu1 }
 0x1f2   : > { %v2998_v28 = vpop.f32.mrf.mxu0  ;;  %v3159_v37 = vpop.f32.mrf.mxu1 }
 0x1f4   : > { %v6505_v53 = vpop.f32.mrf.mxu0  ;;  %6708 = vmatmul.mubr.msk.bf16.gmra.mxu0 %vm320_vm2, %v7004_v24  ;;  %v7970_v48 = vpop.f32.mrf.mxu1  ;;  %6742 = vmatmul.mubr.msk.bf16.gmra.mxu1 %vm320_vm2, %v7098_v14  ;;  %v7011_v24 = vld [vmem:[%s7194_s25 + $0x1c0] sm:$0xff]  }
 0x1f5   : > { %v7968_v20 = vadd.f32 %v6505_v53, %v7843_v63  ;;  %6711 = vmatprep.mubr.msk.bf16.mxu0 %vm320_vm2, %v7005_v4  ;;  %6745 = vmatprep.mubr.msk.bf16.mxu1 %vm320_vm2, %v7099_v17  ;;  %v7105_v53 = vld [vmem:[%s7194_s25 + $0xa0] sm:$0xff]  }
 0x1f6   : > { %v3009_v39 = vpop.f32.mrf.mxu0  ;;  %v7980_v40 = vpop.f32.mrf.mxu1 }
 0x1f7   : > { %v7978_v23 = vadd.f32 %v3009_v39, %v7846_v1  ;;  %v7100_v1 = vld [vmem:[%s7194_s25 + $0x188] sm:$0xff]  }
 0x1f8   : > { %v6506_v63 = vpop.f32.mrf.mxu0  ;;  %v6540_v26 = vpop.f32.mrf.mxu1 }
 0x1fa   : > { %v3012_v43 = vpop.f32.mrf.mxu0  ;;  %v3173_v31 = vpop.f32.mrf.mxu1 }
 0x1fc   : > { %v6509_v52 = vpop.f32.mrf.mxu0  ;;  %6712 = vmatmul.mubr.msk.bf16.gmra.mxu0 %vm320_vm2, %v7006_v56  ;;  %v7988_v38 = vpop.f32.mrf.mxu1  ;;  %6746 = vmatmul.mubr.msk.bf16.gmra.mxu1 %vm320_vm2, %v7100_v1  ;;  %v7012_v56 = vld [vmem:[%s7194_s25 + $0x1c8] sm:$0xff]  }
 0x1fd   : > { %v7986_v3 = vadd.f32 %v6509_v52, %v7857_v25  ;;  %6715 = vmatprep.mubr.msk.bf16.mxu0 %vm320_vm2, %v7007_v33  ;;  %6749 = vmatprep.mubr.msk.bf16.mxu1 %vm320_vm2, %v7101_v55  ;;  %v7013_v33 = vld [vmem:[%s7194_s25 + $0x1d0] sm:$0xff]   ;;  %v7106_v52 = vld [vmem:[%s7194_s25 + $0xa8] sm:$0xff]  }
 0x1fe   : > { %v3023_v36 = vpop.f32.mrf.mxu0  ;;  %v7998_v50 = vpop.f32.mrf.mxu1 }
 0x1ff   : > { %v7996_v59 = vadd.f32 %v3023_v36, %v7860_v34  ;;  %v7102_v34 = vld [vmem:[%s7194_s25 + $0x198] sm:$0xff]  }
 0x200   : > { %v6510_v25 = vpop.f32.mrf.mxu0  ;;  %v6544_v30 = vpop.f32.mrf.mxu1 }
 0x202   : > { %v3026_v2 = vpop.f32.mrf.mxu0  ;;  %v3187_v29 = vpop.f32.mrf.mxu1 }
 0x203   : > { %v7014_v29 = vld [vmem:[%s7194_s25 + $0x1d8] sm:$0xff]  }
 0x204   : > { %v6513_v22 = vpop.f32.mrf.mxu0  ;;  %6716 = vmatmul.mubr.msk.bf16.gmra.mxu0 %vm320_vm2, %v7008_v42  ;;  %v8006_v19 = vpop.f32.mrf.mxu1  ;;  %6750 = vmatmul.mubr.msk.bf16.gmra.mxu1 %vm320_vm2, %v7102_v34  ;;  %v7015_v34 = vld [vmem:[%s7194_s25 + $0x1e0] sm:$0xff]  }
 0x205   : > { %v8004_v18 = vadd.f32 %v6513_v22, %v7871_v13  ;;  %6719 = vmatprep.mubr.msk.bf16.mxu0 %vm320_vm2, %v7009_v41  ;;  %6753 = vmatprep.mubr.msk.bf16.mxu1 %vm320_vm2, %v7103_v60 }
 0x206   : > { %v3037_v51 = vpop.f32.mrf.mxu0  ;;  %v8016_v8 = vpop.f32.mrf.mxu1 }
 0x207   : > { %v8014_v58 = vadd.f32 %v3037_v51, %v7874_v45  ;;  %v7104_v45 = vld [vmem:[%s7194_s25 + $0x1a8] sm:$0xff]  }
 0x208   : > { %v6514_v13 = vpop.f32.mrf.mxu0  ;;  %v6548_v10 = vpop.f32.mrf.mxu1 }
 0x209   : > { %v7108_v13 = vld [vmem:[%s7194_s25 + $0xb8] sm:$0xff]  }
 0x20a   : > { %v3040_v46 = vpop.f32.mrf.mxu0  ;;  %v3201_v5 = vpop.f32.mrf.mxu1 }
 0x20c   : > { %v6517_v4 = vpop.f32.mrf.mxu0  ;;  %6720 = vmatmul.mubr.msk.bf16.gmra.mxu0 %vm320_vm2, %v7010_v32  ;;  %v8024_v37 = vpop.f32.mrf.mxu1  ;;  %6754 = vmatmul.mubr.msk.bf16.gmra.mxu1 %vm320_vm2, %v7104_v45 }
 0x20d   : > { %v8022_v28 = vadd.f32 %v6517_v4, %v7885_v15  ;;  %6759 = vmatprep.mubr.msk.bf16.mxu0 %vm320_vm2, %v7105_v53  ;;  %6793 = vmatprep.mubr.msk.bf16.mxu1 %vm320_vm2, %v7011_v24 }
 0x20e   : > { %v3051_v14 = vpop.f32.mrf.mxu0  ;;  %v8034_v17 = vpop.f32.mrf.mxu1 }
 0x20f   : > { %v8032_v39 = vadd.f32 %v3051_v14, %v7889_v57  ;;  %v7107_v57 = vld [vmem:[%s7194_s25 + $0xb0] sm:$0xff]   ;;  %v7016_v14 = vld [vmem:[%s7194_s25 + $0x1e8] sm:$0xff]  }
 0x210   : > { %v6518_v15 = vpop.f32.mrf.mxu0  ;;  %v6552_v63 = vpop.f32.mrf.mxu1 }
 0x211   : > { %v7017_v63 = vld [vmem:[%s7194_s25 + $0x1f0] sm:$0xff]  }
 0x212   : > { %v3054_v26 = vpop.f32.mrf.mxu0  ;;  %v3215_v43 = vpop.f32.mrf.mxu1 }
 0x214   : > { %v6557_v31 = vpop.f32.mrf.mxu0  ;;  %6760 = vmatmul.mubr.msk.bf16.vlgmr.msra.gmra.mxu0 %vm320_vm2, %v7106_v52  ;;  %v6591_v36 = vpop.f32.mrf.mxu1  ;;  %6794 = vmatmul.mubr.msk.bf16.vlgmr.msra.gmra.mxu1 %vm320_vm2, %v7012_v56 }
 0x215   : > { %v3267_v1 = vadd.f32 %v6557_v31, %v7896_v16  ;;  %6763 = vmatprep.mubr.msk.bf16.mxu0 %vm320_vm2, %v7107_v57  ;;  %6797 = vmatprep.mubr.msk.bf16.mxu1 %vm320_vm2, %v7013_v33  ;;  %v7110_v33 = vld [vmem:[%s7194_s25 + $0xc8] sm:$0xff]  }
 0x216   : > { %v3259_v55 = vpop.f32.mrf.mxu0  ;;  %v3565_v30 = vpop.f32.mrf.mxu1 }
 0x217   : > { %v8045_v25 = vadd.f32 %v6591_v36, %v3267_v1  ;;  %v3260_v42 = vadd.f32 %v3259_v55, %v7906_v6  ;;  %v7109_v6 = vld [vmem:[%s7194_s25 + $0xc0] sm:$0xff]  }
 0x218   : > { %v6558_v41 = vpop.f32.mrf.mxu0  ;;  %v6592_v16 = vpop.f32.mrf.mxu1 }
 0x219   : > { %v8048_v2 = vadd.f32 %v3565_v30, %v3260_v42  ;;  %v7018_v30 = vld [vmem:[%s7194_s25 + $0x1f8] sm:$0xff]   ;;  %v7019_v16 = vld [vmem:[%s7194_s25 + $0x200] sm:$0xff]  }
 0x21a   : > { %v3262_v22 = vpop.f32.mrf.mxu0  ;;  %v3568_v51 = vpop.f32.mrf.mxu1 }
 0x21c   : > { %v6561_v60 = vpop.f32.mrf.mxu0  ;;  %6764 = vmatmul.mubr.msk.bf16.gmra.mxu0 %vm320_vm2, %v7108_v13  ;;  %v6595_v10 = vpop.f32.mrf.mxu1  ;;  %6798 = vmatmul.mubr.msk.bf16.gmra.mxu1 %vm320_vm2, %v7014_v29 }
 0x21d   : > { %v3281_v32 = vadd.f32 %v6561_v60, %v7916_v27  ;;  %6767 = vmatprep.mubr.msk.bf16.mxu0 %vm320_vm2, %v7109_v6  ;;  %6801 = vmatprep.mubr.msk.bf16.mxu1 %vm320_vm2, %v7015_v34  ;;  %v7112_v34 = vld [vmem:[%s7194_s25 + $0xd8] sm:$0xff]  }
 0x21e   : > { %v3273_v46 = vpop.f32.mrf.mxu0  ;;  %v3579_v4 = vpop.f32.mrf.mxu1 }
 0x21f   : > { %v8059_v24 = vadd.f32 %v6595_v10, %v3281_v32  ;;  %v3274_v5 = vadd.f32 %v3273_v46, %v7926_v44  ;;  %v7111_v44 = vld [vmem:[%s7194_s25 + $0xd0] sm:$0xff]  }
 0x220   : > { %v6562_v45 = vpop.f32.mrf.mxu0  ;;  %v6596_v27 = vpop.f32.mrf.mxu1 }
 0x221   : > { %v8062_v53 = vadd.f32 %v3579_v4, %v3274_v5  ;;  %v7020_v4 = vld [vmem:[%s7194_s25 + $0x208] sm:$0xff]   ;;  %v7021_v27 = vld [vmem:[%s7194_s25 + $0x210] sm:$0xff]  }
 0x222   : > { %v3276_v15 = vpop.f32.mrf.mxu0  ;;  %v3582_v56 = vpop.f32.mrf.mxu1 }
 0x224   : > { %v6565_v26 = vpop.f32.mrf.mxu0  ;;  %6768 = vmatmul.mubr.msk.bf16.gmra.mxu0 %vm320_vm2, %v7110_v33  ;;  %v6599_v31 = vpop.f32.mrf.mxu1  ;;  %6802 = vmatmul.mubr.msk.bf16.gmra.mxu1 %vm320_vm2, %v7016_v14 }
 0x225   : > { %v3295_v43 = vadd.f32 %v6565_v26, %v7934_v49  ;;  %6771 = vmatprep.mubr.msk.bf16.mxu0 %vm320_vm2, %v7111_v44  ;;  %6805 = vmatprep.mubr.msk.bf16.mxu1 %vm320_vm2, %v7017_v63  ;;  %v7114_v63 = vld [vmem:[%s7194_s25 + $0xe8] sm:$0xff]  }
 0x226   : > { %v3287_v52 = vpop.f32.mrf.mxu0  ;;  %v3593_v57 = vpop.f32.mrf.mxu1 }
 0x227   : > { %v8073_v1 = vadd.f32 %v6599_v31, %v3295_v43  ;;  %v3288_v36 = vadd.f32 %v3287_v52, %v7944_v12  ;;  %v7113_v12 = vld [vmem:[%s7194_s25 + $0xe0] sm:$0xff]  }
 0x228   : > { %v6566_v55 = vpop.f32.mrf.mxu0  ;;  %v6600_v49 = vpop.f32.mrf.mxu1 }
 0x229   : > { %v8076_v42 = vadd.f32 %v3593_v57, %v3288_v36  ;;  %v7022_v57 = vld [vmem:[%s7194_s25 + $0x218] sm:$0xff]   ;;  %v7023_v49 = vld [vmem:[%s7194_s25 + $0x220] sm:$0xff]  }
 0x22a   : > { %v3290_v41 = vpop.f32.mrf.mxu0  ;;  %v3596_v29 = vpop.f32.mrf.mxu1 }
 0x22c   : > { %v6569_v22 = vpop.f32.mrf.mxu0  ;;  %6772 = vmatmul.mubr.msk.bf16.gmra.mxu0 %vm320_vm2, %v7112_v34  ;;  %v6603_v60 = vpop.f32.mrf.mxu1  ;;  %6806 = vmatmul.mubr.msk.bf16.gmra.mxu1 %vm320_vm2, %v7018_v30 }
 0x22d   : > { %v3309_v51 = vadd.f32 %v6569_v22, %v7952_v21  ;;  %6775 = vmatprep.mubr.msk.bf16.mxu0 %vm320_vm2, %v7113_v12  ;;  %6809 = vmatprep.mubr.msk.bf16.mxu1 %vm320_vm2, %v7019_v16  ;;  %v7116_v16 = vld [vmem:[%s7194_s25 + $0xf8] sm:$0xff]  }
 0x22e   : > { %v3301_v13 = vpop.f32.mrf.mxu0  ;;  %v3607_v6 = vpop.f32.mrf.mxu1 }
 0x22f   : > { %v8087_v32 = vadd.f32 %v6603_v60, %v3309_v51  ;;  %v3302_v10 = vadd.f32 %v3301_v13, %v7962_v0  ;;  %v7115_v0 = vld [vmem:[%s7194_s25 + $0xf0] sm:$0xff]  }
 0x230   : > { %v6570_v46 = vpop.f32.mrf.mxu0  ;;  %v6604_v21 = vpop.f32.mrf.mxu1 }
 0x231   : > { %v8090_v5 = vadd.f32 %v3607_v6, %v3302_v10  ;;  %v7024_v6 = vld [vmem:[%s7194_s25 + $0x228] sm:$0xff]   ;;  %v7025_v21 = vld [vmem:[%s7194_s25 + $0x230] sm:$0xff]  }
 0x232   : > { %v3304_v45 = vpop.f32.mrf.mxu0  ;;  %v3610_v14 = vpop.f32.mrf.mxu1 }
 0x234   : > { %v6573_v15 = vpop.f32.mrf.mxu0  ;;  %6776 = vmatmul.mubr.msk.bf16.gmra.mxu0 %vm320_vm2, %v7114_v63  ;;  %v6607_v26 = vpop.f32.mrf.mxu1  ;;  %6810 = vmatmul.mubr.msk.bf16.gmra.mxu1 %vm320_vm2, %v7020_v4 }
 0x235   : > { %v3323_v56 = vadd.f32 %v6573_v15, %v7970_v48  ;;  %6779 = vmatprep.mubr.msk.bf16.mxu0 %vm320_vm2, %v7115_v0  ;;  %6813 = vmatprep.mubr.msk.bf16.mxu1 %vm320_vm2, %v7021_v27  ;;  %v7118_v27 = vld [vmem:[%s7194_s25 + $0x108] sm:$0xff]  }
 0x236   : > { %v3315_v33 = vpop.f32.mrf.mxu0  ;;  %v3621_v44 = vpop.f32.mrf.mxu1 }
 0x237   : > { %v8101_v43 = vadd.f32 %v6607_v26, %v3323_v56  ;;  %v3316_v31 = vadd.f32 %v3315_v33, %v7980_v40  ;;  %v7117_v40 = vld [vmem:[%s7194_s25 + $0x100] sm:$0xff]  }
 0x238   : > { %v6574_v52 = vpop.f32.mrf.mxu0  ;;  %v6608_v48 = vpop.f32.mrf.mxu1 }
 0x239   : > { %v8104_v36 = vadd.f32 %v3621_v44, %v3316_v31 }
 0x23a   : > { %v3318_v55 = vpop.f32.mrf.mxu0  ;;  %v3624_v30 = vpop.f32.mrf.mxu1 }
 0x23b   : > { %v7120_v55 = vld [vmem:[%s7194_s25 + $0x118] sm:$0xff]  }
 0x23c   : > { %v6577_v41 = vpop.f32.mrf.mxu0  ;;  %6780 = vmatmul.mubr.msk.bf16.gmra.mxu0 %vm320_vm2, %v7116_v16  ;;  %v6611_v22 = vpop.f32.mrf.mxu1  ;;  %6814 = vmatmul.mubr.msk.bf16.gmra.mxu1 %vm320_vm2, %v7022_v57 }
 0x23d   : > { %v3337_v29 = vadd.f32 %v6577_v41, %v7988_v38  ;;  %6783 = vmatprep.mubr.msk.bf16.mxu0 %vm320_vm2, %v7117_v40  ;;  %6817 = vmatprep.mubr.msk.bf16.mxu1 %vm320_vm2, %v7023_v49 }
 0x23e   : > { %v3329_v34 = vpop.f32.mrf.mxu0  ;;  %v3635_v12 = vpop.f32.mrf.mxu1 }
 0x23f   : > { %v8115_v51 = vadd.f32 %v6611_v22, %v3337_v29  ;;  %v3330_v60 = vadd.f32 %v3329_v34, %v7998_v50  ;;  %v7119_v50 = vld [vmem:[%s7194_s25 + $0x110] sm:$0xff]  }
 0x240   : > { %v6578_v13 = vpop.f32.mrf.mxu0  ;;  %v6612_v38 = vpop.f32.mrf.mxu1 }
 0x241   : > { %v8118_v10 = vadd.f32 %v3635_v12, %v3330_v60 }
 0x242   : > { %v3332_v46 = vpop.f32.mrf.mxu0  ;;  %v3638_v4 = vpop.f32.mrf.mxu1 }
 0x244   : > { %v6581_v45 = vpop.f32.mrf.mxu0  ;;  %6784 = vmatmul.mubr.msk.bf16.gmra.mxu0 %vm320_vm2, %v7118_v27  ;;  %v6615_v15 = vpop.f32.mrf.mxu1  ;;  %6818 = vmatmul.mubr.msk.bf16.gmra.mxu1 %vm320_vm2, %v7024_v6 }
 0x245   : > { %v3351_v14 = vadd.f32 %v6581_v45, %v8006_v19  ;;  %6787 = vmatprep.mubr.msk.bf16.mxu0 %vm320_vm2, %v7119_v50  ;;  %6821 = vmatprep.mubr.msk.bf16.mxu1 %vm320_vm2, %v7025_v21  ;;  %v7026_v19 = vld [vmem:[%s7194_s25 + $0x238] sm:$0xff]  }
 0x246   : > { %v3343_v63 = vpop.f32.mrf.mxu0  ;;  %v3649_v0 = vpop.f32.mrf.mxu1 }
 0x247   : > { %v8129_v56 = vadd.f32 %v6615_v15, %v3351_v14  ;;  %v3344_v26 = vadd.f32 %v3343_v63, %v8016_v8 }
 0x248   : > { %v6582_v33 = vpop.f32.mrf.mxu0  ;;  %v6616_v44 = vpop.f32.mrf.mxu1 }
 0x249   : > { %v8132_v31 = vadd.f32 %v3649_v0, %v3344_v26 }
 0x24a   : > { %v3346_v52 = vpop.f32.mrf.mxu0  ;;  %v3652_v48 = vpop.f32.mrf.mxu1 }
 0x24c   : > { %v6585_v57 = vpop.f32.mrf.mxu0  ;;  %6788 = vmatmul.mubr.msk.bf16.gmra.mxu0 %vm320_vm2, %v7120_v55  ;;  %v6619_v30 = vpop.f32.mrf.mxu1  ;;  %6822 = vmatmul.mubr.msk.bf16.gmra.mxu1 %vm320_vm2, %v7026_v19 }
 0x24d   : > { %v3365_v49 = vadd.f32 %v6585_v57, %v8024_v37 }
 0x24e   : > { %v3357_v41 = vpop.f32.mrf.mxu0  ;;  %v3663_v29 = vpop.f32.mrf.mxu1 }
 0x24f   : > { %v8139_v16 = vadd.f32 %v6619_v30, %v3365_v49  ;;  %v3358_v8 = vadd.f32 %v3357_v41, %v8034_v17 }
 0x250   : > { %v6586_v22 = vpop.f32.mrf.mxu0  ;;  %v6620_v34 = vpop.f32.mrf.mxu1 }
 0x251   : > { %v8142_v40 = vadd.f32 %v3663_v29, %v3358_v8 }
 0x252   : > { %v3360_v60 = vpop.f32.mrf.mxu0  ;;  %v3666_v12 = vpop.f32.mrf.mxu1 }
 0x254   : > { %v6625_v13 = vpop.f32.mrf.mxu0  ;;  %v6659_v6 = vpop.f32.mrf.mxu1 }
 0x255   : > { %v3838_v38 = vadd.f32 %v6625_v13, %v8045_v25 }
 0x256   : > { %v3726_v37 = vpop.f32.mrf.mxu0  ;;  %v3887_v4 = vpop.f32.mrf.mxu1 }
 0x257   : > { %v8145_v46 = vadd.f32 %v6659_v6, %v3838_v38  ;;  %v3837_v21 = vadd.f32 %v3726_v37, %v8048_v2 }
 0x258   : > { %v6626_v45 = vpop.f32.mrf.mxu0  ;;  %v6660_v17 = vpop.f32.mrf.mxu1 }
 0x259   : > { %v8148_v27 = vadd.f32 %v3887_v4, %v3837_v21 }
 0x25a   : > { %v3729_v14 = vpop.f32.mrf.mxu0  ;;  %v3890_v15 = vpop.f32.mrf.mxu1 }
 0x25c   : > { %v6629_v50 = vpop.f32.mrf.mxu0  ;;  %v6663_v26 = vpop.f32.mrf.mxu1 }
 0x25d   : > { %v3840_v63 = vadd.f32 %v6629_v50, %v8059_v24 }
 0x25e   : > { %v3740_v0 = vpop.f32.mrf.mxu0  ;;  %v3901_v44 = vpop.f32.mrf.mxu1 }
 0x25f   : > { %v8151_v33 = vadd.f32 %v6663_v26, %v3840_v63  ;;  %v3839_v25 = vadd.f32 %v3740_v0, %v8062_v53 }
 0x260   : > { %v6630_v19 = vpop.f32.mrf.mxu0  ;;  %v6664_v2 = vpop.f32.mrf.mxu1 }
 0x261   : > { %v8154_v52 = vadd.f32 %v3901_v44, %v3839_v25 }
 0x262   : > { %v3743_v48 = vpop.f32.mrf.mxu0  ;;  %v3904_v57 = vpop.f32.mrf.mxu1 }
 0x264   : > { %v6633_v55 = vpop.f32.mrf.mxu0  ;;  %v6667_v30 = vpop.f32.mrf.mxu1 }
 0x265   : > { %v3842_v49 = vadd.f32 %v6633_v55, %v8073_v1 }
 0x266   : > { %v3754_v41 = vpop.f32.mrf.mxu0  ;;  %v3915_v29 = vpop.f32.mrf.mxu1 }
 0x267   : > { %v8157_v8 = vadd.f32 %v6667_v30, %v3842_v49  ;;  %v3841_v24 = vadd.f32 %v3754_v41, %v8076_v42 }
 0x268   : > { %v6634_v22 = vpop.f32.mrf.mxu0  ;;  %v6668_v53 = vpop.f32.mrf.mxu1 }
 0x269   : > { %v8160_v34 = vadd.f32 %v3915_v29, %v3841_v24 }
 0x26a   : > { %v3757_v60 = vpop.f32.mrf.mxu0  ;;  %v3918_v12 = vpop.f32.mrf.mxu1 }
 0x26c   : > { %v6637_v13 = vpop.f32.mrf.mxu0  ;;  %v6671_v6 = vpop.f32.mrf.mxu1 }
 0x26d   : > { %v3844_v38 = vadd.f32 %v6637_v13, %v8087_v32 }
 0x26e   : > { %v3768_v37 = vpop.f32.mrf.mxu0  ;;  %v3929_v4 = vpop.f32.mrf.mxu1 }
 0x26f   : > { %v8163_v21 = vadd.f32 %v6671_v6, %v3844_v38  ;;  %v3843_v1 = vadd.f32 %v3768_v37, %v8090_v5 }
 0x270   : > { %v6638_v45 = vpop.f32.mrf.mxu0  ;;  %v6672_v42 = vpop.f32.mrf.mxu1 }
 0x271   : > { %v8166_v17 = vadd.f32 %v3929_v4, %v3843_v1 }
 0x272   : > { %v3771_v14 = vpop.f32.mrf.mxu0  ;;  %v3932_v15 = vpop.f32.mrf.mxu1 }
 0x274   : > { %v6641_v50 = vpop.f32.mrf.mxu0  ;;  %v6675_v26 = vpop.f32.mrf.mxu1 }
 0x275   : > { %v3846_v63 = vadd.f32 %v6641_v50, %v8101_v43 }
 0x276   : > { %v3782_v0 = vpop.f32.mrf.mxu0  ;;  %v3943_v44 = vpop.f32.mrf.mxu1 }
 0x277   : > { %v8169_v25 = vadd.f32 %v6675_v26, %v3846_v63  ;;  %v3845_v32 = vadd.f32 %v3782_v0, %v8104_v36 }
 0x278   : > { %v6642_v19 = vpop.f32.mrf.mxu0  ;;  %v6676_v5 = vpop.f32.mrf.mxu1 }
 0x279   : > { %v8172_v2 = vadd.f32 %v3943_v44, %v3845_v32 }
 0x27a   : > { %v3785_v48 = vpop.f32.mrf.mxu0  ;;  %v3946_v57 = vpop.f32.mrf.mxu1 }
 0x27c   : > { %v6645_v55 = vpop.f32.mrf.mxu0  ;;  %v6679_v30 = vpop.f32.mrf.mxu1 }
 0x27d   : > { %v3848_v49 = vadd.f32 %v6645_v55, %v8115_v51 }
 0x27e   : > { %v3796_v41 = vpop.f32.mrf.mxu0  ;;  %v3957_v29 = vpop.f32.mrf.mxu1 }
 0x27f   : > { %v8175_v24 = vadd.f32 %v6679_v30, %v3848_v49  ;;  %v3847_v43 = vadd.f32 %v3796_v41, %v8118_v10 }
 0x280   : > { %v6646_v22 = vpop.f32.mrf.mxu0  ;;  %v6680_v36 = vpop.f32.mrf.mxu1 }
 0x281   : > { %v8178_v53 = vadd.f32 %v3957_v29, %v3847_v43 }
 0x282   : > { %v3799_v60 = vpop.f32.mrf.mxu0  ;;  %v3960_v12 = vpop.f32.mrf.mxu1 }
 0x284   : > { %v6649_v13 = vpop.f32.mrf.mxu0  ;;  %v6683_v6 = vpop.f32.mrf.mxu1 }
 0x285   : > { %v3850_v38 = vadd.f32 %v6649_v13, %v8129_v56 }
 0x286   : > { %v3810_v37 = vpop.f32.mrf.mxu0  ;;  %v3971_v4 = vpop.f32.mrf.mxu1 }
 0x287   : > { %v8181_v1 = vadd.f32 %v6683_v6, %v3850_v38  ;;  %v3849_v51 = vadd.f32 %v3810_v37, %v8132_v31 }
 0x288   : > { %v6650_v45 = vpop.f32.mrf.mxu0  ;;  %v6684_v10 = vpop.f32.mrf.mxu1 }
 0x289   : > { %v8184_v42 = vadd.f32 %v3971_v4, %v3849_v51 }
 0x28a   : > { %v3813_v14 = vpop.f32.mrf.mxu0  ;;  %v3974_v15 = vpop.f32.mrf.mxu1 }
 0x28c   : > { %v6653_v50 = vpop.f32.mrf.mxu0  ;;  %v6687_v26 = vpop.f32.mrf.mxu1 }
 0x28d   : > { %v3852_v63 = vadd.f32 %v6653_v50, %v8139_v16 }
 0x28e   : > { %v3824_v0 = vpop.f32.mrf.mxu0  ;;  %v3985_v44 = vpop.f32.mrf.mxu1 }
 0x28f   : > { %v8187_v32 = vadd.f32 %v6687_v26, %v3852_v63  ;;  %v3851_v56 = vadd.f32 %v3824_v0, %v8142_v40 }
 0x290   : > { %v6654_v19 = vpop.f32.mrf.mxu0  ;;  %v6688_v31 = vpop.f32.mrf.mxu1 }
 0x291   : > { %v8190_v5 = vadd.f32 %v3985_v44, %v3851_v56 }
 0x292   : > { %v3827_v48 = vpop.f32.mrf.mxu0  ;;  %v3988_v57 = vpop.f32.mrf.mxu1 }
 0x294   : > { %v6693_v55 = vpop.f32.mrf.mxu0  ;;  %v6727_v30 = vpop.f32.mrf.mxu1 }
 0x295   : > { %v4320_v49 = vadd.f32 %v6693_v55, %v8145_v46 }
 0x296   : > { %v4208_v41 = vpop.f32.mrf.mxu0  ;;  %v4369_v29 = vpop.f32.mrf.mxu1 }
 0x297   : > { %v8193_v43 = vadd.f32 %v6727_v30, %v4320_v49  ;;  %v4319_v16 = vadd.f32 %v4208_v41, %v8148_v27 }
 0x298   : > { %v6694_v22 = vpop.f32.mrf.mxu0  ;;  %v6728_v40 = vpop.f32.mrf.mxu1 }
 0x299   : > { %v8196_v36 = vadd.f32 %v4369_v29, %v4319_v16 }
 0x29a   : > { %v4211_v60 = vpop.f32.mrf.mxu0  ;;  %v4372_v12 = vpop.f32.mrf.mxu1 }
 0x29c   : > { %v8198_v13 = vpop.f32.mrf.mxu0  ;;  %v8200_v38 = vpop.f32.mrf.mxu1 }
 0x29e   : > { %v8202_v6 = vpop.f32.mrf.mxu0  ;;  %v8204_v46 = vpop.f32.mrf.mxu1 }
 0x2a0   : > { %v6698_v37 = vpop.f32.mrf.mxu0  ;;  %v6732_v51 = vpop.f32.mrf.mxu1 }
 0x2a2   : > { %v4225_v4 = vpop.f32.mrf.mxu0  ;;  %v4386_v45 = vpop.f32.mrf.mxu1 }
 0x2a4   : > { %v6701_v27 = vpop.f32.mrf.mxu0  ;;  %v6735_v14 = vpop.f32.mrf.mxu1 }
 0x2a5   : > { %v4324_v10 = vadd.f32 %v6701_v27, %v8157_v8 }
 0x2a6   : > { %v4236_v15 = vpop.f32.mrf.mxu0  ;;  %v4397_v26 = vpop.f32.mrf.mxu1 }
 0x2a7   : > { %v8207_v50 = vadd.f32 %v6735_v14, %v4324_v10  ;;  %v4323_v63 = vadd.f32 %v4236_v15, %v8160_v34 }
 0x2a8   : > { %v6702_v0 = vpop.f32.mrf.mxu0  ;;  %v6736_v44 = vpop.f32.mrf.mxu1 }
 0x2a9   : > { %v8210_v56 = vadd.f32 %v4397_v26, %v4323_v63 }
 0x2aa   : > { %v4239_v19 = vpop.f32.mrf.mxu0  ;;  %v4400_v31 = vpop.f32.mrf.mxu1 }
 0x2ac   : > { %v8212_v48 = vpop.f32.mrf.mxu0  ;;  %v8214_v57 = vpop.f32.mrf.mxu1 }
 0x2ae   : > { %v8216_v55 = vpop.f32.mrf.mxu0  ;;  %v8218_v8 = vpop.f32.mrf.mxu1 }
 0x2b0   : > { %v6706_v49 = vpop.f32.mrf.mxu0  ;;  %v6740_v30 = vpop.f32.mrf.mxu1 }
 0x2b2   : > { %v4253_v41 = vpop.f32.mrf.mxu0  ;;  %v4414_v16 = vpop.f32.mrf.mxu1 }
 0x2b4   : > { %v6709_v34 = vpop.f32.mrf.mxu0  ;;  %v6743_v22 = vpop.f32.mrf.mxu1 }
 0x2b5   : > { %v4328_v29 = vadd.f32 %v6709_v34, %v8169_v25 }
 0x2b6   : > { %v4264_v40 = vpop.f32.mrf.mxu0  ;;  %v4425_v37 = vpop.f32.mrf.mxu1 }
 0x2b7   : > { %v8221_v60 = vadd.f32 %v6743_v22, %v4328_v29  ;;  %v4327_v12 = vadd.f32 %v4264_v40, %v8172_v2 }
 0x2b8   : > { %v6710_v51 = vpop.f32.mrf.mxu0  ;;  %v6744_v45 = vpop.f32.mrf.mxu1 }
 0x2b9   : > { %v8224_v4 = vadd.f32 %v4425_v37, %v4327_v12 }
 0x2ba   : > { %v4267_v27 = vpop.f32.mrf.mxu0  ;;  %v4428_v10 = vpop.f32.mrf.mxu1 }
 0x2bc   : > { %v8226_v14 = vpop.f32.mrf.mxu0  ;;  %v8228_v15 = vpop.f32.mrf.mxu1 }
 0x2be   : > { %v8230_v63 = vpop.f32.mrf.mxu0  ;;  %v8232_v25 = vpop.f32.mrf.mxu1 }
 0x2c0   : > { %v6714_v26 = vpop.f32.mrf.mxu0  ;;  %v6748_v0 = vpop.f32.mrf.mxu1 }
 0x2c2   : > { %v4281_v44 = vpop.f32.mrf.mxu0  ;;  %v4442_v19 = vpop.f32.mrf.mxu1 }
 0x2c4   : > { %v6717_v2 = vpop.f32.mrf.mxu0  ;;  %v6751_v49 = vpop.f32.mrf.mxu1 }
 0x2c5   : > { %v4332_v31 = vadd.f32 %v6717_v2, %v8181_v1 }
 0x2c6   : > { %v4292_v30 = vpop.f32.mrf.mxu0  ;;  %v4453_v34 = vpop.f32.mrf.mxu1 }
 0x2c7   : > { %v8235_v41 = vadd.f32 %v6751_v49, %v4332_v31  ;;  %v4331_v16 = vadd.f32 %v4292_v30, %v8184_v42  ;;  %v4322_v49 = vadd.f32 %v8198_v13, %v8151_v33 }
 0x2c8   : > { %v6718_v29 = vpop.f32.mrf.mxu0  ;;  %v6752_v40 = vpop.f32.mrf.mxu1 }
 0x2c9   : > { %v8238_v22 = vadd.f32 %v4453_v34, %v4331_v16  ;;  %v4321_v40 = vadd.f32 %v8202_v6, %v8154_v52 }
 0x2ca   : > { %v4295_v12 = vpop.f32.mrf.mxu0  ;;  %v4456_v37 = vpop.f32.mrf.mxu1 }
 0x2cb   : > { %v4482_v33 = vadd.f32 %v8204_v46, %v4321_v40 }
 0x2cc   : > { %v8240_v51 = vpop.f32.mrf.mxu0  ;;  %v8242_v45 = vpop.f32.mrf.mxu1 }
 0x2ce   : > { %v8244_v27 = vpop.f32.mrf.mxu0  ;;  %v8246_v1 = vpop.f32.mrf.mxu1 }
 0x2d0   : > { %v6722_v10 = vpop.f32.mrf.mxu0  ;;  %v6756_v26 = vpop.f32.mrf.mxu1 }
 0x2d2   : > { %v4309_v0 = vpop.f32.mrf.mxu0  ;;  %v4470_v44 = vpop.f32.mrf.mxu1 }
 0x2d4   : > { %v6761_v42 = vpop.f32.mrf.mxu0  ;;  %v6795_v2 = vpop.f32.mrf.mxu1 }
 0x2d5   : > { %v4642_v19 = vadd.f32 %v6761_v42, %v8193_v43  ;;  %v4483_v43 = vadd.f32 %v8200_v38, %v4322_v49 }
 0x2d6   : > { %v4530_v31 = vpop.f32.mrf.mxu0  ;;  %v4851_v34 = vpop.f32.mrf.mxu1 }
 0x2d7   : > { %v4963_v30 = vadd.f32 %v6795_v2, %v4642_v19  ;;  %v4641_v16 = vadd.f32 %v4530_v31, %v8196_v36 }
 0x2d8   : > { %v6762_v29 = vpop.f32.mrf.mxu0  ;;  %v6796_v10 = vpop.f32.mrf.mxu1 }
 0x2d9   : > { %v4979_v12 = vmax.f32 %v7894_v11, %v4963_v30  ;;  %v4962_v37 = vadd.f32 %v4851_v34, %v4641_v16 }
 0x2da   : > { %v4533_v26 = vpop.f32.mrf.mxu0  ;;  %v4854_v44 = vpop.f32.mrf.mxu1 }
 0x2db   : > { %v4978_v0 = vmax.f32 %v7904_v9, %v4962_v37  ;;  %v8262_v9 = vld [vmem:[%s8324_s2] ss:$0 sm:$0xff] }
 0x2dc   : > { %v6765_v42 = vpop.f32.mrf.mxu0  ;;  %v6799_v19 = vpop.f32.mrf.mxu1 }
 0x2dd   : > { %v4994_v13 = vmax.f32 %v4978_v0, %v4979_v12  ;;  %v4644_v36 = vadd.f32 %v6765_v42, %v4483_v43 }
 0x2de   : > { %v4544_v2 = vpop.f32.mrf.mxu0  ;;  %v4865_v52 = vpop.f32.mrf.mxu1 }
 0x2df   : > { %v4965_v31 = vadd.f32 %v6799_v19, %v4644_v36  ;;  %v4643_v29 = vadd.f32 %v4544_v2, %v4482_v33  ;;  %v5009_v40 = vadd.f32 %v8262_v9, %v4994_v13 }
 0x2e0   : > { %v6766_v11 = vpop.f32.mrf.mxu0  ;;  %v6800_v16 = vpop.f32.mrf.mxu1 }
 0x2e1   : > { %v4981_v6 = vmax.f32 %v7914_v54, %v4965_v31  ;;  %v4964_v30 = vadd.f32 %v4865_v52, %v4643_v29  ;;  %v4326_v54 = vadd.f32 %v8212_v48, %v8163_v21  ;;  %v5017_v13 = vmax.f32 %v5009_v40, 0.0 }
 0x2e2   : > { %v4547_v38 = vpop.f32.mrf.mxu0  ;;  %v4868_v49 = vpop.f32.mrf.mxu1 }
 0x2e3   : > { %v4980_v46 = vmax.f32 %v7924_v35, %v4964_v30  ;;  %v4325_v35 = vadd.f32 %v8216_v55, %v8166_v17 }
 0x2e4   : > { %v6769_v34 = vpop.f32.mrf.mxu0  ;;  %v6803_v10 = vpop.f32.mrf.mxu1 }
 0x2e5   : > { %v4995_v12 = vmax.f32 %v4980_v46, %v4981_v6  ;;  %v4646_v37 = vadd.f32 %v6769_v34, %v8207_v50  ;;  %v4486_v29 = vadd.f32 %v8218_v8, %v4325_v35 }
 0x2e6   : > { %v4558_v26 = vpop.f32.mrf.mxu0  ;;  %v4879_v42 = vpop.f32.mrf.mxu1 }
 0x2e7   : > { %v5010_v43 = vadd.f32 %v8262_v9, %v4995_v12  ;;  %v4967_v0 = vadd.f32 %v6803_v10, %v4646_v37  ;;  %v4645_v44 = vadd.f32 %v4558_v26, %v8210_v56  ;;  %v4487_v56 = vadd.f32 %v8214_v57, %v4326_v54 }
 0x2e8   : > { %v6770_v33 = vpop.f32.mrf.mxu0  ;;  %v6804_v2 = vpop.f32.mrf.mxu1 }
 0x2e9   : > { %v5018_v36 = vmax.f32 %v5010_v43, 0.0  ;;  %v4983_v50 = vmax.f32 %v7932_v61, %v4967_v0  ;;  %v4966_v19 = vadd.f32 %v4879_v42, %v4645_v44  ;;  %v4330_v0 = vadd.f32 %v8226_v14, %v8175_v24 }
 0x2ea   : > { %v4561_v21 = vpop.f32.mrf.mxu0  ;;  %v4882_v17 = vpop.f32.mrf.mxu1 }
 0x2eb   : > { %v5887_v48 = vpack.c.bf16 %v5018_v36, %v5017_v13  ;;  %v4982_v31 = vmax.f32 %v7942_v47, %v4966_v19  ;;  %v4491_v24 = vadd.f32 %v8228_v15, %v4330_v0 }
 0x2ec   : > { %v6773_v55 = vpop.f32.mrf.mxu0  ;;  %v6807_v11 = vpop.f32.mrf.mxu1 }
 0x2ed   : > { %5888 = vst [vmem:[%s8278_s13] sm:$0xff] %v5887_v48   ;;  %v4996_v61 = vmax.f32 %v4982_v31, %v4983_v50  ;;  %v4648_v52 = vadd.f32 %v6773_v55, %v4487_v56 }
 0x2ee   : > { %v4572_v6 = vpop.f32.mrf.mxu0  ;;  %v4893_v38 = vpop.f32.mrf.mxu1 }
 0x2ef   : > { %v4969_v30 = vadd.f32 %v6807_v11, %v4648_v52  ;;  %v4647_v16 = vadd.f32 %v4572_v6, %v4486_v29  ;;  %v5011_v8 = vadd.f32 %v8262_v9, %v4996_v61 }
 0x2f0   : > { %v6774_v46 = vpop.f32.mrf.mxu0  ;;  %v6808_v57 = vpop.f32.mrf.mxu1 }
 0x2f1   : > { %v4985_v49 = vmax.f32 %v7950_v7, %v4969_v30  ;;  %v4968_v34 = vadd.f32 %v4893_v38, %v4647_v16  ;;  %v5019_v13 = vmax.f32 %v5011_v8, 0.0  ;;  %v4334_v57 = vadd.f32 %v8240_v51, %v8187_v32 }
 0x2f2   : > { %v4575_v40 = vpop.f32.mrf.mxu0  ;;  %v4896_v12 = vpop.f32.mrf.mxu1 }
 0x2f3   : > { %v4984_v47 = vmax.f32 %v7960_v62, %v4968_v34  ;;  %v4329_v62 = vadd.f32 %v8230_v63, %v8178_v53  ;;  %v4495_v32 = vadd.f32 %v8242_v45, %v4334_v57 }
 0x2f4   : > { %v6777_v37 = vpop.f32.mrf.mxu0  ;;  %v6811_v54 = vpop.f32.mrf.mxu1 }
 0x2f5   : > { %v4997_v10 = vmax.f32 %v4984_v47, %v4985_v49  ;;  %v4650_v26 = vadd.f32 %v6777_v37, %v8221_v60  ;;  %v4490_v48 = vadd.f32 %v8232_v25, %v4329_v62 }
 0x2f6   : > { %v4586_v43 = vpop.f32.mrf.mxu0  ;;  %v4907_v35 = vpop.f32.mrf.mxu1 }
 0x2f7   : > { %v5012_v44 = vadd.f32 %v8262_v9, %v4997_v10  ;;  %v4971_v7 = vadd.f32 %v6811_v54, %v4650_v26  ;;  %v4649_v42 = vadd.f32 %v4586_v43, %v8224_v4 }
 0x2f8   : > { %v6778_v33 = vpop.f32.mrf.mxu0  ;;  %v6812_v19 = vpop.f32.mrf.mxu1 }
 0x2f9   : > { %v5020_v36 = vmax.f32 %v5012_v44, 0.0  ;;  %v4987_v60 = vmax.f32 %v7968_v20, %v4971_v7  ;;  %v4970_v50 = vadd.f32 %v4907_v35, %v4649_v42 }
 0x2fa   : > { %v4589_v2 = vpop.f32.mrf.mxu0  ;;  %v4910_v56 = vpop.f32.mrf.mxu1 }
 0x2fb   : > { %v5892_v14 = vpack.c.bf16 %v5020_v36, %v5019_v13  ;;  %v4986_v21 = vmax.f32 %v7978_v23, %v4970_v50 }
 0x2fc   : > { %v6781_v4 = vpop.f32.mrf.mxu0  ;;  %v6815_v63 = vpop.f32.mrf.mxu1 }
 0x2fd   : > { %5904 = vst [vmem:[%s8278_s13 + $0x8] sm:$0xff] %v5892_v14   ;;  %v4998_v31 = vmax.f32 %v4986_v21, %v4987_v60  ;;  %v4652_v53 = vadd.f32 %v6781_v4, %v4491_v24 }
 0x2fe   : > { %v4600_v17 = vpop.f32.mrf.mxu0  ;;  %v4921_v20 = vpop.f32.mrf.mxu1 }
 0x2ff   : > { %v4973_v55 = vadd.f32 %v6815_v63, %v4652_v53  ;;  %v4651_v29 = vadd.f32 %v4600_v17, %v4490_v48  ;;  %v5013_v25 = vadd.f32 %v8262_v9, %v4998_v31 }
 0x300   : > { %v6782_v61 = vpop.f32.mrf.mxu0  ;;  %v6816_v15 = vpop.f32.mrf.mxu1 }
 0x301   : > { %v4989_v52 = vmax.f32 %v7986_v3, %v4973_v55  ;;  %v4972_v11 = vadd.f32 %v4921_v20, %v4651_v29  ;;  %v5021_v8 = vmax.f32 %v5013_v25, 0.0 }
 0x302   : > { %v4603_v6 = vpop.f32.mrf.mxu0  ;;  %v4924_v30 = vpop.f32.mrf.mxu1 }
 0x303   : > { %v4988_v23 = vmax.f32 %v7996_v59, %v4972_v11  ;;  %v4333_v59 = vadd.f32 %v8244_v27, %v8190_v5 }
 0x304   : > { %v6785_v16 = vpop.f32.mrf.mxu0  ;;  %v6819_v49 = vpop.f32.mrf.mxu1 }
 0x305   : > { %v4999_v38 = vmax.f32 %v4988_v23, %v4989_v52  ;;  %v4654_v46 = vadd.f32 %v6785_v16, %v8235_v41  ;;  %v4494_v7 = vadd.f32 %v8246_v1, %v4333_v59 }
 0x306   : > { %v4614_v34 = vpop.f32.mrf.mxu0  ;;  %v4935_v12 = vpop.f32.mrf.mxu1 }
 0x307   : > { %v5014_v40 = vadd.f32 %v8262_v9, %v4999_v38  ;;  %v4975_v3 = vadd.f32 %v6819_v49, %v4654_v46  ;;  %v4653_v47 = vadd.f32 %v4614_v34, %v8238_v22 }
 0x308   : > { %v6786_v37 = vpop.f32.mrf.mxu0  ;;  %v6820_v54 = vpop.f32.mrf.mxu1 }
 0x309   : > { %v5022_v10 = vmax.f32 %v5014_v40, 0.0  ;;  %v4991_v41 = vmax.f32 %v8004_v18, %v4975_v3  ;;  %v4974_v26 = vadd.f32 %v4935_v12, %v4653_v47 }
 0x30a   : > { %v4617_v43 = vpop.f32.mrf.mxu0  ;;  %v4938_v44 = vpop.f32.mrf.mxu1 }
 0x30b   : > { %v5897_v51 = vpack.c.bf16 %v5022_v10, %v5021_v8  ;;  %v4990_v0 = vmax.f32 %v8014_v58, %v4974_v26 }
 0x30c   : > { %v6789_v22 = vpop.f32.mrf.mxu0  ;;  %v6823_v27 = vpop.f32.mrf.mxu1 }
 0x30d   : > { %5905 = vst [vmem:[%s8278_s13 + $0x10] sm:$0xff] %v5897_v51   ;;  %v5000_v42 = vmax.f32 %v4990_v0, %v4991_v41  ;;  %v4656_v5 = vadd.f32 %v6789_v22, %v4495_v32 }
 0x30e   : > { %v4628_v35 = vpop.f32.mrf.mxu0  ;;  %v4949_v33 = vpop.f32.mrf.mxu1 }
 0x30f   : > { %v4977_v62 = vadd.f32 %v6823_v27, %v4656_v5  ;;  %v4655_v18 = vadd.f32 %v4628_v35, %v4494_v7  ;;  %v5015_v1 = vadd.f32 %v8262_v9, %v5000_v42 }
 0x310   : > { %v6790_v13 = vpop.f32.mrf.mxu0  ;;  %v6824_v60 = vpop.f32.mrf.mxu1 }
 0x311   : > { %v4993_v36 = vmax.f32 %v8022_v28, %v4977_v62  ;;  %v4976_v45 = vadd.f32 %v4949_v33, %v4655_v18  ;;  %v5023_v14 = vmax.f32 %v5015_v1, 0.0 }
 0x312   : > { %v4631_v50 = vpop.f32.mrf.mxu0  ;;  %v4952_v19 = vpop.f32.mrf.mxu1 }
 0x313   : > { %v4992_v58 = vmax.f32 %v8032_v39, %v4976_v45 }
 0x315   : > { %v5001_v2 = vmax.f32 %v4992_v58, %v4993_v36 }
 0x317   : > { %v5016_v24 = vadd.f32 %v8262_v9, %v5001_v2 }
 0x319   : > { %v5024_v21 = vmax.f32 %v5016_v24, 0.0 }
 0x31b   : > { %v5902_v56 = vpack.c.bf16 %v5024_v21, %v5023_v14 }
 0x31d   : > { %5906 = vst [vmem:[%s8278_s13 + $0x18] sm:$0xff] %v5902_v56  }
 0x31e PF: > { %s13_s12 = sadd.s32 1, %s7127_s12  }
 0x31f   : > { %p10_p4 = scmp.ge.s32.totalorder %s13_s12, 4  }
 0x321   :  { %12 = sbr.rel (!%p10_p4) target bundleno = 1 (0x1), region = 73 }

// kernel: conv_autoencoder_forward.7
= control target key start
LH: loop header
LB: loop body
LE: loop exit
PB: predicated region body
PF: predicated region fallthrough
CT: control target
= control target key end

     0   :  { %s4911_s12 = smov 0   ;;  %s5900_s0 = inlined_call_operand.vmem [shape: bf16[2,2,2,160,128], index: 0, kind: input, shape index: {}]   ;;  %s5901_s1 = inlined_call_operand.vmem [shape: bf16[9,128,128], index: 1, kind: input, shape index: {}]   ;;  %s5902_s2 = inlined_call_operand.vmem [shape: f32[1,128], index: 2, kind: input, shape index: {}]   ;;  %s5903_s3 = inlined_call_operand.vmem [shape: bf16[2,4,4,128], index: 3, kind: output, shape index: {}]  }
   0x1 LB: > { %s3340_s13 = sadd.s32 4294967295, %s4889_s12   ;;  %p3344_p0 = scmp.ge.s32.totalorder %s4889_s12, 1  ;;  %s4889_s12 = sphi %s4911_s12, %s13_s12  }
   0x2   : > { %p137_p1 = scmp.lt.s32.totalorder %s4889_s12, 3 }
   0x4   : > { %p138_p2 = pnand %p3344_p0, %p137_p1 }
   0x6   : > { %141 = sbr.rel (%p138_p2) target bundleno = 535 (0x217), region = 32 }
   0xb   : > { %v4665_v0 = vld [vmem:[%s5901_s1 + $0x78] sm:$0xff]   ;;  %p161_p3 = scmp.lt.s32.totalorder %s3340_s13, 1  ;;  %v4667_v2 = vld [vmem:[%s5901_s1 + $0x70] sm:$0xff]   ;;  %v4669_v4 = vld [vmem:[%s5901_s1 + $0x68] sm:$0xff]   ;;  %vm3249_vm0 = vcmask 1043456  }
   0xc   : > { %v4666_v1 = vld [vmem:[%s5901_s1 + $0x38] sm:$0xff]   ;;  %4080 = vmatprep.subr.bf16.mxu0 %v4665_v0  ;;  %v4668_v3 = vld [vmem:[%s5901_s1 + $0x30] sm:$0xff]   ;;  %v4670_v5 = vld [vmem:[%s5901_s1 + $0x28] sm:$0xff]  }
   0xd   : > { %4112 = vmatprep.subr.bf16.mxu1 %v4666_v1  ;;  %4081 = vmatpush3.bf16.msra.mxu0 %v4665_v0  ;;  %s5933_s13 = smov (!%p161_p3, %s3340_s13), 1  ;;  %v4671_v6 = vld [vmem:[%s5901_s1 + $0x60] sm:$0xff]   ;;  %v4673_v8 = vld [vmem:[%s5901_s1 + $0x58] sm:$0xff]   ;;  %v4675_v10 = vld [vmem:[%s5901_s1 + $0x50] sm:$0xff]  }
   0xe   : > { %4113 = vmatpush3.bf16.msra.mxu1 %v4666_v1  ;;  %4082 = vmatprep.subr.bf16.mxu0 %v4667_v2  ;;  %v4672_v7 = vld [vmem:[%s5901_s1 + $0x20] sm:$0xff]   ;;  %s4656_s30 = smul.u32 320, %s5933_s13  ;;  %v4674_v9 = vld [vmem:[%s5901_s1 + $0x18] sm:$0xff]   ;;  %v4676_v11 = vld [vmem:[%s5901_s1 + $0x10] sm:$0xff]  }
   0xf   : > { %4114 = vmatprep.subr.bf16.mxu1 %v4668_v3  ;;  %v4677_v14 = vld [vmem:[%s5901_s1 + $0x48] sm:$0xff]   ;;  %v4679_v16 = vld [vmem:[%s5901_s1 + $0x40] sm:$0xff]   ;;  %v4685_v19 = vld [vmem:[%s5901_s1 + $0xb8] sm:$0xff]  }
  0x10   : > { %s4955_s10 = scalar_lea.vmem %s5900_s0, %s4656_s30  ;;  %v4678_v15 = vld [vmem:[%s5901_s1 + $0x8] sm:$0xff]   ;;  %v4680_v17 = vld [vmem:[%s5901_s1] sm:$0xff]   ;;  %v4686_v20 = vld [vmem:[%s5901_s1 + $0xf8] sm:$0xff]   ;;  %s3791_s30 = sshll.u32 %s5933_s13, 3 }
  0x11   : > { %4083 = vmatpush3.bf16.msra.mxu0 %v4667_v2  ;;  %v4681_v12 = vld [vmem:[%s4955_s10 + $0xa0] sm:$0xff]   ;;  %v4683_v18 = vld [vmem:[%s4955_s10 + $0xa8] sm:$0xff]   ;;  %v4687_v22 = vld [vmem:[%s5901_s1 + $0xb0] sm:$0xff]   ;;  %s5870_s13 = scalar_lea.vmem %s5903_s3, %s3791_s30 }
  0x12   : > { %4115 = vmatpush3.bf16.msra.mxu1 %v4668_v3  ;;  %4084 = vmatprep.subr.bf16.mxu0 %v4669_v4  ;;  %v4682_v13 = vld [vmem:[%s4955_s10] sm:$0xff]   ;;  %v4684_v21 = vld [vmem:[%s4955_s10 + $0x8] sm:$0xff]   ;;  %v4688_v23 = vld [vmem:[%s5901_s1 + $0xf0] sm:$0xff]  }
  0x13   : > { %4116 = vmatprep.subr.bf16.mxu1 %v4670_v5  ;;  %4096 = vmatprep.mubr.bf16.mxu0 %v4681_v12  ;;  %v4689_v24 = vld [vmem:[%s4955_s10 + $0xb0] sm:$0xff]   ;;  %v4691_v26 = vld [vmem:[%s4955_s10 + $0xb8] sm:$0xff]   ;;  %v4693_v27 = vld [vmem:[%s5901_s1 + $0xa8] sm:$0xff]  }
  0x14   : > { %4128 = vmatprep.mubr.bf16.mxu1 %v4682_v13  ;;  %v4690_v25 = vld [vmem:[%s4955_s10 + $0x10] sm:$0xff]   ;;  %v4694_v28 = vld [vmem:[%s5901_s1 + $0xe8] sm:$0xff]   ;;  %v4692_v29 = vld [vmem:[%s4955_s10 + $0x18] sm:$0xff]  }
  0x15   : > { %4085 = vmatpush3.bf16.msra.mxu0 %v4669_v4  ;;  %v4695_v30 = vld [vmem:[%s5901_s1 + $0xa0] sm:$0xff]   ;;  %v4699_v34 = vld [vmem:[%s4955_s10 + $0xc8] sm:$0xff]   ;;  %v4701_v35 = vld [vmem:[%s5901_s1 + $0x98] sm:$0xff]  }
  0x16   : > { %4117 = vmatpush3.bf16.msra.mxu1 %v4670_v5  ;;  %4086 = vmatprep.subr.bf16.mxu0 %v4671_v6  ;;  %v4696_v31 = vld [vmem:[%s5901_s1 + $0xe0] sm:$0xff]   ;;  %v4702_v36 = vld [vmem:[%s5901_s1 + $0xd8] sm:$0xff]   ;;  %v4700_v37 = vld [vmem:[%s4955_s10 + $0x28] sm:$0xff]  }
  0x17   : > { %4118 = vmatprep.subr.bf16.mxu1 %v4672_v7  ;;  %v4697_v32 = vld [vmem:[%s4955_s10 + $0xc0] sm:$0xff]   ;;  %v4703_v38 = vld [vmem:[%s5901_s1 + $0x90] sm:$0xff]   ;;  %v4707_v42 = vld [vmem:[%s4955_s10 + $0xd8] sm:$0xff]  }
  0x18   : > { %v4698_v33 = vld [vmem:[%s4955_s10 + $0x20] sm:$0xff]   ;;  %v4704_v39 = vld [vmem:[%s5901_s1 + $0xd0] sm:$0xff]   ;;  %v4709_v43 = vld [vmem:[%s5901_s1 + $0x88] sm:$0xff]  }
  0x19   : > { %4087 = vmatpush3.bf16.msra.mxu0 %v4671_v6  ;;  %v4705_v40 = vld [vmem:[%s4955_s10 + $0xd0] sm:$0xff]   ;;  %v4710_v44 = vld [vmem:[%s5901_s1 + $0xc8] sm:$0xff]   ;;  %v4708_v45 = vld [vmem:[%s4955_s10 + $0x38] sm:$0xff]  }
  0x1a   : > { %4119 = vmatpush3.bf16.msra.mxu1 %v4672_v7  ;;  %4088 = vmatprep.subr.bf16.mxu0 %v4673_v8  ;;  %v4706_v41 = vld [vmem:[%s4955_s10 + $0x30] sm:$0xff]   ;;  %v4711_v46 = vld [vmem:[%s5901_s1 + $0x80] sm:$0xff]   ;;  %v4714_v49 = vld [vmem:[%s4955_s10 + $0x8] sm:$0xff]  }
  0x1b   : > { %4120 = vmatprep.subr.bf16.mxu1 %v4674_v9  ;;  %v4712_v47 = vld [vmem:[%s5901_s1 + $0xc0] sm:$0xff]   ;;  %v5040_v48 = vld [vmem:[%s4955_s10 + $0x50] sm:$0xff]   ;;  %v5044_v50 = vld [vmem:[%s4955_s10 + $0x58] sm:$0xff]  }
  0x1c   : > { %v5049_v51 = vld [vmem:[%s5901_s1 + $0x138] sm:$0xff]   ;;  %v4716_v53 = vld [vmem:[%s4955_s10 + $0x10] sm:$0xff]   ;;  %v5066_v56 = vld [vmem:[%s4955_s10 + $0x60] sm:$0xff]  }
  0x1d   : > { %4089 = vmatpush3.bf16.msra.mxu0 %v4673_v8  ;;  %v4718_v52 = vld [vmem:[%s5901_s1 + $0x178] sm:$0xff]   ;;  %v5059_v54 = vld [vmem:[%s5901_s1 + $0x130] sm:$0xff]   ;;  %v5073_v58 = vld [vmem:[%s4955_s10 + $0x68] sm:$0xff]  }
  0x1e   : > { %4121 = vmatpush3.bf16.msra.mxu1 %v4674_v9  ;;  %4090 = vmatprep.subr.bf16.mxu0 %v4675_v10  ;;  %v4720_v55 = vld [vmem:[%s5901_s1 + $0x170] sm:$0xff]   ;;  %v4722_v57 = vld [vmem:[%s4955_s10 + $0x18] sm:$0xff]   ;;  %v5078_v59 = vld [vmem:[%s5901_s1 + $0x128] sm:$0xff]  }
  0x1f   : > { %4122 = vmatprep.subr.bf16.mxu1 %v4676_v11  ;;  %v4726_v60 = vld [vmem:[%s5901_s1 + $0x168] sm:$0xff]   ;;  %v4724_v61 = vld [vmem:[%s4955_s10 + $0x20] sm:$0xff]   ;;  %v5096_v0 = vld [vmem:[%s4955_s10 + $0x70] sm:$0xff]  }
  0x20   : > { %v5089_v62 = vld [vmem:[%s5901_s1 + $0x120] sm:$0xff]   ;;  %v4730_v1 = vld [vmem:[%s4955_s10 + $0x28] sm:$0xff]   ;;  %v5103_v2 = vld [vmem:[%s4955_s10 + $0x78] sm:$0xff]  }
  0x21   : > { %4091 = vmatpush3.bf16.msra.mxu0 %v4675_v10  ;;  %v4728_v63 = vld [vmem:[%s5901_s1 + $0x160] sm:$0xff]   ;;  %v5108_v3 = vld [vmem:[%s5901_s1 + $0x118] sm:$0xff]   ;;  %v4732_v5 = vld [vmem:[%s4955_s10 + $0x30] sm:$0xff]  }
  0x22   : > { %4123 = vmatpush3.bf16.msra.mxu1 %v4676_v11  ;;  %4092 = vmatprep.subr.bf16.mxu0 %v4677_v14  ;;  %v4734_v4 = vld [vmem:[%s5901_s1 + $0x158] sm:$0xff]   ;;  %v5119_v6 = vld [vmem:[%s5901_s1 + $0x110] sm:$0xff]   ;;  %v5126_v8 = vld [vmem:[%s4955_s10 + $0x80] sm:$0xff]  }
  0x23   : > { %4124 = vmatprep.subr.bf16.mxu1 %v4678_v15  ;;  %v4736_v7 = vld [vmem:[%s5901_s1 + $0x150] sm:$0xff]   ;;  %v4738_v9 = vld [vmem:[%s4955_s10 + $0x38] sm:$0xff]   ;;  %v5133_v10 = vld [vmem:[%s4955_s10 + $0x88] sm:$0xff]  }
  0x24   : > { %v5138_v11 = vld [vmem:[%s5901_s1 + $0x108] sm:$0xff]   ;;  %v4740_v13 = vld [vmem:[%s4955_s10 + $0x40] sm:$0xff]  }
  0x25   : > { %4093 = vmatpush3.bf16.msra.mxu0 %v4677_v14  ;;  %v4742_v12 = vld [vmem:[%s5901_s1 + $0x148] sm:$0xff]   ;;  %v5149_v14 = vld [vmem:[%s5901_s1 + $0x100] sm:$0xff]  }
  0x26   : > { %4125 = vmatpush3.bf16.msra.mxu1 %v4678_v15  ;;  %4094 = vmatprep.subr.bf16.mxu0 %v4679_v16  ;;  %v4744_v15 = vld [vmem:[%s5901_s1 + $0x140] sm:$0xff]  }
  0x27   : > { %4126 = vmatprep.subr.bf16.mxu1 %v4680_v17 }
  0x29   : > { %4095 = vmatpush3.bf16.msra.mxu0 %v4679_v16  ;;  %v5156_v16 = vld [vmem:[%s4955_s10 + $0xa8] sm:$0xff]  }
  0x2a   : > { %4127 = vmatpush3.bf16.msra.mxu1 %v4680_v17  ;;  %4144 = vmatprep.subr.bf16.mxu0 %v4685_v19  ;;  %v5160_v17 = vld [vmem:[%s4955_s10 + $0x58] sm:$0xff]  }
  0x2b   : > { %4176 = vmatprep.subr.bf16.mxu1 %v4686_v20 }
  0x2c   : > { %4097 = vmatmul.mubr.bf16.vlgmr.msra.gmra.mxu0 %v4683_v18  ;;  %v5165_v18 = vld [vmem:[%s4955_s10 + $0xb0] sm:$0xff]  }
  0x2d   : > { %4129 = vmatmul.mubr.bf16.vlgmr.msra.gmra.mxu1 %v4684_v21  ;;  %4145 = vmatpush3.bf16.msra.mxu0 %v4685_v19  ;;  %v5170_v19 = vld [vmem:[%s5901_s1 + $0x1b8] sm:$0xff]   ;;  %v5180_v21 = vld [vmem:[%s4955_s10 + $0x60] sm:$0xff]  }
  0x2e   : > { %4177 = vmatpush3.bf16.msra.mxu1 %v4686_v20  ;;  %4146 = vmatprep.subr.bf16.mxu0 %v4687_v22  ;;  %v5176_v20 = vld [vmem:[%s5901_s1 + $0x1f8] sm:$0xff]  }
  0x2f   : > { %4178 = vmatprep.subr.bf16.mxu1 %v4688_v23  ;;  %4100 = vmatprep.mubr.bf16.mxu0 %v4689_v24  ;;  %v5196_v24 = vld [vmem:[%s4955_s10 + $0xb8] sm:$0xff]  }
  0x30   : > { %4132 = vmatprep.mubr.bf16.mxu1 %v4690_v25  ;;  %v5200_v25 = vld [vmem:[%s4955_s10 + $0x68] sm:$0xff]  }
  0x31   : > { %4147 = vmatpush3.bf16.msra.mxu0 %v4687_v22  ;;  %v5186_v22 = vld [vmem:[%s5901_s1 + $0x1b0] sm:$0xff]  }
  0x32   : > { %4179 = vmatpush3.bf16.msra.mxu1 %v4688_v23  ;;  %4148 = vmatprep.subr.bf16.mxu0 %v4693_v27  ;;  %v5192_v23 = vld [vmem:[%s5901_s1 + $0x1f0] sm:$0xff]  }
  0x33   : > { %4180 = vmatprep.subr.bf16.mxu1 %v4694_v28 }
  0x34   : > { %4101 = vmatmul.mubr.bf16.gmra.mxu0 %v4691_v26  ;;  %v5207_v26 = vld [vmem:[%s4955_s10 + $0xc0] sm:$0xff]  }
  0x35   : > { %4133 = vmatmul.mubr.bf16.gmra.mxu1 %v4692_v29  ;;  %4149 = vmatpush3.bf16.msra.mxu0 %v4693_v27  ;;  %v5212_v27 = vld [vmem:[%s5901_s1 + $0x1a8] sm:$0xff]   ;;  %v5223_v29 = vld [vmem:[%s4955_s10 + $0x70] sm:$0xff]  }
  0x36   : > { %4181 = vmatpush3.bf16.msra.mxu1 %v4694_v28  ;;  %4150 = vmatprep.subr.bf16.mxu0 %v4695_v30  ;;  %v5219_v28 = vld [vmem:[%s5901_s1 + $0x1e8] sm:$0xff]  }
  0x37   : > { %4182 = vmatprep.subr.bf16.mxu1 %v4696_v31  ;;  %4104 = vmatprep.mubr.bf16.mxu0 %v4697_v32  ;;  %v5240_v32 = vld [vmem:[%s4955_s10 + $0xc8] sm:$0xff]  }
  0x38   : > { %4136 = vmatprep.mubr.bf16.mxu1 %v4698_v33  ;;  %v5244_v33 = vld [vmem:[%s4955_s10 + $0x78] sm:$0xff]  }
  0x39   : > { %4151 = vmatpush3.bf16.msra.mxu0 %v4695_v30  ;;  %v5229_v30 = vld [vmem:[%s5901_s1 + $0x1a0] sm:$0xff]  }
  0x3a   : > { %4183 = vmatpush3.bf16.msra.mxu1 %v4696_v31  ;;  %4152 = vmatprep.subr.bf16.mxu0 %v4701_v35  ;;  %v5236_v31 = vld [vmem:[%s5901_s1 + $0x1e0] sm:$0xff]  }
  0x3b   : > { %4184 = vmatprep.subr.bf16.mxu1 %v4702_v36 }
  0x3c   : > { %4105 = vmatmul.mubr.bf16.gmra.mxu0 %v4699_v34  ;;  %v5251_v34 = vld [vmem:[%s4955_s10 + $0xd0] sm:$0xff]  }
  0x3d   : > { %4137 = vmatmul.mubr.bf16.gmra.mxu1 %v4700_v37  ;;  %4153 = vmatpush3.bf16.msra.mxu0 %v4701_v35  ;;  %v5256_v35 = vld [vmem:[%s5901_s1 + $0x198] sm:$0xff]   ;;  %v5267_v37 = vld [vmem:[%s4955_s10 + $0x80] sm:$0xff]  }
  0x3e   : > { %4185 = vmatpush3.bf16.msra.mxu1 %v4702_v36  ;;  %4154 = vmatprep.subr.bf16.mxu0 %v4703_v38  ;;  %v5263_v36 = vld [vmem:[%s5901_s1 + $0x1d8] sm:$0xff]  }
  0x3f   : > { %4186 = vmatprep.subr.bf16.mxu1 %v4704_v39  ;;  %4108 = vmatprep.mubr.bf16.mxu0 %v4705_v40  ;;  %v5284_v40 = vld [vmem:[%s4955_s10 + $0xd8] sm:$0xff]  }
  0x40   : > { %4140 = vmatprep.mubr.bf16.mxu1 %v4706_v41  ;;  %v5288_v41 = vld [vmem:[%s4955_s10 + $0x88] sm:$0xff]  }
  0x41   : > { %4155 = vmatpush3.bf16.msra.mxu0 %v4703_v38  ;;  %v5273_v38 = vld [vmem:[%s5901_s1 + $0x190] sm:$0xff]  }
  0x42   : > { %4187 = vmatpush3.bf16.msra.mxu1 %v4704_v39  ;;  %4156 = vmatprep.subr.bf16.mxu0 %v4709_v43  ;;  %v5280_v39 = vld [vmem:[%s5901_s1 + $0x1d0] sm:$0xff]  }
  0x43   : > { %4188 = vmatprep.subr.bf16.mxu1 %v4710_v44  ;;  %5916 = vst [vmem:[#allocation2_spill] sm:$0xff] %v5280_v39 }
  0x44   : > { %4109 = vmatmul.mubr.bf16.gmra.mxu0 %v4707_v42  ;;  %v5295_v42 = vld [vmem:[%s4955_s10 + $0xe0] sm:$0xff]  }
  0x45   : > { %4141 = vmatmul.mubr.bf16.gmra.mxu1 %v4708_v45  ;;  %4157 = vmatpush3.bf16.msra.mxu0 %v4709_v43  ;;  %v5300_v43 = vld [vmem:[%s5901_s1 + $0x188] sm:$0xff]   ;;  %v5311_v45 = vld [vmem:[%s4955_s10 + $0x90] sm:$0xff]  }
  0x46   : > { %4189 = vmatpush3.bf16.msra.mxu1 %v4710_v44  ;;  %4158 = vmatprep.subr.bf16.mxu0 %v4711_v46  ;;  %v5307_v44 = vld [vmem:[%s5901_s1 + $0x1c8] sm:$0xff]  }
  0x47   : > { %4190 = vmatprep.subr.bf16.mxu1 %v4712_v47  ;;  %4160 = vmatprep.mubr.bf16.mxu0 %v5040_v48  ;;  %5917 = vst [vmem:[#allocation3_spill] sm:$0xff] %v5307_v44 }
  0x48   : > { %4192 = vmatprep.mubr.bf16.mxu1 %v4714_v49  ;;  %v4777_v49 = vld [vmem:[%s4955_s10 + $0x10] sm:$0xff]  }
  0x49   : > { %4159 = vmatpush3.bf16.msra.mxu0 %v4711_v46  ;;  %v5317_v46 = vld [vmem:[%s5901_s1 + $0x180] sm:$0xff]  }
  0x4a   : > { %4191 = vmatpush3.bf16.msra.mxu1 %v4712_v47  ;;  %4208 = vmatprep.subr.bf16.mxu0 %v5049_v51  ;;  %v5324_v47 = vld [vmem:[%s5901_s1 + $0x1c0] sm:$0xff]  }
  0x4b   : > { %4240 = vmatprep.subr.bf16.mxu1 %v4718_v52  ;;  %5918 = vst [vmem:[#allocation4_spill] sm:$0xff] %v5324_v47 }
  0x4c   : > { %4161 = vmatmul.mubr.bf16.vlgmr.msra.gmra.mxu0 %v5044_v50 }
  0x4d   : > { %4193 = vmatmul.mubr.bf16.vlgmr.msra.gmra.mxu1 %v4716_v53  ;;  %4209 = vmatpush3.bf16.msra.mxu0 %v5049_v51  ;;  %v5339_v53 = vld [vmem:[%s5901_s1 + $0x238] sm:$0xff]  }
  0x4e   : > { %4241 = vmatpush3.bf16.msra.mxu1 %v4718_v52  ;;  %4210 = vmatprep.subr.bf16.mxu0 %v5059_v54  ;;  %v5330_v52 = vld [vmem:[%s4955_s10 + $0xb0] sm:$0xff]  }
  0x4f   : > { %4242 = vmatprep.subr.bf16.mxu1 %v4720_v55  ;;  %4164 = vmatprep.mubr.bf16.mxu0 %v5066_v56 }
  0x50   : > { %4196 = vmatprep.mubr.bf16.mxu1 %v4722_v57  ;;  %v5346_v57 = vld [vmem:[%s4955_s10 + $0xb8] sm:$0xff]  }
  0x51   : > { %4211 = vmatpush3.bf16.msra.mxu0 %v5059_v54 }
  0x52   : > { %4243 = vmatpush3.bf16.msra.mxu1 %v4720_v55  ;;  %4212 = vmatprep.subr.bf16.mxu0 %v5078_v59  ;;  %v4779_v55 = vld [vmem:[%s4955_s10 + $0x18] sm:$0xff]  }
  0x53   : > { %4244 = vmatprep.subr.bf16.mxu1 %v4726_v60 }
  0x54   : > { %4165 = vmatmul.mubr.bf16.gmra.mxu0 %v5073_v58 }
  0x55   : > { %4197 = vmatmul.mubr.bf16.gmra.mxu1 %v4724_v61  ;;  %4213 = vmatpush3.bf16.msra.mxu0 %v5078_v59  ;;  %v4833_v61 = vld [vmem:[%s5901_s1 + $0x78] sm:$0xff]  }
  0x56   : > { %4245 = vmatpush3.bf16.msra.mxu1 %v4726_v60  ;;  %4214 = vmatprep.subr.bf16.mxu0 %v5089_v62  ;;  %v5353_v60 = vld [vmem:[%s5901_s1 + $0x230] sm:$0xff]  }
  0x57   : > { %4246 = vmatprep.subr.bf16.mxu1 %v4728_v63  ;;  %4168 = vmatprep.mubr.bf16.mxu0 %v5096_v0 }
  0x58   : > { %4200 = vmatprep.mubr.bf16.mxu1 %v4730_v1  ;;  %v5360_v1 = vld [vmem:[%s4955_s10 + $0xc0] sm:$0xff]  }
  0x59   : > { %4215 = vmatpush3.bf16.msra.mxu0 %v5089_v62 }
  0x5a   : > { %4247 = vmatpush3.bf16.msra.mxu1 %v4728_v63  ;;  %4216 = vmatprep.subr.bf16.mxu0 %v5108_v3  ;;  %v4783_v63 = vld [vmem:[%s4955_s10 + $0x20] sm:$0xff]  }
  0x5b   : > { %4248 = vmatprep.subr.bf16.mxu1 %v4734_v4 }
  0x5c   : > { %4169 = vmatmul.mubr.bf16.gmra.mxu0 %v5103_v2 }
  0x5d   : > { %4201 = vmatmul.mubr.bf16.gmra.mxu1 %v4732_v5  ;;  %4217 = vmatpush3.bf16.msra.mxu0 %v5108_v3  ;;  %v4834_v5 = vld [vmem:[%s5901_s1 + $0x70] sm:$0xff]  }
  0x5e   : > { %4249 = vmatpush3.bf16.msra.mxu1 %v4734_v4  ;;  %4218 = vmatprep.subr.bf16.mxu0 %v5119_v6  ;;  %v5368_v4 = vld [vmem:[%s5901_s1 + $0x228] sm:$0xff]  }
  0x5f   : > { %4250 = vmatprep.subr.bf16.mxu1 %v4736_v7  ;;  %4172 = vmatprep.mubr.bf16.mxu0 %v5126_v8 }
  0x60   : > { %4204 = vmatprep.mubr.bf16.mxu1 %v4738_v9  ;;  %v5377_v9 = vld [vmem:[%s4955_s10 + $0xc8] sm:$0xff]  }
  0x61   : > { %4219 = vmatpush3.bf16.msra.mxu0 %v5119_v6 }
  0x62   : > { %4251 = vmatpush3.bf16.msra.mxu1 %v4736_v7  ;;  %4220 = vmatprep.subr.bf16.mxu0 %v5138_v11  ;;  %v4785_v7 = vld [vmem:[%s4955_s10 + $0x28] sm:$0xff]  }
  0x63   : > { %4252 = vmatprep.subr.bf16.mxu1 %v4742_v12 }
  0x64   : > { %4173 = vmatmul.mubr.bf16.gmra.mxu0 %v5133_v10 }
  0x65   : > { %4205 = vmatmul.mubr.bf16.gmra.mxu1 %v4740_v13  ;;  %4221 = vmatpush3.bf16.msra.mxu0 %v5138_v11  ;;  %v4835_v13 = vld [vmem:[%s5901_s1 + $0x68] sm:$0xff]  }
  0x66   : > { %4253 = vmatpush3.bf16.msra.mxu1 %v4742_v12  ;;  %4222 = vmatprep.subr.bf16.mxu0 %v5149_v14  ;;  %v5383_v12 = vld [vmem:[%s5901_s1 + $0x220] sm:$0xff]  }
  0x67   : > { %4254 = vmatprep.subr.bf16.mxu1 %v4744_v15  ;;  %4224 = vmatprep.mubr.bf16.mxu0 %v5156_v16 }
  0x68   : > { %4256 = vmatprep.mubr.bf16.mxu1 %v5160_v17 }
  0x69   : > { %4223 = vmatpush3.bf16.msra.mxu0 %v5149_v14 }
  0x6a   : > { %4255 = vmatpush3.bf16.msra.mxu1 %v4744_v15  ;;  %4272 = vmatprep.subr.bf16.mxu0 %v5170_v19  ;;  %v4789_v15 = vld [vmem:[%s4955_s10 + $0x30] sm:$0xff]  }
  0x6b   : > { %4304 = vmatprep.subr.bf16.mxu1 %v5176_v20 }
  0x6c   : > { %4225 = vmatmul.mubr.bf16.vlgmr.msra.gmra.mxu0 %v5165_v18 }
  0x6d   : > { %4257 = vmatmul.mubr.bf16.vlgmr.msra.gmra.mxu1 %v5180_v21  ;;  %4273 = vmatpush3.bf16.msra.mxu0 %v5170_v19 }
  0x6e   : > { %4305 = vmatpush3.bf16.msra.mxu1 %v5176_v20  ;;  %4274 = vmatprep.subr.bf16.mxu0 %v5186_v22 }
  0x6f   : > { %4306 = vmatprep.subr.bf16.mxu1 %v5192_v23  ;;  %4228 = vmatprep.mubr.bf16.mxu0 %v5196_v24 }
  0x70   : > { %4260 = vmatprep.mubr.bf16.mxu1 %v5200_v25 }
  0x71   : > { %4275 = vmatpush3.bf16.msra.mxu0 %v5186_v22 }
  0x72   : > { %4307 = vmatpush3.bf16.msra.mxu1 %v5192_v23  ;;  %4276 = vmatprep.subr.bf16.mxu0 %v5212_v27 }
  0x73   : > { %4308 = vmatprep.subr.bf16.mxu1 %v5219_v28 }
  0x74   : > { %4229 = vmatmul.mubr.bf16.gmra.mxu0 %v5207_v26 }
  0x75   : > { %4261 = vmatmul.mubr.bf16.gmra.mxu1 %v5223_v29  ;;  %4277 = vmatpush3.bf16.msra.mxu0 %v5212_v27 }
  0x76   : > { %4309 = vmatpush3.bf16.msra.mxu1 %v5219_v28  ;;  %4278 = vmatprep.subr.bf16.mxu0 %v5229_v30 }
  0x77   : > { %4310 = vmatprep.subr.bf16.mxu1 %v5236_v31  ;;  %4232 = vmatprep.mubr.bf16.mxu0 %v5240_v32 }
  0x78   : > { %4264 = vmatprep.mubr.bf16.mxu1 %v5244_v33 }
  0x79   : > { %4279 = vmatpush3.bf16.msra.mxu0 %v5229_v30 }
  0x7a   : > { %4311 = vmatpush3.bf16.msra.mxu1 %v5236_v31  ;;  %4280 = vmatprep.subr.bf16.mxu0 %v5256_v35 }
  0x7b   : > { %4312 = vmatprep.subr.bf16.mxu1 %v5263_v36 }
  0x7c   : > { %4233 = vmatmul.mubr.bf16.gmra.mxu0 %v5251_v34 }
  0x7d   : > { %4265 = vmatmul.mubr.bf16.gmra.mxu1 %v5267_v37  ;;  %4281 = vmatpush3.bf16.msra.mxu0 %v5256_v35 }
  0x7e   : > { %4313 = vmatpush3.bf16.msra.mxu1 %v5263_v36  ;;  %4282 = vmatprep.subr.bf16.mxu0 %v5273_v38 }
  0x7f   : > { %4314 = vmatprep.subr.bf16.mxu1 %v5280_v39  ;;  %4236 = vmatprep.mubr.bf16.mxu0 %v5284_v40 }
  0x80   : > { %4268 = vmatprep.mubr.bf16.mxu1 %v5288_v41 }
  0x81   : > { %4283 = vmatpush3.bf16.msra.mxu0 %v5273_v38 }
  0x82   : > { %4315 = vmatpush3.bf16.msra.mxu1 %v5280_v39  ;;  %4284 = vmatprep.subr.bf16.mxu0 %v5300_v43  ;;  %v5437_v39 = vld [vmem:[%s4955_s10 + $0xe8] sm:$0xff]  }
  0x83   : > { %4316 = vmatprep.subr.bf16.mxu1 %v5307_v44  ;;  %5921 = vst [vmem:[#allocation7_spill] sm:$0xff] %v5437_v39 }
  0x84   : > { %4237 = vmatmul.mubr.bf16.gmra.mxu0 %v5295_v42 }
  0x85   : > { %4269 = vmatmul.mubr.bf16.gmra.mxu1 %v5311_v45  ;;  %4285 = vmatpush3.bf16.msra.mxu0 %v5300_v43 }
  0x86   : > { %4317 = vmatpush3.bf16.msra.mxu1 %v5307_v44  ;;  %4286 = vmatprep.subr.bf16.mxu0 %v5317_v46  ;;  %v4838_v44 = vld [vmem:[%s5901_s1 + $0x50] sm:$0xff]  }
  0x87   : > { %4318 = vmatprep.subr.bf16.mxu1 %v5324_v47  ;;  %4288 = vmatprep.mubr.bf16.mxu0 %v4777_v49  ;;  %v5390_v49 = vld [vmem:[%s4955_s10 + $0xd0] sm:$0xff]  }
  0x88   : > { %4320 = vmatprep.mubr.bf16.mxu1 %v5330_v52 }
  0x89   : > { %4287 = vmatpush3.bf16.msra.mxu0 %v5317_v46 }
  0x8a   : > { %4319 = vmatpush3.bf16.msra.mxu1 %v5324_v47  ;;  %4336 = vmatprep.subr.bf16.mxu0 %v5339_v53  ;;  %v5420_v47 = vld [vmem:[%s4955_s10 + $0xe0] sm:$0xff]  }
  0x8b   : > { %4368 = vmatprep.subr.bf16.mxu1 %v4833_v61  ;;  %5920 = vst [vmem:[#allocation6_spill] sm:$0xff] %v5420_v47 }
  0x8c   : > { %4289 = vmatmul.mubr.bf16.vlgmr.msra.gmra.mxu0 %v4779_v55  ;;  %v5398_v55 = vld [vmem:[%s5901_s1 + $0x218] sm:$0xff]  }
  0x8d   : > { %4321 = vmatmul.mubr.bf16.vlgmr.msra.gmra.mxu1 %v5346_v57  ;;  %4337 = vmatpush3.bf16.msra.mxu0 %v5339_v53 }
  0x8e   : > { %4369 = vmatpush3.bf16.msra.mxu1 %v4833_v61  ;;  %4338 = vmatprep.subr.bf16.mxu0 %v5353_v60  ;;  %v4836_v61 = vld [vmem:[%s5901_s1 + $0x60] sm:$0xff]  }
  0x8f   : > { %4370 = vmatprep.subr.bf16.mxu1 %v4834_v5  ;;  %4292 = vmatprep.mubr.bf16.mxu0 %v4783_v63  ;;  %v4791_v63 = vld [vmem:[%s4955_s10 + $0x38] sm:$0xff]  }
  0x90   : > { %4324 = vmatprep.mubr.bf16.mxu1 %v5360_v1 }
  0x91   : > { %4339 = vmatpush3.bf16.msra.mxu0 %v5353_v60 }
  0x92   : > { %4371 = vmatpush3.bf16.msra.mxu1 %v4834_v5  ;;  %4340 = vmatprep.subr.bf16.mxu0 %v5368_v4  ;;  %v5407_v5 = vld [vmem:[%s4955_s10 + $0xd8] sm:$0xff]  }
  0x93   : > { %4372 = vmatprep.subr.bf16.mxu1 %v4835_v13 }
  0x94   : > { %4293 = vmatmul.mubr.bf16.gmra.mxu0 %v4785_v7  ;;  %v5413_v7 = vld [vmem:[%s5901_s1 + $0x210] sm:$0xff]  }
  0x95   : > { %4325 = vmatmul.mubr.bf16.gmra.mxu1 %v5377_v9  ;;  %4341 = vmatpush3.bf16.msra.mxu0 %v5368_v4  ;;  %5919 = vst [vmem:[#allocation5_spill] sm:$0xff] %v5413_v7 }
  0x96   : > { %4373 = vmatpush3.bf16.msra.mxu1 %v4835_v13  ;;  %4342 = vmatprep.subr.bf16.mxu0 %v5383_v12  ;;  %v4837_v13 = vld [vmem:[%s5901_s1 + $0x58] sm:$0xff]  }
  0x97   : > { %4374 = vmatprep.subr.bf16.mxu1 %v4836_v61  ;;  %4296 = vmatprep.mubr.bf16.mxu0 %v4789_v15  ;;  %v4795_v15 = vld [vmem:[%s4955_s10 + $0x40] sm:$0xff]  }
  0x98   : > { %4328 = vmatprep.mubr.bf16.mxu1 %v5390_v49 }
  0x99   : > { %4343 = vmatpush3.bf16.msra.mxu0 %v5383_v12 }
  0x9a   : > { %4375 = vmatpush3.bf16.msra.mxu1 %v4836_v61  ;;  %4344 = vmatprep.subr.bf16.mxu0 %v5398_v55  ;;  %v5428_v61 = vld [vmem:[%s5901_s1 + $0x208] sm:$0xff]  }
  0x9b   : > { %4376 = vmatprep.subr.bf16.mxu1 %v4837_v13 }
  0x9c   : > { %4297 = vmatmul.mubr.bf16.gmra.mxu0 %v4791_v63  ;;  %v4797_v63 = vld [vmem:[%s4955_s10 + $0x48] sm:$0xff]  }
  0x9d   : > { %4329 = vmatmul.mubr.bf16.gmra.mxu1 %v5407_v5  ;;  %4345 = vmatpush3.bf16.msra.mxu0 %v5398_v55 }
  0x9e   : > { %4377 = vmatpush3.bf16.msra.mxu1 %v4837_v13  ;;  %4346 = vmatprep.subr.bf16.mxu0 %v5413_v7  ;;  %v5443_v13 = vld [vmem:[%s5901_s1 + $0x200] sm:$0xff]  }
  0x9f   : > { %4378 = vmatprep.subr.bf16.mxu1 %v4838_v44  ;;  %4300 = vmatprep.mubr.bf16.mxu0 %v4795_v15  ;;  %v4839_v15 = vld [vmem:[%s5901_s1 + $0x48] sm:$0xff]  }
  0xa0   : > { %4332 = vmatprep.mubr.bf16.mxu1 %v5420_v47  ;;  %v5449_v47 = vld [vmem:[%s4955_s10 + $0x60] sm:$0xff]  }
  0xa1   : > { %4347 = vmatpush3.bf16.msra.mxu0 %v5413_v7  ;;  %v5460_v7 = vld [vmem:[%s4955_s10 + $0x68] sm:$0xff]  }
  0xa2   : > { %4379 = vmatpush3.bf16.msra.mxu1 %v4838_v44  ;;  %4348 = vmatprep.subr.bf16.mxu0 %v5428_v61  ;;  %v4840_v44 = vld [vmem:[%s5901_s1 + $0x40] sm:$0xff]   ;;  %5922 = vst [vmem:[#allocation8_spill] sm:$0xff] %v5460_v7 }
  0xa3   : > { %4380 = vmatprep.subr.bf16.mxu1 %v4839_v15 }
  0xa4   : > { %4301 = vmatmul.mubr.bf16.gmra.mxu0 %v4797_v63  ;;  %v4841_v63 = vld [vmem:[%s5901_s1 + $0x38] sm:$0xff]  }
  0xa5   : > { %4333 = vmatmul.mubr.bf16.gmra.mxu1 %v5437_v39  ;;  %4349 = vmatpush3.bf16.msra.mxu0 %v5428_v61  ;;  %v5470_v39 = vld [vmem:[%s4955_s10 + $0x70] sm:$0xff]  }
  0xa6   : > { %4381 = vmatpush3.bf16.msra.mxu1 %v4839_v15  ;;  %4350 = vmatprep.subr.bf16.mxu0 %v5443_v13  ;;  %v4842_v15 = vld [vmem:[%s5901_s1 + $0xb8] sm:$0xff]  }
  0xa7   : > { %4382 = vmatprep.subr.bf16.mxu1 %v4840_v44  ;;  %4352 = vmatprep.mubr.bf16.mxu0 %v5449_v47 }
  0xa8   : > { %4384 = vmatprep.mubr.bf16.mxu1 %v5040_v48  ;;  %v4843_v48 = vld [vmem:[%s5901_s1 + $0x30] sm:$0xff]  }
  0xa9   : > { %4351 = vmatpush3.bf16.msra.mxu0 %v5443_v13 }
  0xaa   : > { %4383 = vmatpush3.bf16.msra.mxu1 %v4840_v44  ;;  %4400 = vmatprep.subr.bf16.mxu0 %v4841_v63  ;;  %v4844_v44 = vld [vmem:[%s5901_s1 + $0xb0] sm:$0xff]  }
  0xab   : > { %4432 = vmatprep.subr.bf16.mxu1 %v4842_v15 }
  0xac   : > { %4353 = vmatmul.mubr.bf16.vlgmr.msra.gmra.mxu0 %v5460_v7  ;;  %v5483_v7 = vld [vmem:[%s4955_s10 + $0x78] sm:$0xff]  }
  0xad   : > { %4385 = vmatmul.mubr.bf16.vlgmr.msra.gmra.mxu1 %v5044_v50  ;;  %4401 = vmatpush3.bf16.msra.mxu0 %v4841_v63  ;;  %v4845_v50 = vld [vmem:[%s5901_s1 + $0x28] sm:$0xff]  }
  0xae   : > { %4433 = vmatpush3.bf16.msra.mxu1 %v4842_v15  ;;  %4402 = vmatprep.subr.bf16.mxu0 %v4843_v48  ;;  %v4846_v63 = vld [vmem:[%s5901_s1 + $0xa8] sm:$0xff]   ;;  %v5492_v15 = vld [vmem:[%s4955_s10 + $0x80] sm:$0xff]  }
  0xaf   : > { %4434 = vmatprep.subr.bf16.mxu1 %v4844_v44  ;;  %4356 = vmatprep.mubr.bf16.mxu0 %v5470_v39 }
  0xb0   : > { %4388 = vmatprep.mubr.bf16.mxu1 %v5066_v56  ;;  %v4847_v56 = vld [vmem:[%s5901_s1 + $0x20] sm:$0xff]  }
  0xb1   : > { %4403 = vmatpush3.bf16.msra.mxu0 %v4843_v48  ;;  %v4848_v48 = vld [vmem:[%s5901_s1 + $0xa0] sm:$0xff]  }
  0xb2   : > { %4435 = vmatpush3.bf16.msra.mxu1 %v4844_v44  ;;  %4404 = vmatprep.subr.bf16.mxu0 %v4845_v50  ;;  %v5505_v44 = vld [vmem:[%s4955_s10 + $0x88] sm:$0xff]  }
  0xb3   : > { %4436 = vmatprep.subr.bf16.mxu1 %v4846_v63 }
  0xb4   : > { %4357 = vmatmul.mubr.bf16.gmra.mxu0 %v5483_v7 }
  0xb5   : > { %4389 = vmatmul.mubr.bf16.gmra.mxu1 %v5073_v58  ;;  %4405 = vmatpush3.bf16.msra.mxu0 %v4845_v50  ;;  %v4849_v58 = vld [vmem:[%s5901_s1 + $0x18] sm:$0xff]  }
  0xb6   : > { %4437 = vmatpush3.bf16.msra.mxu1 %v4846_v63  ;;  %4406 = vmatprep.subr.bf16.mxu0 %v4847_v56  ;;  %v4850_v50 = vld [vmem:[%s5901_s1 + $0x98] sm:$0xff]   ;;  %v5514_v63 = vld [vmem:[%s4955_s10 + $0x90] sm:$0xff]  }
  0xb7   : > { %4438 = vmatprep.subr.bf16.mxu1 %v4848_v48  ;;  %4360 = vmatprep.mubr.bf16.mxu0 %v5492_v15 }
  0xb8   : > { %4392 = vmatprep.mubr.bf16.mxu1 %v5096_v0  ;;  %v4851_v0 = vld [vmem:[%s5901_s1 + $0x10] sm:$0xff]  }
  0xb9   : > { %4407 = vmatpush3.bf16.msra.mxu0 %v4847_v56  ;;  %v4852_v56 = vld [vmem:[%s5901_s1 + $0x90] sm:$0xff]  }
  0xba   : > { %4439 = vmatpush3.bf16.msra.mxu1 %v4848_v48  ;;  %4408 = vmatprep.subr.bf16.mxu0 %v4849_v58  ;;  %v5527_v48 = vld [vmem:[%s4955_s10 + $0x98] sm:$0xff]  }
  0xbb   : > { %4440 = vmatprep.subr.bf16.mxu1 %v4850_v50  ;;  %5923 = vst [vmem:[#allocation9_spill] sm:$0xff] %v5527_v48 }
  0xbc   : > { %4361 = vmatmul.mubr.bf16.gmra.mxu0 %v5505_v44 }
  0xbd   : > { %4393 = vmatmul.mubr.bf16.gmra.mxu1 %v5103_v2  ;;  %4409 = vmatpush3.bf16.msra.mxu0 %v4849_v58  ;;  %v4853_v2 = vld [vmem:[%s5901_s1 + $0x8] sm:$0xff]  }
  0xbe   : > { %4441 = vmatpush3.bf16.msra.mxu1 %v4850_v50  ;;  %4410 = vmatprep.subr.bf16.mxu0 %v4851_v0  ;;  %v4854_v58 = vld [vmem:[%s5901_s1 + $0x88] sm:$0xff]   ;;  %v4809_v50 = vld [vmem:[%s4955_s10 + $0xf0] sm:$0xff]  }
  0xbf   : > { %4442 = vmatprep.subr.bf16.mxu1 %v4852_v56  ;;  %4364 = vmatprep.mubr.bf16.mxu0 %v5514_v63 }
  0xc0   : > { %4396 = vmatprep.mubr.bf16.mxu1 %v5126_v8  ;;  %v4855_v8 = vld [vmem:[%s5901_s1] sm:$0xff]  }
  0xc1   : > { %4411 = vmatpush3.bf16.msra.mxu0 %v4851_v0  ;;  %v4856_v0 = vld [vmem:[%s5901_s1 + $0x80] sm:$0xff]  }
  0xc2   : > { %4443 = vmatpush3.bf16.msra.mxu1 %v4852_v56  ;;  %4412 = vmatprep.subr.bf16.mxu0 %v4853_v2  ;;  %v4857_v56 = vld [vmem:[%s4955_s10 + $0xa0] sm:$0xff]  }
  0xc3   : > { %4444 = vmatprep.subr.bf16.mxu1 %v4854_v58 }
  0xc4   : > { %4365 = vmatmul.mubr.bf16.gmra.mxu0 %v5527_v48  ;;  %v4811_v48 = vld [vmem:[%s4955_s10 + $0x100] sm:$0xff]  }
  0xc5   : > { %4397 = vmatmul.mubr.bf16.gmra.mxu1 %v5133_v10  ;;  %4413 = vmatpush3.bf16.msra.mxu0 %v4853_v2  ;;  %v4810_v10 = vld [vmem:[%s4955_s10 + $0xf8] sm:$0xff]  }
  0xc6   : > { %4445 = vmatpush3.bf16.msra.mxu1 %v4854_v58  ;;  %4414 = vmatprep.subr.bf16.mxu0 %v4855_v8  ;;  %v4858_v2 = vld [vmem:[%s5901_s1 + $0xf8] sm:$0xff]   ;;  %v4859_v58 = vld [vmem:[%s4955_s10 + $0xa8] sm:$0xff]  }
  0xc7   : > { %4446 = vmatprep.subr.bf16.mxu1 %v4856_v0  ;;  %4416 = vmatprep.mubr.bf16.mxu0 %v4857_v56  ;;  %v4863_v56 = vld [vmem:[%s5901_s1 + $0xe8] sm:$0xff]  }
  0xc8   : > { %4448 = vmatprep.mubr.bf16.mxu1 %v4809_v50  ;;  %v4860_v50 = vld [vmem:[%s5901_s1 + $0x138] sm:$0xff]  }
  0xc9   : > { %4415 = vmatpush3.bf16.msra.mxu0 %v4855_v8  ;;  %v4861_v8 = vld [vmem:[%s5901_s1 + $0xf0] sm:$0xff]  }
  0xca   : > { %4447 = vmatpush3.bf16.msra.mxu1 %v4856_v0  ;;  %4464 = vmatprep.subr.bf16.mxu0 %v4858_v2  ;;  %v4812_v0 = vld [vmem:[%s4955_s10 + $0x108] sm:$0xff]  }
  0xcb   : > { %4496 = vmatprep.subr.bf16.mxu1 %v5049_v51  ;;  %v4862_v51 = vld [vmem:[%s4955_s10 + $0xb0] sm:$0xff]  }
  0xcc   : > { %4417 = vmatmul.mubr.bf16.vlgmr.msra.gmra.mxu0 %v4859_v58  ;;  %v4814_v58 = vld [vmem:[%s4955_s10 + $0x118] sm:$0xff]  }
  0xcd   : > { %4449 = vmatmul.mubr.bf16.vlgmr.msra.gmra.mxu1 %v4810_v10  ;;  %4465 = vmatpush3.bf16.msra.mxu0 %v4858_v2  ;;  %v4864_v10 = vld [vmem:[%s4955_s10 + $0xb8] sm:$0xff]   ;;  %v4813_v2 = vld [vmem:[%s4955_s10 + $0x110] sm:$0xff]  }
  0xce   : > { %4497 = vmatpush3.bf16.msra.mxu1 %v4860_v50  ;;  %4466 = vmatprep.subr.bf16.mxu0 %v4861_v8  ;;  %v4867_v50 = vld [vmem:[%s5901_s1 + $0xd8] sm:$0xff]  }
  0xcf   : > { %4498 = vmatprep.subr.bf16.mxu1 %v5059_v54  ;;  %4420 = vmatprep.mubr.bf16.mxu0 %v4862_v51  ;;  %v4870_v51 = vld [vmem:[%s4955_s10 + $0xd0] sm:$0xff]  }
  0xd0   : > { %4452 = vmatprep.mubr.bf16.mxu1 %v4811_v48  ;;  %v4866_v48 = vld [vmem:[%s4955_s10 + $0xc0] sm:$0xff]  }
  0xd1   : > { %4467 = vmatpush3.bf16.msra.mxu0 %v4861_v8  ;;  %v4815_v8 = vld [vmem:[%s4955_s10 + $0x120] sm:$0xff]  }
  0xd2   : > { %4499 = vmatpush3.bf16.msra.mxu1 %v5059_v54  ;;  %4468 = vmatprep.subr.bf16.mxu0 %v4863_v56  ;;  %v4865_v54 = vld [vmem:[%s5901_s1 + $0xe0] sm:$0xff]  }
  0xd3   : > { %4500 = vmatprep.subr.bf16.mxu1 %v5078_v59 }
  0xd4   : > { %4421 = vmatmul.mubr.bf16.gmra.mxu0 %v4864_v10  ;;  %v4873_v10 = vld [vmem:[%s5901_s1 + $0xc0] sm:$0xff]  }
  0xd5   : > { %4453 = vmatmul.mubr.bf16.gmra.mxu1 %v4812_v0  ;;  %4469 = vmatpush3.bf16.msra.mxu0 %v4863_v56  ;;  %v4816_v0 = vld [vmem:[%s4955_s10 + $0x128] sm:$0xff]  }
  0xd6   : > { %4501 = vmatpush3.bf16.msra.mxu1 %v5078_v59  ;;  %4470 = vmatprep.subr.bf16.mxu0 %v4865_v54  ;;  %v4868_v59 = vld [vmem:[%s4955_s10 + $0xc8] sm:$0xff]  }
  0xd7   : > { %4502 = vmatprep.subr.bf16.mxu1 %v5089_v62  ;;  %4424 = vmatprep.mubr.bf16.mxu0 %v4866_v48  ;;  %v4871_v56 = vld [vmem:[%s5901_s1 + $0xc8] sm:$0xff]  }
  0xd8   : > { %4456 = vmatprep.mubr.bf16.mxu1 %v4813_v2 }
  0xd9   : > { %4471 = vmatpush3.bf16.msra.mxu0 %v4865_v54 }
  0xda   : > { %4503 = vmatpush3.bf16.msra.mxu1 %v5089_v62  ;;  %4472 = vmatprep.subr.bf16.mxu0 %v4867_v50  ;;  %v4869_v62 = vld [vmem:[%s5901_s1 + $0xd0] sm:$0xff]  }
  0xdb   : > { %4504 = vmatprep.subr.bf16.mxu1 %v5108_v3 }
  0xdc   : > { %4425 = vmatmul.mubr.bf16.gmra.mxu0 %v4868_v59 }
  0xdd   : > { %4457 = vmatmul.mubr.bf16.gmra.mxu1 %v4814_v58  ;;  %4473 = vmatpush3.bf16.msra.mxu0 %v4867_v50  ;;  %v4876_v58 = vld [vmem:[%s5901_s1 + $0x168] sm:$0xff]  }
  0xde   : > { %4505 = vmatpush3.bf16.msra.mxu1 %v5108_v3  ;;  %4474 = vmatprep.subr.bf16.mxu0 %v4869_v62  ;;  %v4872_v3 = vld [vmem:[%s4955_s10 + $0xd8] sm:$0xff]  }
  0xdf   : > { %4506 = vmatprep.subr.bf16.mxu1 %v5119_v6  ;;  %4428 = vmatprep.mubr.bf16.mxu0 %v4870_v51 }
  0xe0   : > { %4460 = vmatprep.mubr.bf16.mxu1 %v4815_v8  ;;  %v4877_v8 = vld [vmem:[%s5901_s1 + $0x160] sm:$0xff]  }
  0xe1   : > { %4475 = vmatpush3.bf16.msra.mxu0 %v4869_v62 }
  0xe2   : > { %4507 = vmatpush3.bf16.msra.mxu1 %v5119_v6  ;;  %4476 = vmatprep.subr.bf16.mxu0 %v4871_v56  ;;  %v4874_v6 = vld [vmem:[%s5901_s1 + $0x178] sm:$0xff]  }
  0xe3   : > { %4508 = vmatprep.subr.bf16.mxu1 %v5138_v11 }
  0xe4   : > { %4429 = vmatmul.mubr.bf16.gmra.mxu0 %v4872_v3 }
  0xe5   : > { %4461 = vmatmul.mubr.bf16.gmra.mxu1 %v4816_v0  ;;  %4477 = vmatpush3.bf16.msra.mxu0 %v4871_v56  ;;  %v4878_v0 = vld [vmem:[%s5901_s1 + $0x158] sm:$0xff]  }
  0xe6   : > { %4509 = vmatpush3.bf16.msra.mxu1 %v5138_v11  ;;  %4478 = vmatprep.subr.bf16.mxu0 %v4873_v10 }
  0xe7   : > { %4510 = vmatprep.subr.bf16.mxu1 %v5149_v14  ;;  %4480 = vmatprep.mubr.bf16.mxu0 %v5156_v16 }
  0xe8   : > { %4512 = vmatprep.mubr.bf16.mxu1 %v5160_v17 }
  0xe9   : > { %4479 = vmatpush3.bf16.msra.mxu0 %v4873_v10  ;;  %v4879_v10 = vld [vmem:[%s5901_s1 + $0x150] sm:$0xff]  }
  0xea   : > { %4511 = vmatpush3.bf16.msra.mxu1 %v5149_v14  ;;  %4528 = vmatprep.subr.bf16.mxu0 %v4874_v6  ;;  %v4875_v14 = vld [vmem:[%s5901_s1 + $0x170] sm:$0xff]  }
  0xeb   : > { %4560 = vmatprep.subr.bf16.mxu1 %v5170_v19 }
  0xec   : > { %v4098_v11 = vpop.f32.mrf.mxu0  ;;  %4481 = vmatmul.mubr.bf16.vlgmr.msra.gmra.mxu0 %v5165_v18 }
  0xed   : > { %v4130_v2 = vpop.f32.mrf.mxu1  ;;  %4513 = vmatmul.mubr.bf16.vlgmr.msra.gmra.mxu1 %v5180_v21  ;;  %4529 = vmatpush3.bf16.msra.mxu0 %v4874_v6 }
  0xee   : > { %v5609_v16 = vadd.f32 %v4130_v2, %v4098_v11  ;;  %4561 = vmatpush3.bf16.msra.mxu1 %v5170_v19  ;;  %v368_v17 = vpop.f32.mrf.mxu0  ;;  %4530 = vmatprep.subr.bf16.mxu0 %v4875_v14  ;;  %v4880_v2 = vld [vmem:[%s5901_s1 + $0x148] sm:$0xff]  }
  0xef   : > { %v553_v54 = vpop.f32.mrf.mxu1  ;;  %4562 = vmatprep.subr.bf16.mxu1 %v5186_v22  ;;  %4484 = vmatprep.mubr.bf16.mxu0 %v5196_v24 }
  0xf0   : > { %v5617_v18 = vadd.f32 %v553_v54, %v368_v17  ;;  %v4099_v48 = vpop.f32.mrf.mxu0  ;;  %4516 = vmatprep.mubr.bf16.mxu1 %v5200_v25 }
  0xf1   : > { %v4131_v21 = vpop.f32.mrf.mxu1  ;;  %4531 = vmatpush3.bf16.msra.mxu0 %v4875_v14  ;;  %v4817_v14 = vld [vmem:[%s4955_s10 + $0xf8] sm:$0xff]   ;;  %v4881_v48 = vld [vmem:[%s5901_s1 + $0x140] sm:$0xff]  }
  0xf2   : > { %4563 = vmatpush3.bf16.msra.mxu1 %v5186_v22  ;;  %v371_v19 = vpop.f32.mrf.mxu0  ;;  %4532 = vmatprep.subr.bf16.mxu0 %v4876_v58 }
  0xf3   : > { %v556_v50 = vpop.f32.mrf.mxu1  ;;  %4564 = vmatprep.subr.bf16.mxu1 %v5212_v27 }
  0xf4   : > { %v4102_v59 = vpop.f32.mrf.mxu0  ;;  %4485 = vmatmul.mubr.bf16.gmra.mxu0 %v5207_v26 }
  0xf5   : > { %v4134_v24 = vpop.f32.mrf.mxu1  ;;  %4517 = vmatmul.mubr.bf16.gmra.mxu1 %v5223_v29  ;;  %4533 = vmatpush3.bf16.msra.mxu0 %v4876_v58 }
  0xf6   : > { %v5627_v25 = vadd.f32 %v4134_v24, %v4102_v59  ;;  %4565 = vmatpush3.bf16.msra.mxu1 %v5212_v27  ;;  %v382_v22 = vpop.f32.mrf.mxu0  ;;  %4534 = vmatprep.subr.bf16.mxu0 %v4877_v8  ;;  %v4819_v59 = vld [vmem:[%s4955_s10 + $0x108] sm:$0xff]  }
  0xf7   : > { %v567_v62 = vpop.f32.mrf.mxu1  ;;  %4566 = vmatprep.subr.bf16.mxu1 %v5229_v30  ;;  %4488 = vmatprep.mubr.bf16.mxu0 %v5240_v32 }
  0xf8   : > { %v5635_v26 = vadd.f32 %v567_v62, %v382_v22  ;;  %v4103_v51 = vpop.f32.mrf.mxu0  ;;  %4520 = vmatprep.mubr.bf16.mxu1 %v5244_v33 }
  0xf9   : > { %v4135_v29 = vpop.f32.mrf.mxu1  ;;  %4535 = vmatpush3.bf16.msra.mxu0 %v4877_v8 }
  0xfa   : > { %4567 = vmatpush3.bf16.msra.mxu1 %v5229_v30  ;;  %v385_v27 = vpop.f32.mrf.mxu0  ;;  %4536 = vmatprep.subr.bf16.mxu0 %v4878_v0 }
  0xfb   : > { %v570_v56 = vpop.f32.mrf.mxu1  ;;  %4568 = vmatprep.subr.bf16.mxu1 %v5256_v35  ;;  %v4821_v27 = vld [vmem:[%s4955_s10 + $0x118] sm:$0xff]  }
  0xfc   : > { %v4106_v3 = vpop.f32.mrf.mxu0  ;;  %4489 = vmatmul.mubr.bf16.gmra.mxu0 %v5251_v34 }
  0xfd   : > { %v4138_v32 = vpop.f32.mrf.mxu1  ;;  %4521 = vmatmul.mubr.bf16.gmra.mxu1 %v5267_v37  ;;  %4537 = vmatpush3.bf16.msra.mxu0 %v4878_v0 }
  0xfe   : > { %v5645_v33 = vadd.f32 %v4138_v32, %v4106_v3  ;;  %4569 = vmatpush3.bf16.msra.mxu1 %v5256_v35  ;;  %v396_v30 = vpop.f32.mrf.mxu0  ;;  %4538 = vmatprep.subr.bf16.mxu0 %v4879_v10 }
  0xff   : > { %v581_v6 = vpop.f32.mrf.mxu1  ;;  %4570 = vmatprep.subr.bf16.mxu1 %v5273_v38  ;;  %4492 = vmatprep.mubr.bf16.mxu0 %v5284_v40 }
 0x100   : > { %v5653_v34 = vadd.f32 %v581_v6, %v396_v30  ;;  %v4107_v37 = vpop.f32.mrf.mxu0  ;;  %4524 = vmatprep.mubr.bf16.mxu1 %v5288_v41 }
 0x101   : > { %v4139_v11 = vpop.f32.mrf.mxu1  ;;  %4539 = vmatpush3.bf16.msra.mxu0 %v4879_v10 }
 0x102   : > { %4571 = vmatpush3.bf16.msra.mxu1 %v5273_v38  ;;  %v399_v35 = vpop.f32.mrf.mxu0  ;;  %4540 = vmatprep.subr.bf16.mxu0 %v4880_v2 }
 0x103   : > { %v584_v17 = vpop.f32.mrf.mxu1  ;;  %4572 = vmatprep.subr.bf16.mxu1 %v5300_v43 }
 0x104   : > { %v4110_v40 = vpop.f32.mrf.mxu0  ;;  %4493 = vmatmul.mubr.bf16.gmra.mxu0 %v5295_v42 }
 0x105   : > { %v4142_v54 = vpop.f32.mrf.mxu1  ;;  %4525 = vmatmul.mubr.bf16.gmra.mxu1 %v5311_v45  ;;  %4541 = vmatpush3.bf16.msra.mxu0 %v4880_v2  ;;  %v4818_v45 = vld [vmem:[%s4955_s10 + $0x100] sm:$0xff]  }
 0x106   : > { %v5664_v41 = vadd.f32 %v4142_v54, %v4110_v40  ;;  %4573 = vmatpush3.bf16.msra.mxu1 %v5300_v43  ;;  %v410_v38 = vpop.f32.mrf.mxu0  ;;  %4542 = vmatprep.subr.bf16.mxu0 %v4881_v48  ;;  %v5926_v40 = vld [vmem:[#allocation6_spill] sm:$0xff] }
 0x107   : > { %v595_v21 = vpop.f32.mrf.mxu1  ;;  %4574 = vmatprep.subr.bf16.mxu1 %v5317_v46  ;;  %4544 = vmatprep.mubr.bf16.mxu0 %v4817_v14  ;;  %v5925_v14 = vld [vmem:[#allocation5_spill] sm:$0xff] }
 0x108   : > { %v5671_v42 = vadd.f32 %v595_v21, %v410_v38  ;;  %v4111_v19 = vpop.f32.mrf.mxu0  ;;  %4576 = vmatprep.mubr.bf16.mxu1 %v5330_v52  ;;  %v5927_v38 = vld [vmem:[#allocation3_spill] sm:$0xff]  ;;  %v4825_v21 = vld [vmem:[%s4955_s10 + $0x100] sm:$0xff]  }
 0x109   : > { %v4143_v58 = vpop.f32.mrf.mxu1  ;;  %4543 = vmatpush3.bf16.msra.mxu0 %v4881_v48 }
 0x10a   : > { %4575 = vmatpush3.bf16.msra.mxu1 %v5317_v46  ;;  %v413_v43 = vpop.f32.mrf.mxu0  ;;  %4592 = vmatprep.subr.bf16.mxu0 %v5176_v20  ;;  %v5928_v58 = vld [vmem:[#allocation7_spill] sm:$0xff] }
 0x10b   : > { %v598_v50 = vpop.f32.mrf.mxu1  ;;  %4624 = vmatprep.subr.bf16.mxu1 %v5339_v53 }
 0x10c   : > { %v4162_v24 = vpop.f32.mrf.mxu0  ;;  %4545 = vmatmul.mubr.bf16.vlgmr.msra.gmra.mxu0 %v4818_v45  ;;  %v5929_v50 = vld [vmem:[#allocation4_spill] sm:$0xff] }
 0x10d   : > { %v828_v22 = vadd.f32 %v4162_v24, %v5609_v16  ;;  %v4194_v8 = vpop.f32.mrf.mxu1  ;;  %4577 = vmatmul.mubr.bf16.vlgmr.msra.gmra.mxu1 %v5346_v57  ;;  %4593 = vmatpush3.bf16.msra.mxu0 %v5176_v20  ;;  %v4820_v57 = vld [vmem:[%s4955_s10 + $0x110] sm:$0xff]  }
 0x10e   : > { %4625 = vmatpush3.bf16.msra.mxu1 %v5339_v53  ;;  %v772_v46 = vpop.f32.mrf.mxu0  ;;  %4594 = vmatprep.subr.bf16.mxu0 %v5192_v23  ;;  %v4882_v23 = vld [vmem:[%s5901_s1 + $0x1f0] sm:$0xff]  }
 0x10f   : > { %v5684_v52 = vadd.f32 %v4194_v8, %v828_v22  ;;  %v827_v62 = vadd.f32 %v772_v46, %v5617_v18  ;;  %v998_v51 = vpop.f32.mrf.mxu1  ;;  %4626 = vmatprep.subr.bf16.mxu1 %v5353_v60  ;;  %4548 = vmatprep.mubr.bf16.mxu0 %v4819_v59 }
 0x110   : > { %v4163_v16 = vpop.f32.mrf.mxu0  ;;  %4580 = vmatprep.mubr.bf16.mxu1 %v5360_v1 }
 0x111   : > { %v5690_v29 = vadd.f32 %v998_v51, %v827_v62  ;;  %v4195_v20 = vpop.f32.mrf.mxu1  ;;  %4595 = vmatpush3.bf16.msra.mxu0 %v4882_v23  ;;  %v4827_v51 = vld [vmem:[%s4955_s10 + $0x110] sm:$0xff]  }
 0x112   : > { %4627 = vmatpush3.bf16.msra.mxu1 %v5353_v60  ;;  %v775_v53 = vpop.f32.mrf.mxu0  ;;  %4596 = vmatprep.subr.bf16.mxu0 %v5219_v28 }
 0x113   : > { %v1001_v18 = vpop.f32.mrf.mxu1  ;;  %4628 = vmatprep.subr.bf16.mxu1 %v5368_v4 }
 0x114   : > { %v4166_v0 = vpop.f32.mrf.mxu0  ;;  %4549 = vmatmul.mubr.bf16.gmra.mxu0 %v4820_v57  ;;  %v5930_v57 = vld [vmem:[#allocation8_spill] sm:$0xff] }
 0x115   : > { %v830_v1 = vadd.f32 %v4166_v0, %v5627_v25  ;;  %v4198_v56 = vpop.f32.mrf.mxu1  ;;  %4581 = vmatmul.mubr.bf16.gmra.mxu1 %v5377_v9  ;;  %4597 = vmatpush3.bf16.msra.mxu0 %v5219_v28  ;;  %v4822_v9 = vld [vmem:[%s4955_s10 + $0x120] sm:$0xff]  }
 0x116   : > { %4629 = vmatpush3.bf16.msra.mxu1 %v5368_v4  ;;  %v786_v60 = vpop.f32.mrf.mxu0  ;;  %4598 = vmatprep.subr.bf16.mxu0 %v5236_v31 }
 0x117   : > { %v5704_v3 = vadd.f32 %v4198_v56, %v830_v1  ;;  %v829_v32 = vadd.f32 %v786_v60, %v5635_v26  ;;  %v1012_v30 = vpop.f32.mrf.mxu1  ;;  %4630 = vmatprep.subr.bf16.mxu1 %v5383_v12  ;;  %4552 = vmatprep.mubr.bf16.mxu0 %v4821_v27  ;;  %v4823_v26 = vld [vmem:[%s4955_s10 + $0x128] sm:$0xff]   ;;  %v4828_v56 = vld [vmem:[%s4955_s10 + $0x118] sm:$0xff]  }
 0x118   : > { %v4167_v25 = vpop.f32.mrf.mxu0  ;;  %4584 = vmatprep.mubr.bf16.mxu1 %v5390_v49 }
 0x119   : > { %v5710_v10 = vadd.f32 %v1012_v30, %v829_v32  ;;  %v4199_v28 = vpop.f32.mrf.mxu1  ;;  %4599 = vmatpush3.bf16.msra.mxu0 %v5236_v31  ;;  %v4829_v32 = vld [vmem:[%s4955_s10 + $0x120] sm:$0xff]  }
 0x11a   : > { %4631 = vmatpush3.bf16.msra.mxu1 %v5383_v12  ;;  %v789_v4 = vpop.f32.mrf.mxu0  ;;  %4600 = vmatprep.subr.bf16.mxu0 %v5263_v36  ;;  %v5924_v12 = vld [vmem:[#allocation2_spill] sm:$0xff] }
 0x11b   : > { %v1015_v6 = vpop.f32.mrf.mxu1  ;;  %4632 = vmatprep.subr.bf16.mxu1 %v5398_v55 }
 0x11c   : > { %v4170_v37 = vpop.f32.mrf.mxu0  ;;  %4553 = vmatmul.mubr.bf16.gmra.mxu0 %v4822_v9 }
 0x11d   : > { %v832_v49 = vadd.f32 %v4170_v37, %v5645_v33  ;;  %v4202_v11 = vpop.f32.mrf.mxu1  ;;  %4585 = vmatmul.mubr.bf16.gmra.mxu1 %v5407_v5  ;;  %4601 = vmatpush3.bf16.msra.mxu0 %v5263_v36  ;;  %v4824_v5 = vld [vmem:[%s4955_s10 + $0x130] sm:$0xff]  }
 0x11e   : > { %4633 = vmatpush3.bf16.msra.mxu1 %v5398_v55  ;;  %v800_v31 = vpop.f32.mrf.mxu0  ;;  %4602 = vmatprep.subr.bf16.mxu0 %v5924_v12 }
 0x11f   : > { %v5722_v35 = vadd.f32 %v4202_v11, %v832_v49  ;;  %v831_v2 = vadd.f32 %v800_v31, %v5653_v34  ;;  %v1026_v17 = vpop.f32.mrf.mxu1  ;;  %4634 = vmatprep.subr.bf16.mxu1 %v5925_v14  ;;  %4556 = vmatprep.mubr.bf16.mxu0 %v4823_v26  ;;  %v4830_v49 = vld [vmem:[%s4955_s10 + $0x128] sm:$0xff]   ;;  %v4831_v31 = vld [vmem:[%s4955_s10 + $0x130] sm:$0xff]  }
 0x120   : > { %v4171_v33 = vpop.f32.mrf.mxu0  ;;  %4588 = vmatprep.mubr.bf16.mxu1 %v5926_v40 }
 0x121   : > { %v5728_v54 = vadd.f32 %v1026_v17, %v831_v2  ;;  %v4203_v36 = vpop.f32.mrf.mxu1  ;;  %4603 = vmatpush3.bf16.msra.mxu0 %v5924_v12 }
 0x122   : > { %4635 = vmatpush3.bf16.msra.mxu1 %v5925_v14  ;;  %v803_v55 = vpop.f32.mrf.mxu0  ;;  %4604 = vmatprep.subr.bf16.mxu0 %v5927_v38  ;;  %v4832_v36 = vld [vmem:[%s4955_s10 + $0x138] sm:$0xff]  }
 0x123   : > { %v1029_v34 = vpop.f32.mrf.mxu1  ;;  %4636 = vmatprep.subr.bf16.mxu1 %v5428_v61 }
 0x124   : > { %v4174_v48 = vpop.f32.mrf.mxu0  ;;  %4557 = vmatmul.mubr.bf16.gmra.mxu0 %v4824_v5 }
 0x125   : > { %v834_v19 = vadd.f32 %v4174_v48, %v5664_v41  ;;  %v4206_v45 = vpop.f32.mrf.mxu1  ;;  %4589 = vmatmul.mubr.bf16.gmra.mxu1 %v5928_v58  ;;  %4605 = vmatpush3.bf16.msra.mxu0 %v5927_v38 }
 0x126   : > { %4637 = vmatpush3.bf16.msra.mxu1 %v5428_v61  ;;  %v814_v43 = vpop.f32.mrf.mxu0  ;;  %4606 = vmatprep.subr.bf16.mxu0 %v5929_v50  ;;  %v4826_v61 = vld [vmem:[%s4955_s10 + $0x108] sm:$0xff]  }
 0x127   : > { %v5740_v59 = vadd.f32 %v4206_v45, %v834_v19  ;;  %v833_v24 = vadd.f32 %v814_v43, %v5671_v42  ;;  %v1040_v22 = vpop.f32.mrf.mxu1  ;;  %4638 = vmatprep.subr.bf16.mxu1 %v5443_v13  ;;  %4608 = vmatprep.mubr.bf16.mxu0 %v5449_v47 }
 0x128   : > { %v4175_v41 = vpop.f32.mrf.mxu0  ;;  %4640 = vmatprep.mubr.bf16.mxu1 %v4825_v21 }
 0x129   : > { %v5745_v8 = vadd.f32 %v1040_v22, %v833_v24  ;;  %v4207_v46 = vpop.f32.mrf.mxu1  ;;  %4607 = vmatpush3.bf16.msra.mxu0 %v5929_v50 }
 0x12a   : > { %4639 = vmatpush3.bf16.msra.mxu1 %v5443_v13  ;;  %v817_v62 = vpop.f32.mrf.mxu0 }
 0x12b   : > { %v1043_v16 = vpop.f32.mrf.mxu1 }
 0x12c   : > { %v4226_v42 = vpop.f32.mrf.mxu0  ;;  %4609 = vmatmul.mubr.bf16.vlgmr.msra.gmra.mxu0 %v5930_v57 }
 0x12d   : > { %v1280_v47 = vadd.f32 %v4226_v42, %v5684_v52  ;;  %v4258_v20 = vpop.f32.mrf.mxu1  ;;  %4641 = vmatmul.mubr.bf16.vlgmr.msra.gmra.mxu1 %v4826_v61  ;;  %4612 = vmatprep.mubr.bf16.mxu0 %v5470_v39 }
 0x12e   : > { %v1224_v23 = vpop.f32.mrf.mxu0  ;;  %4644 = vmatprep.mubr.bf16.mxu1 %v4827_v51 }
 0x12f   : > { %v1506_v53 = vadd.f32 %v4258_v20, %v1280_v47  ;;  %v1279_v18 = vadd.f32 %v1224_v23, %v5690_v29  ;;  %v1450_v13 = vpop.f32.mrf.mxu1 }
 0x130   : > { %v4227_v27 = vpop.f32.mrf.mxu0 }
 0x131   : > { %v1505_v0 = vadd.f32 %v1450_v13, %v1279_v18  ;;  %v4259_v1 = vpop.f32.mrf.mxu1 }
 0x132   : > { %v1227_v60 = vpop.f32.mrf.mxu0 }
 0x133   : > { %v1453_v30 = vpop.f32.mrf.mxu1 }
 0x134   : > { %v4230_v25 = vpop.f32.mrf.mxu0  ;;  %4613 = vmatmul.mubr.bf16.gmra.mxu0 %v5483_v7 }
 0x135   : > { %v1282_v39 = vadd.f32 %v4230_v25, %v5704_v3  ;;  %v4262_v52 = vpop.f32.mrf.mxu1  ;;  %4645 = vmatmul.mubr.bf16.gmra.mxu1 %v4828_v56  ;;  %4616 = vmatprep.mubr.bf16.mxu0 %v5492_v15 }
 0x136   : > { %v1238_v29 = vpop.f32.mrf.mxu0  ;;  %4648 = vmatprep.mubr.bf16.mxu1 %v4829_v32 }
 0x137   : > { %v1508_v9 = vadd.f32 %v4262_v52, %v1282_v39  ;;  %v1281_v28 = vadd.f32 %v1238_v29, %v5710_v10  ;;  %v1464_v4 = vpop.f32.mrf.mxu1 }
 0x138   : > { %v4231_v6 = vpop.f32.mrf.mxu0 }
 0x139   : > { %v1507_v26 = vadd.f32 %v1464_v4, %v1281_v28  ;;  %v4263_v37 = vpop.f32.mrf.mxu1 }
 0x13a   : > { %v1241_v11 = vpop.f32.mrf.mxu0 }
 0x13b   : > { %v1467_v7 = vpop.f32.mrf.mxu1 }
 0x13c   : > { %v4234_v12 = vpop.f32.mrf.mxu0  ;;  %4617 = vmatmul.mubr.bf16.gmra.mxu0 %v5505_v44  ;;  %v5931_v44 = vld [vmem:[#allocation9_spill] sm:$0xff] }
 0x13d   : > { %v1284_v3 = vadd.f32 %v4234_v12, %v5722_v35  ;;  %v4266_v15 = vpop.f32.mrf.mxu1  ;;  %4649 = vmatmul.mubr.bf16.gmra.mxu1 %v4830_v49  ;;  %4620 = vmatprep.mubr.bf16.mxu0 %v5514_v63 }
 0x13e   : > { %v1252_v2 = vpop.f32.mrf.mxu0  ;;  %4652 = vmatprep.mubr.bf16.mxu1 %v4831_v31 }
 0x13f   : > { %v1510_v10 = vadd.f32 %v4266_v15, %v1284_v3  ;;  %v1283_v17 = vadd.f32 %v1252_v2, %v5728_v54  ;;  %v1478_v14 = vpop.f32.mrf.mxu1 }
 0x140   : > { %v4235_v33 = vpop.f32.mrf.mxu0 }
 0x141   : > { %v1509_v40 = vadd.f32 %v1478_v14, %v1283_v17  ;;  %v4267_v5 = vpop.f32.mrf.mxu1 }
 0x142   : > { %v1255_v55 = vpop.f32.mrf.mxu0 }
 0x143   : > { %v1481_v38 = vpop.f32.mrf.mxu1 }
 0x144   : > { %v4238_v34 = vpop.f32.mrf.mxu0  ;;  %4621 = vmatmul.mubr.bf16.gmra.mxu0 %v5931_v44 }
 0x145   : > { %v1286_v35 = vadd.f32 %v4238_v34, %v5740_v59  ;;  %v4270_v48 = vpop.f32.mrf.mxu1  ;;  %4653 = vmatmul.mubr.bf16.gmra.mxu1 %v4832_v36 }
 0x146   : > { %v1266_v63 = vpop.f32.mrf.mxu0 }
 0x147   : > { %v1512_v21 = vadd.f32 %v4270_v48, %v1286_v35  ;;  %v1285_v19 = vadd.f32 %v1266_v63, %v5745_v8  ;;  %v1492_v45 = vpop.f32.mrf.mxu1 }
 0x148   : > { %v4239_v54 = vpop.f32.mrf.mxu0 }
 0x149   : > { %v1511_v58 = vadd.f32 %v1492_v45, %v1285_v19  ;;  %v4271_v43 = vpop.f32.mrf.mxu1 }
 0x14a   : > { %v1269_v50 = vpop.f32.mrf.mxu0 }
 0x14b   : > { %v1495_v24 = vpop.f32.mrf.mxu1 }
 0x14c   : > { %v4290_v22 = vpop.f32.mrf.mxu0 }
 0x14d   : > { %v1732_v41 = vadd.f32 %v4290_v22, %v1506_v53  ;;  %v4322_v46 = vpop.f32.mrf.mxu1 }
 0x14e   : > { %v1676_v61 = vpop.f32.mrf.mxu0 }
 0x14f   : > { %v1958_v62 = vadd.f32 %v4322_v46, %v1732_v41  ;;  %v1731_v51 = vadd.f32 %v1676_v61, %v1505_v0  ;;  %v1902_v16 = vpop.f32.mrf.mxu1 }
 0x150   : > { %v4291_v59 = vpop.f32.mrf.mxu0 }
 0x151   : > { %v1957_v42 = vadd.f32 %v1902_v16, %v1731_v51  ;;  %v4323_v57 = vpop.f32.mrf.mxu1 }
 0x152   : > { %v1679_v47 = vpop.f32.mrf.mxu0 }
 0x153   : > { %v1905_v20 = vpop.f32.mrf.mxu1 }
 0x154   : > { %v4294_v23 = vpop.f32.mrf.mxu0 }
 0x155   : > { %v1734_v8 = vadd.f32 %v4294_v23, %v1508_v9  ;;  %v4326_v18 = vpop.f32.mrf.mxu1 }
 0x156   : > { %v1690_v13 = vpop.f32.mrf.mxu0 }
 0x157   : > { %v1960_v27 = vadd.f32 %v4326_v18, %v1734_v8  ;;  %v1733_v1 = vadd.f32 %v1690_v13, %v1507_v26  ;;  %v1916_v56 = vpop.f32.mrf.mxu1 }
 0x158   : > { %v4295_v60 = vpop.f32.mrf.mxu0 }
 0x159   : > { %v1959_v32 = vadd.f32 %v1916_v56, %v1733_v1  ;;  %v4327_v53 = vpop.f32.mrf.mxu1 }
 0x15a   : > { %v1693_v30 = vpop.f32.mrf.mxu0 }
 0x15b   : > { %v1919_v25 = vpop.f32.mrf.mxu1 }
 0x15c   : > { %v4298_v39 = vpop.f32.mrf.mxu0 }
 0x15d   : > { %v1736_v0 = vadd.f32 %v4298_v39, %v1510_v10  ;;  %v4330_v52 = vpop.f32.mrf.mxu1 }
 0x15e   : > { %v1704_v29 = vpop.f32.mrf.mxu0 }
 0x15f   : > { %v1962_v28 = vadd.f32 %v4330_v52, %v1736_v0  ;;  %v1735_v4 = vadd.f32 %v1704_v29, %v1509_v40  ;;  %v1930_v6 = vpop.f32.mrf.mxu1 }
 0x160   : > { %v4299_v37 = vpop.f32.mrf.mxu0 }
 0x161   : > { %v1961_v49 = vadd.f32 %v1930_v6, %v1735_v4  ;;  %v4331_v9 = vpop.f32.mrf.mxu1 }
 0x162   : > { %v1707_v11 = vpop.f32.mrf.mxu0 }
 0x163   : > { %v1933_v31 = vpop.f32.mrf.mxu1 }
 0x164   : > { %v4302_v7 = vpop.f32.mrf.mxu0 }
 0x165   : > { %v1738_v26 = vadd.f32 %v4302_v7, %v1512_v21  ;;  %v4334_v12 = vpop.f32.mrf.mxu1 }
 0x166   : > { %v1718_v3 = vpop.f32.mrf.mxu0 }
 0x167   : > { %v1964_v15 = vadd.f32 %v4334_v12, %v1738_v26  ;;  %v1737_v2 = vadd.f32 %v1718_v3, %v1511_v58  ;;  %v1944_v17 = vpop.f32.mrf.mxu1 }
 0x168   : > { %v4303_v14 = vpop.f32.mrf.mxu0 }
 0x169   : > { %v1963_v33 = vadd.f32 %v1944_v17, %v1737_v2  ;;  %v4335_v10 = vpop.f32.mrf.mxu1 }
 0x16a   : > { %v1721_v5 = vpop.f32.mrf.mxu0 }
 0x16b   : > { %v1947_v36 = vpop.f32.mrf.mxu1 }
 0x16c   : > { %v4354_v55 = vpop.f32.mrf.mxu0 }
 0x16d   : > { %v5771_v40 = vadd.f32 %v4354_v55, %v1958_v62  ;;  %v4386_v38 = vpop.f32.mrf.mxu1 }
 0x16e   : > { %v2128_v34 = vpop.f32.mrf.mxu0 }
 0x16f   : > { %v5773_v44 = vadd.f32 %v2128_v34, %v1957_v42  ;;  %v2225_v35 = vpop.f32.mrf.mxu1 }
 0x170   : > { %v4355_v48 = vpop.f32.mrf.mxu0 }
 0x171   : > { %v4387_v63 = vpop.f32.mrf.mxu1 }
 0x172   : > { %v2131_v21 = vpop.f32.mrf.mxu0 }
 0x173   : > { %v2228_v19 = vpop.f32.mrf.mxu1 }
 0x174   : > { %v4358_v45 = vpop.f32.mrf.mxu0 }
 0x175   : > { %v5775_v54 = vadd.f32 %v4358_v45, %v1960_v27  ;;  %v4390_v58 = vpop.f32.mrf.mxu1 }
 0x176   : > { %v2142_v43 = vpop.f32.mrf.mxu0 }
 0x177   : > { %v5777_v50 = vadd.f32 %v2142_v43, %v1959_v32  ;;  %v2239_v24 = vpop.f32.mrf.mxu1 }
 0x178   : > { %v4359_v22 = vpop.f32.mrf.mxu0 }
 0x179   : > { %v4391_v41 = vpop.f32.mrf.mxu1 }
 0x17a   : > { %v2145_v46 = vpop.f32.mrf.mxu0 }
 0x17b   : > { %v2242_v61 = vpop.f32.mrf.mxu1 }
 0x17c   : > { %v4362_v62 = vpop.f32.mrf.mxu0 }
 0x17d   : > { %v5779_v51 = vadd.f32 %v4362_v62, %v1962_v28  ;;  %v4394_v16 = vpop.f32.mrf.mxu1 }
 0x17e   : > { %v2156_v59 = vpop.f32.mrf.mxu0 }
 0x17f   : > { %v5781_v42 = vadd.f32 %v2156_v59, %v1961_v49  ;;  %v2253_v57 = vpop.f32.mrf.mxu1 }
 0x180   : > { %v4363_v47 = vpop.f32.mrf.mxu0 }
 0x181   : > { %v4395_v20 = vpop.f32.mrf.mxu1 }
 0x182   : > { %v2159_v23 = vpop.f32.mrf.mxu0 }
 0x183   : > { %v2256_v8 = vpop.f32.mrf.mxu1 }
 0x184   : > { %v4366_v18 = vpop.f32.mrf.mxu0 }
 0x185   : > { %v5783_v13 = vadd.f32 %v4366_v18, %v1964_v15  ;;  %v4398_v27 = vpop.f32.mrf.mxu1 }
 0x186   : > { %v2170_v1 = vpop.f32.mrf.mxu0 }
 0x187   : > { %v5785_v56 = vadd.f32 %v2170_v1, %v1963_v33  ;;  %v2267_v60 = vpop.f32.mrf.mxu1 }
 0x188   : > { %v4367_v32 = vpop.f32.mrf.mxu0 }
 0x189   : > { %v4399_v53 = vpop.f32.mrf.mxu1 }
 0x18a   : > { %v2173_v30 = vpop.f32.mrf.mxu0 }
 0x18b   : > { %v2270_v25 = vpop.f32.mrf.mxu1 }
 0x18c   : > { %v4418_v39 = vpop.f32.mrf.mxu0 }
 0x18d   : > { %v2322_v0 = vadd.f32 %v4418_v39, %v4386_v38  ;;  %v4450_v52 = vpop.f32.mrf.mxu1 }
 0x18e   : > { %v2314_v29 = vpop.f32.mrf.mxu0 }
 0x18f   : > { %v5787_v28 = vadd.f32 %v4450_v52, %v2322_v0  ;;  %v2315_v4 = vadd.f32 %v2314_v29, %v2225_v35  ;;  %v2468_v6 = vpop.f32.mrf.mxu1 }
 0x190   : > { %v4419_v37 = vpop.f32.mrf.mxu0 }
 0x191   : > { %v5789_v49 = vadd.f32 %v2468_v6, %v2315_v4  ;;  %v4451_v9 = vpop.f32.mrf.mxu1 }
 0x192   : > { %v2317_v11 = vpop.f32.mrf.mxu0 }
 0x193   : > { %v2471_v31 = vpop.f32.mrf.mxu1 }
 0x194   : > { %v4422_v7 = vpop.f32.mrf.mxu0 }
 0x195   : > { %v2336_v26 = vadd.f32 %v4422_v7, %v4390_v58  ;;  %v4454_v12 = vpop.f32.mrf.mxu1 }
 0x196   : > { %v2328_v3 = vpop.f32.mrf.mxu0 }
 0x197   : > { %v5791_v15 = vadd.f32 %v4454_v12, %v2336_v26  ;;  %v2329_v2 = vadd.f32 %v2328_v3, %v2239_v24  ;;  %v2482_v17 = vpop.f32.mrf.mxu1 }
 0x198   : > { %v4423_v14 = vpop.f32.mrf.mxu0 }
 0x199   : > { %v5793_v33 = vadd.f32 %v2482_v17, %v2329_v2  ;;  %v4455_v10 = vpop.f32.mrf.mxu1 }
 0x19a   : > { %v2331_v5 = vpop.f32.mrf.mxu0 }
 0x19b   : > { %v2485_v36 = vpop.f32.mrf.mxu1 }
 0x19c   : > { %v4426_v55 = vpop.f32.mrf.mxu0 }
 0x19d   : > { %v2350_v38 = vadd.f32 %v4426_v55, %v4394_v16  ;;  %v4458_v34 = vpop.f32.mrf.mxu1 }
 0x19e   : > { %v2342_v35 = vpop.f32.mrf.mxu0 }
 0x19f   : > { %v5795_v48 = vadd.f32 %v4458_v34, %v2350_v38  ;;  %v2343_v63 = vadd.f32 %v2342_v35, %v2253_v57  ;;  %v2496_v21 = vpop.f32.mrf.mxu1 }
 0x1a0   : > { %v4427_v19 = vpop.f32.mrf.mxu0 }
 0x1a1   : > { %v5797_v45 = vadd.f32 %v2496_v21, %v2343_v63  ;;  %v4459_v58 = vpop.f32.mrf.mxu1 }
 0x1a2   : > { %v2345_v43 = vpop.f32.mrf.mxu0 }
 0x1a3   : > { %v2499_v24 = vpop.f32.mrf.mxu1 }
 0x1a4   : > { %v4430_v22 = vpop.f32.mrf.mxu0 }
 0x1a5   : > { %v2364_v41 = vadd.f32 %v4430_v22, %v4398_v27  ;;  %v4462_v46 = vpop.f32.mrf.mxu1 }
 0x1a6   : > { %v2356_v61 = vpop.f32.mrf.mxu0 }
 0x1a7   : > { %v5799_v62 = vadd.f32 %v4462_v46, %v2364_v41  ;;  %v2357_v59 = vadd.f32 %v2356_v61, %v2267_v60  ;;  %v2510_v16 = vpop.f32.mrf.mxu1 }
 0x1a8   : > { %v4431_v47 = vpop.f32.mrf.mxu0 }
 0x1a9   : > { %v5801_v20 = vadd.f32 %v2510_v16, %v2357_v59  ;;  %v4463_v23 = vpop.f32.mrf.mxu1 }
 0x1aa   : > { %v2359_v57 = vpop.f32.mrf.mxu0 }
 0x1ab   : > { %v2513_v8 = vpop.f32.mrf.mxu1 }
 0x1ac   : > { %v4482_v18 = vpop.f32.mrf.mxu0 }
 0x1ad   : > { %v4514_v1 = vpop.f32.mrf.mxu1 }
 0x1ae   : > { %v2565_v32 = vpop.f32.mrf.mxu0 }
 0x1af   : > { %v2662_v53 = vpop.f32.mrf.mxu1 }
 0x1b0   : > { %v4483_v30 = vpop.f32.mrf.mxu0 }
 0x1b1   : > { %v4515_v25 = vpop.f32.mrf.mxu1 }
 0x1b2   : > { %v2568_v39 = vpop.f32.mrf.mxu0 }
 0x1b3   : > { %v2665_v27 = vpop.f32.mrf.mxu1 }
 0x1b4   : > { %v4486_v0 = vpop.f32.mrf.mxu0 }
 0x1b5   : > { %v5803_v52 = vpop.f32.mrf.mxu1 }
 0x1b6   : > { %v2579_v29 = vpop.f32.mrf.mxu0 }
 0x1b7   : > { %v5805_v60 = vpop.f32.mrf.mxu1 }
 0x1b8   : > { %v4487_v4 = vpop.f32.mrf.mxu0 }
 0x1b9   : > { %v4519_v6 = vpop.f32.mrf.mxu1 }
 0x1ba   : > { %v2582_v37 = vpop.f32.mrf.mxu0  ;;  %v2621_v6 = vadd.f32 %v4482_v18, %v5787_v28 }
 0x1bb   : > { %v2679_v9 = vpop.f32.mrf.mxu1 }
 0x1bc   : > { %v5807_v11 = vpop.f32.mrf.mxu0 }
 0x1bd   : > { %v5809_v31 = vpop.f32.mrf.mxu1 }
 0x1be   : > { %v5811_v7 = vpop.f32.mrf.mxu0 }
 0x1bf   : > { %v5813_v26 = vpop.f32.mrf.mxu1 }
 0x1c0   : > { %v4491_v12 = vpop.f32.mrf.mxu0 }
 0x1c1   : > { %v4523_v3 = vpop.f32.mrf.mxu1  ;;  %v2620_v12 = vadd.f32 %v2565_v32, %v5789_v49  ;;  %v2622_v49 = vadd.f32 %v2579_v29, %v5793_v33 }
 0x1c2   : > { %v2596_v2 = vpop.f32.mrf.mxu0 }
 0x1c3   : > { %v2693_v17 = vpop.f32.mrf.mxu1 }
 0x1c4   : > { %v5815_v14 = vpop.f32.mrf.mxu0  ;;  %v2718_v17 = vadd.f32 %v4514_v1, %v2621_v6 }
 0x1c5   : > { %v5817_v10 = vpop.f32.mrf.mxu1 }
 0x1c6   : > { %v5819_v5 = vpop.f32.mrf.mxu0 }
 0x1c7   : > { %v5821_v36 = vpop.f32.mrf.mxu1 }
 0x1c8   : > { %v4495_v55 = vpop.f32.mrf.mxu0 }
 0x1c9   : > { %v4527_v38 = vpop.f32.mrf.mxu1 }
 0x1ca   : > { %v2610_v34 = vpop.f32.mrf.mxu0 }
 0x1cb   : > { %v2707_v35 = vpop.f32.mrf.mxu1  ;;  %v2717_v34 = vadd.f32 %v2662_v53, %v2620_v12 }
 0x1cc   : > { %v4546_v63 = vpop.f32.mrf.mxu0 }
 0x1cd   : > { %v4578_v21 = vpop.f32.mrf.mxu1  ;;  %v2879_v35 = vadd.f32 %v4546_v63, %v2718_v17  ;;  %v2719_v63 = vadd.f32 %v5805_v60, %v2622_v49 }
 0x1ce   : > { %v2823_v19 = vpop.f32.mrf.mxu0 }
 0x1cf   : > { %v2920_v58 = vpop.f32.mrf.mxu1  ;;  %v2878_v28 = vadd.f32 %v2823_v19, %v2717_v34  ;;  %v2976_v32 = vadd.f32 %v4578_v21, %v2879_v35 }
 0x1d0   : > { %v4547_v43 = vpop.f32.mrf.mxu0 }
 0x1d1   : > { %v4579_v24 = vpop.f32.mrf.mxu1 }
 0x1d2   : > { %v2826_v22 = vpop.f32.mrf.mxu0 }
 0x1d3   : > { %v2923_v41 = vpop.f32.mrf.mxu1  ;;  %v2623_v22 = vadd.f32 %v4486_v0, %v5791_v15  ;;  %v2625_v0 = vadd.f32 %v5807_v11, %v5795_v48 }
 0x1d4   : > { %v4550_v46 = vpop.f32.mrf.mxu0 }
 0x1d5   : > { %v4582_v61 = vpop.f32.mrf.mxu1  ;;  %v2720_v1 = vadd.f32 %v5803_v52, %v2623_v22  ;;  %v2722_v17 = vadd.f32 %v5809_v31, %v2625_v0 }
 0x1d6   : > { %v2837_v59 = vpop.f32.mrf.mxu0 }
 0x1d7   : > { %v2934_v16 = vpop.f32.mrf.mxu1  ;;  %v2881_v6 = vadd.f32 %v4550_v46, %v2720_v1  ;;  %v2880_v33 = vadd.f32 %v2837_v59, %v2719_v63  ;;  %v5855_v59 = vld [vmem:[%s5902_s2] ss:$0 sm:$0xff] }
 0x1d8   : > { %v4551_v47 = vpop.f32.mrf.mxu0 }
 0x1d9   : > { %v4583_v23 = vpop.f32.mrf.mxu1  ;;  %v2977_v48 = vadd.f32 %v2934_v16, %v2880_v33  ;;  %v2627_v16 = vadd.f32 %v5815_v14, %v5799_v62 }
 0x1da   : > { %v2840_v57 = vpop.f32.mrf.mxu0 }
 0x1db   : > { %v2937_v8 = vpop.f32.mrf.mxu1  ;;  %v2975_v57 = vadd.f32 %v2920_v58, %v2878_v28  ;;  %v2624_v58 = vadd.f32 %v5811_v7, %v5797_v45 }
 0x1dc   : > { %v4554_v30 = vpop.f32.mrf.mxu0 }
 0x1dd   : > { %v5823_v25 = vpop.f32.mrf.mxu1 }
 0x1de   : > { %v5825_v39 = vpop.f32.mrf.mxu0 }
 0x1df   : > { %v5827_v27 = vpop.f32.mrf.mxu1 }
 0x1e0   : > { %v4555_v4 = vpop.f32.mrf.mxu0 }
 0x1e1   : > { %v4587_v37 = vpop.f32.mrf.mxu1 }
 0x1e2   : > { %v2854_v9 = vpop.f32.mrf.mxu0 }
 0x1e3   : > { %v2951_v3 = vpop.f32.mrf.mxu1 }
 0x1e4   : > { %v5831_v2 = vpop.f32.mrf.mxu0  ;;  %v2978_v3 = vadd.f32 %v4582_v61, %v2881_v6 }
 0x1e5   : > { %v5833_v55 = vpop.f32.mrf.mxu1 }
 0x1e6   : > { %v5835_v38 = vpop.f32.mrf.mxu0 }
 0x1e7   : > { %v5837_v43 = vpop.f32.mrf.mxu1 }
 0x1e8   : > { %v4559_v24 = vpop.f32.mrf.mxu0 }
 0x1e9   : > { %v4591_v18 = vpop.f32.mrf.mxu1  ;;  %v2883_v24 = vadd.f32 %v4554_v30, %v2722_v17 }
 0x1ea   : > { %v2868_v41 = vpop.f32.mrf.mxu0 }
 0x1eb   : > { %v2965_v47 = vpop.f32.mrf.mxu1  ;;  %v2980_v30 = vadd.f32 %v5823_v25, %v2883_v24 }
 0x1ec   : > { %v4610_v23 = vpop.f32.mrf.mxu0 }
 0x1ed   : > { %v3073_v8 = vadd.f32 %v4610_v23, %v2976_v32  ;;  %v4642_v4 = vpop.f32.mrf.mxu1 }
 0x1ee   : > { %v3017_v53 = vpop.f32.mrf.mxu0 }
 0x1ef   : > { %v3234_v37 = vadd.f32 %v4642_v4, %v3073_v8  ;;  %v3072_v9 = vadd.f32 %v3017_v53, %v2975_v57  ;;  %v3178_v15 = vpop.f32.mrf.mxu1 }
 0x1f0   : > { %v4611_v19 = vpop.f32.mrf.mxu0 }
 0x1f1   : > { %v3242_v29 = vmax.f32 %v5771_v40, %v3234_v37  ;;  %v3233_v21 = vadd.f32 %v3178_v15, %v3072_v9  ;;  %v4643_v12 = vpop.f32.mrf.mxu1 }
 0x1f2   : > { %v3020_v52 = vpop.f32.mrf.mxu0 }
 0x1f3   : > { %v3241_v60 = vmax.f32 %v5773_v44, %v3233_v21  ;;  %v3181_v46 = vpop.f32.mrf.mxu1  ;;  %v3251_v11 = vsel %vm3249_vm0, %v3242_v29, -inf  ;;  %v2721_v44 = vadd.f32 %v5813_v26, %v2624_v58  ;;  %v2626_v26 = vadd.f32 %v5819_v5, %v5801_v20 }
 0x1f4   : > { %v4614_v34 = vpop.f32.mrf.mxu0 }
 0x1f5   : > { %v3250_v40 = vsel %vm3249_vm0, %v3241_v60, -inf  ;;  %v3075_v35 = vadd.f32 %v4614_v34, %v2978_v3  ;;  %v4646_v45 = vpop.f32.mrf.mxu1  ;;  %v2882_v49 = vadd.f32 %v5825_v39, %v2721_v44  ;;  %v2723_v37 = vadd.f32 %v5821_v36, %v2626_v26 }
 0x1f6   : > { %v3252_v7 = vmax.f32 %v3250_v40, %v3251_v11  ;;  %v3031_v61 = vpop.f32.mrf.mxu0 }
 0x1f7   : > { %v3236_v31 = vadd.f32 %v4646_v45, %v3075_v35  ;;  %v3074_v22 = vadd.f32 %v3031_v61, %v2977_v48  ;;  %v3192_v28 = vpop.f32.mrf.mxu1  ;;  %v2979_v4 = vadd.f32 %v5827_v27, %v2882_v49  ;;  %v2884_v27 = vadd.f32 %v5835_v38, %v2723_v37 }
 0x1f8   : > { %v3269_v18 = vadd.f32 %v5855_v59, %v3252_v7  ;;  %v4615_v41 = vpop.f32.mrf.mxu0 }
 0x1f9   : > { %v3244_v32 = vmax.f32 %v5775_v54, %v3236_v31  ;;  %v3235_v47 = vadd.f32 %v3192_v28, %v3074_v22  ;;  %v4647_v23 = vpop.f32.mrf.mxu1  ;;  %v2724_v54 = vadd.f32 %v5817_v10, %v2627_v16  ;;  %v2981_v46 = vadd.f32 %v5837_v43, %v2884_v27 }
 0x1fa   : > { %v3273_v1 = vmax.f32 %v3269_v18, 0.0  ;;  %v3034_v57 = vpop.f32.mrf.mxu0 }
 0x1fb   : > { %v3243_v62 = vmax.f32 %v5777_v50, %v3235_v47  ;;  %v3195_v14 = vpop.f32.mrf.mxu1  ;;  %v3254_v53 = vsel %vm3249_vm0, %v3244_v32, -inf  ;;  %v2885_v50 = vadd.f32 %v5831_v2, %v2724_v54 }
 0x1fc   : > { %v3277_v39 = vpack.c.bf16 %v3273_v1, %v3273_v1  ;;  %v4618_v8 = vpop.f32.mrf.mxu0 }
 0x1fd   : > { %v3253_v20 = vsel %vm3249_vm0, %v3243_v62, -inf  ;;  %v3077_v5 = vadd.f32 %v4618_v8, %v2980_v30  ;;  %v4650_v25 = vpop.f32.mrf.mxu1  ;;  %v2982_v58 = vadd.f32 %v5833_v55, %v2885_v50 }
 0x1fe   : > { %3281 = vst [vmem:[%s5870_s13] sm:$0x3] %v3277_v39  ;;  %v3255_v63 = vmax.f32 %v3253_v20, %v3254_v53  ;;  %v3045_v6 = vpop.f32.mrf.mxu0 }
 0x1ff   : > { %v3238_v9 = vadd.f32 %v4650_v25, %v3077_v5  ;;  %v3076_v15 = vadd.f32 %v3045_v6, %v2979_v4  ;;  %v3206_v10 = vpop.f32.mrf.mxu1 }
 0x200   : > { %v3270_v0 = vadd.f32 %v5855_v59, %v3255_v63  ;;  %v4619_v19 = vpop.f32.mrf.mxu0 }
 0x201   : > { %v3246_v33 = vmax.f32 %v5779_v51, %v3238_v9  ;;  %v3237_v29 = vadd.f32 %v3206_v10, %v3076_v15  ;;  %v4651_v21 = vpop.f32.mrf.mxu1 }
 0x202   : > { %v3274_v12 = vmax.f32 %v3270_v0, 0.0  ;;  %v3048_v52 = vpop.f32.mrf.mxu0 }
 0x203   : > { %v3245_v36 = vmax.f32 %v5781_v42, %v3237_v29  ;;  %v3209_v2 = vpop.f32.mrf.mxu1  ;;  %v3257_v17 = vsel %vm3249_vm0, %v3246_v33, -inf }
 0x204   : > { %v3278_v3 = vpack.c.bf16 %v3274_v12, %v3274_v12  ;;  %v4622_v60 = vpop.f32.mrf.mxu0 }
 0x205   : > { %v3256_v38 = vsel %vm3249_vm0, %v3245_v36, -inf  ;;  %v3079_v34 = vadd.f32 %v4622_v60, %v2982_v58  ;;  %v4654_v48 = vpop.f32.mrf.mxu1 }
 0x206   : > { %3282 = vst [vmem:[%s5870_s13 + $0x2] sm:$0x3] %v3278_v3  ;;  %v3258_v51 = vmax.f32 %v3256_v38, %v3257_v17  ;;  %v3059_v11 = vpop.f32.mrf.mxu0 }
 0x207   : > { %v3240_v40 = vadd.f32 %v4654_v48, %v3079_v34  ;;  %v3078_v35 = vadd.f32 %v3059_v11, %v2981_v46  ;;  %v3220_v55 = vpop.f32.mrf.mxu1 }
 0x208   : > { %v3271_v42 = vadd.f32 %v5855_v59, %v3258_v51  ;;  %v4623_v45 = vpop.f32.mrf.mxu0 }
 0x209   : > { %v3248_v7 = vmax.f32 %v5783_v13, %v3240_v40  ;;  %v3239_v43 = vadd.f32 %v3220_v55, %v3078_v35  ;;  %v4655_v61 = vpop.f32.mrf.mxu1 }
 0x20a   : > { %v3275_v44 = vmax.f32 %v3271_v42, 0.0  ;;  %v3062_v24 = vpop.f32.mrf.mxu0 }
 0x20b   : > { %v3247_v31 = vmax.f32 %v5785_v56, %v3239_v43  ;;  %v3223_v22 = vpop.f32.mrf.mxu1  ;;  %v3260_v16 = vsel %vm3249_vm0, %v3248_v7, -inf }
 0x20c   : > { %v3279_v28 = vpack.c.bf16 %v3275_v44, %v3275_v44 }
 0x20d   : > { %v3259_v18 = vsel %vm3249_vm0, %v3247_v31, -inf }
 0x20e   : > { %3283 = vst [vmem:[%s5870_s13 + $0x4] sm:$0x3] %v3279_v28  ;;  %v3261_v41 = vmax.f32 %v3259_v18, %v3260_v16 }
 0x210   : > { %v3272_v49 = vadd.f32 %v5855_v59, %v3261_v41 }
 0x212   : > { %v3276_v32 = vmax.f32 %v3272_v49, 0.0 }
 0x214   : > { %v3280_v47 = vpack.c.bf16 %v3276_v32, %v3276_v32 }
 0x216   : > { %3284 = vst [vmem:[%s5870_s13 + $0x6] sm:$0x3] %v3280_v47 }
 0x217 PF: > { %s13_s12 = sadd.s32 1, %s4889_s12  }
 0x218   : > { %p10_p4 = scmp.ge.s32.totalorder %s13_s12, 4  }
 0x21a   :  { %12 = sbr.rel (!%p10_p4) target bundleno = 1 (0x1), region = 73 }

// kernel: conv_autoencoder_forward.11
= control target key start
LH: loop header
LB: loop body
LE: loop exit
PB: predicated region body
PF: predicated region fallthrough
CT: control target
= control target key end

     0   :  { %s762_s1 = inlined_call_operand.vmem [shape: bf16[128,128], index: 1, kind: input, shape index: {}]   ;;  %s763_s0 = inlined_call_operand.vmem [shape: bf16[128,128], index: 0, kind: input, shape index: {}]   ;;  %s764_s2 = inlined_call_operand.vmem [shape: f32[1,128], index: 2, kind: input, shape index: {}]   ;;  %s765_s3 = inlined_call_operand.vmem [shape: f32[128,128], index: 3, kind: output, shape index: {}]  }
   0x1   :  { %v563_v0 = vld [vmem:[%s762_s1 + $0x38] sm:$0xff]   ;;  %v564_v1 = vld [vmem:[%s762_s1 + $0x30] sm:$0xff]   ;;  %v565_v2 = vld [vmem:[%s762_s1 + $0x28] sm:$0xff]  }
   0x2   :  { %515 = vmatprep.subr.bf16.mxu0 %v563_v0  ;;  %547 = vmatprep.subr.bf16.mxu1 %v563_v0  ;;  %v566_v3 = vld [vmem:[%s762_s1 + $0x20] sm:$0xff]   ;;  %v567_v6 = vld [vmem:[%s762_s1 + $0x18] sm:$0xff]   ;;  %v568_v7 = vld [vmem:[%s762_s1 + $0x10] sm:$0xff]  }
   0x3   :  { %516 = vmatpush3.bf16.msra.mxu0 %v563_v0  ;;  %555 = vmatpush3.bf16.msra.mxu1 %v563_v0  ;;  %v571_v4 = vld [vmem:[%s763_s0] sm:$0xff]   ;;  %v569_v8 = vld [vmem:[%s762_s1 + $0x8] sm:$0xff]   ;;  %v575_v12 = vld [vmem:[%s763_s0 + $0x10] sm:$0xff]  }
   0x4   :  { %517 = vmatprep.subr.bf16.mxu0 %v564_v1  ;;  %548 = vmatprep.subr.bf16.mxu1 %v564_v1  ;;  %v572_v5 = vld [vmem:[%s763_s0 + $0x20] sm:$0xff]   ;;  %v573_v10 = vld [vmem:[%s763_s0 + $0x8] sm:$0xff]   ;;  %v576_v13 = vld [vmem:[%s763_s0 + $0x30] sm:$0xff]  }
   0x5   :  { %531 = vmatprep.mubr.bf16.mxu0 %v571_v4  ;;  %539 = vmatprep.mubr.bf16.mxu1 %v572_v5  ;;  %v570_v9 = vld [vmem:[%s762_s1] sm:$0xff]   ;;  %v574_v11 = vld [vmem:[%s763_s0 + $0x28] sm:$0xff]   ;;  %v577_v14 = vld [vmem:[%s763_s0 + $0x18] sm:$0xff]  }
   0x6   :  { %v578_v15 = vld [vmem:[%s763_s0 + $0x38] sm:$0xff]   ;;  %v482_v16 = vld [vmem:[%s764_s2] ss:$0 sm:$0xff] }
   0x7   :  { %518 = vmatpush3.bf16.msra.mxu0 %v564_v1  ;;  %556 = vmatpush3.bf16.msra.mxu1 %v564_v1 }
   0x8   :  { %519 = vmatprep.subr.bf16.mxu0 %v565_v2  ;;  %549 = vmatprep.subr.bf16.mxu1 %v565_v2 }
   0xb   :  { %520 = vmatpush3.bf16.msra.mxu0 %v565_v2  ;;  %557 = vmatpush3.bf16.msra.mxu1 %v565_v2 }
   0xc   :  { %521 = vmatprep.subr.bf16.mxu0 %v566_v3  ;;  %550 = vmatprep.subr.bf16.mxu1 %v566_v3 }
   0xf   :  { %522 = vmatpush3.bf16.msra.mxu0 %v566_v3  ;;  %558 = vmatpush3.bf16.msra.mxu1 %v566_v3 }
  0x10   :  { %523 = vmatprep.subr.bf16.mxu0 %v567_v6  ;;  %551 = vmatprep.subr.bf16.mxu1 %v567_v6 }
  0x13   :  { %524 = vmatpush3.bf16.msra.mxu0 %v567_v6  ;;  %559 = vmatpush3.bf16.msra.mxu1 %v567_v6 }
  0x14   :  { %525 = vmatprep.subr.bf16.mxu0 %v568_v7  ;;  %552 = vmatprep.subr.bf16.mxu1 %v568_v7 }
  0x17   :  { %526 = vmatpush3.bf16.msra.mxu0 %v568_v7  ;;  %560 = vmatpush3.bf16.msra.mxu1 %v568_v7 }
  0x18   :  { %527 = vmatprep.subr.bf16.mxu0 %v569_v8  ;;  %553 = vmatprep.subr.bf16.mxu1 %v569_v8 }
  0x1b   :  { %528 = vmatpush3.bf16.msra.mxu0 %v569_v8  ;;  %561 = vmatpush3.bf16.msra.mxu1 %v569_v8 }
  0x1c   :  { %529 = vmatprep.subr.bf16.mxu0 %v570_v9  ;;  %554 = vmatprep.subr.bf16.mxu1 %v570_v9 }
  0x1f   :  { %530 = vmatpush3.bf16.msra.mxu0 %v570_v9  ;;  %562 = vmatpush3.bf16.msra.mxu1 %v570_v9 }
  0x22   :  { %532 = vmatmul.mubr.bf16.vlgmr.msra.gmra.mxu0 %v573_v10  ;;  %540 = vmatmul.mubr.bf16.vlgmr.msra.gmra.mxu1 %v574_v11 }
  0x23   :  { %535 = vmatprep.mubr.bf16.mxu0 %v575_v12  ;;  %543 = vmatprep.mubr.bf16.mxu1 %v576_v13 }
  0x2a   :  { %536 = vmatmul.mubr.bf16.gmra.mxu0 %v577_v14  ;;  %544 = vmatmul.mubr.bf16.gmra.mxu1 %v578_v15 }
  0xe2   :  { %v533_v17 = vpop.f32.mrf.mxu0  ;;  %v541_v18 = vpop.f32.mrf.mxu1 }
  0xe3   :  { %v336_v19 = vadd.f32 %v533_v17, %v482_v16  ;;  %v344_v20 = vadd.f32 %v541_v18, %v482_v16 }
  0xe4   :  { %v213_v21 = vpop.f32.mrf.mxu0  ;;  %v245_v22 = vpop.f32.mrf.mxu1 }
  0xe5   :  { %v485_v23 = vmul.f32 -1.442695, %v336_v19  ;;  %v493_v24 = vmul.f32 -1.442695, %v344_v20  ;;  %v334_v25 = vadd.f32 %v482_v16, %v213_v21  ;;  %v342_v26 = vadd.f32 %v482_v16, %v245_v22 }
  0xe6   :  { %v534_v27 = vpop.f32.mrf.mxu0  ;;  %v542_v28 = vpop.f32.mrf.mxu1 }
  0xe7   :  { %579 = vpow2.f32 %v485_v23  ;;  %v483_v29 = vmul.f32 -1.442695, %v334_v25  ;;  %v491_v30 = vmul.f32 -1.442695, %v342_v26  ;;  %v337_v31 = vadd.f32 %v534_v27, %v482_v16 }
  0xe8   :  { %581 = vpow2.f32 %v493_v24  ;;  %v345_v32 = vadd.f32 %v542_v28, %v482_v16  ;;  %v216_v33 = vpop.f32.mrf.mxu0  ;;  %v248_v34 = vpop.f32.mrf.mxu1 }
  0xe9   :  { %583 = vpow2.f32 %v483_v29  ;;  %v486_v35 = vmul.f32 -1.442695, %v337_v31  ;;  %v335_v36 = vadd.f32 %v482_v16, %v216_v33  ;;  %v343_v37 = vadd.f32 %v482_v16, %v248_v34 }
  0xea   :  { %585 = vpow2.f32 %v491_v30  ;;  %v494_v38 = vmul.f32 -1.442695, %v345_v32  ;;  %v537_v39 = vpop.f32.mrf.mxu0  ;;  %v545_v40 = vpop.f32.mrf.mxu1 }
  0xeb   :  { %587 = vpow2.f32 %v486_v35  ;;  %v484_v41 = vmul.f32 -1.442695, %v335_v36  ;;  %v492_v42 = vmul.f32 -1.442695, %v343_v37  ;;  %v340_v43 = vadd.f32 %v537_v39, %v482_v16 }
  0xec   :  { %589 = vpow2.f32 %v494_v38  ;;  %v348_v44 = vadd.f32 %v545_v40, %v482_v16  ;;  %v229_v45 = vpop.f32.mrf.mxu0  ;;  %v261_v46 = vpop.f32.mrf.mxu1 }
  0xed   :  { %591 = vpow2.f32 %v484_v41  ;;  %v489_v47 = vmul.f32 -1.442695, %v340_v43  ;;  %v338_v48 = vadd.f32 %v482_v16, %v229_v45  ;;  %v346_v49 = vadd.f32 %v482_v16, %v261_v46 }
  0xee   :  { %593 = vpow2.f32 %v492_v42  ;;  %v497_v50 = vmul.f32 -1.442695, %v348_v44  ;;  %v538_v51 = vpop.f32.mrf.mxu0  ;;  %v546_v52 = vpop.f32.mrf.mxu1 }
  0xef   :  { %595 = vpow2.f32 %v489_v47  ;;  %v487_v53 = vmul.f32 -1.442695, %v338_v48  ;;  %v495_v54 = vmul.f32 -1.442695, %v346_v49  ;;  %v341_v55 = vadd.f32 %v538_v51, %v482_v16 }
  0xf0   :  { %597 = vpow2.f32 %v497_v50  ;;  %v349_v56 = vadd.f32 %v546_v52, %v482_v16  ;;  %v232_v57 = vpop.f32.mrf.mxu0  ;;  %v264_v58 = vpop.f32.mrf.mxu1 }
  0xf1   :  { %599 = vpow2.f32 %v487_v53  ;;  %v490_v59 = vmul.f32 -1.442695, %v341_v55  ;;  %v339_v60 = vadd.f32 %v482_v16, %v232_v57  ;;  %v347_v61 = vadd.f32 %v482_v16, %v264_v58 }
  0xf2   :  { %601 = vpow2.f32 %v495_v54  ;;  %v498_v62 = vmul.f32 -1.442695, %v349_v56 }
  0xf3   :  { %603 = vpow2.f32 %v490_v59  ;;  %v488_v63 = vmul.f32 -1.442695, %v339_v60  ;;  %v496_v0 = vmul.f32 -1.442695, %v347_v61 }
  0xf4   :  { %v580_v1 = vpop.eup %579  ;;  %605 = vpow2.f32 %v498_v62 }
  0xf5   :  { %v582_v2 = vpop.eup %581  ;;  %v400_v3 = vadd.f32 1.0, %v580_v1  ;;  %607 = vpow2.f32 %v488_v63 }
  0xf6   :  { %v584_v4 = vpop.eup %583  ;;  %v408_v5 = vadd.f32 1.0, %v582_v2  ;;  %609 = vpow2.f32 %v496_v0 }
  0xf7   :  { %v586_v6 = vpop.eup %585  ;;  %611 = vrcp.f32 %v400_v3  ;;  %v398_v7 = vadd.f32 1.0, %v584_v4 }
  0xf8   :  { %v588_v8 = vpop.eup %587  ;;  %613 = vrcp.f32 %v408_v5  ;;  %v406_v9 = vadd.f32 1.0, %v586_v6 }
  0xf9   :  { %v590_v10 = vpop.eup %589  ;;  %615 = vrcp.f32 %v398_v7  ;;  %v401_v11 = vadd.f32 1.0, %v588_v8 }
  0xfa   :  { %v592_v12 = vpop.eup %591  ;;  %617 = vrcp.f32 %v406_v9  ;;  %v409_v13 = vadd.f32 1.0, %v590_v10 }
  0xfb   :  { %v594_v14 = vpop.eup %593  ;;  %619 = vrcp.f32 %v401_v11  ;;  %v399_v15 = vadd.f32 1.0, %v592_v12 }
  0xfc   :  { %v596_v16 = vpop.eup %595  ;;  %621 = vrcp.f32 %v409_v13  ;;  %v407_v17 = vadd.f32 1.0, %v594_v14 }
  0xfd   :  { %v598_v18 = vpop.eup %597  ;;  %623 = vrcp.f32 %v399_v15  ;;  %v404_v19 = vadd.f32 1.0, %v596_v16 }
  0xfe   :  { %v600_v20 = vpop.eup %599  ;;  %625 = vrcp.f32 %v407_v17  ;;  %v412_v21 = vadd.f32 1.0, %v598_v18 }
  0xff   :  { %v602_v22 = vpop.eup %601  ;;  %627 = vrcp.f32 %v404_v19  ;;  %v402_v23 = vadd.f32 1.0, %v600_v20 }
 0x100   :  { %v604_v24 = vpop.eup %603  ;;  %629 = vrcp.f32 %v412_v21  ;;  %v410_v25 = vadd.f32 1.0, %v602_v22 }
 0x101   :  { %v606_v26 = vpop.eup %605  ;;  %631 = vrcp.f32 %v402_v23  ;;  %v405_v27 = vadd.f32 1.0, %v604_v24 }
 0x102   :  { %v608_v28 = vpop.eup %607  ;;  %633 = vrcp.f32 %v410_v25  ;;  %v413_v29 = vadd.f32 1.0, %v606_v26 }
 0x103   :  { %v610_v30 = vpop.eup %609  ;;  %635 = vrcp.f32 %v405_v27  ;;  %v403_v31 = vadd.f32 1.0, %v608_v28 }
 0x104   :  { %v612_v32 = vpop.eup %611  ;;  %637 = vrcp.f32 %v413_v29  ;;  %v411_v33 = vadd.f32 1.0, %v610_v30 }
 0x105   :  { %v614_v34 = vpop.eup %613  ;;  %448 = vst [vmem:[%s765_s3 + $0x10] sm:$0xff] %v612_v32  ;;  %639 = vrcp.f32 %v403_v31 }
 0x106   :  { %v616_v35 = vpop.eup %615  ;;  %456 = vst [vmem:[%s765_s3 + $0x50] sm:$0xff] %v614_v34  ;;  %641 = vrcp.f32 %v411_v33 }
 0x107   :  { %v618_v36 = vpop.eup %617  ;;  %446 = vst [vmem:[%s765_s3] sm:$0xff] %v616_v35 }
 0x108   :  { %v620_v37 = vpop.eup %619  ;;  %454 = vst [vmem:[%s765_s3 + $0x40] sm:$0xff] %v618_v36 }
 0x109   :  { %v622_v38 = vpop.eup %621  ;;  %449 = vst [vmem:[%s765_s3 + $0x18] sm:$0xff] %v620_v37 }
 0x10a   :  { %v624_v39 = vpop.eup %623  ;;  %457 = vst [vmem:[%s765_s3 + $0x58] sm:$0xff] %v622_v38 }
 0x10b   :  { %v626_v40 = vpop.eup %625  ;;  %447 = vst [vmem:[%s765_s3 + $0x8] sm:$0xff] %v624_v39 }
 0x10c   :  { %v628_v41 = vpop.eup %627  ;;  %455 = vst [vmem:[%s765_s3 + $0x48] sm:$0xff] %v626_v40 }
 0x10d   :  { %v630_v42 = vpop.eup %629  ;;  %452 = vst [vmem:[%s765_s3 + $0x30] sm:$0xff] %v628_v41 }
 0x10e   :  { %v632_v43 = vpop.eup %631  ;;  %460 = vst [vmem:[%s765_s3 + $0x70] sm:$0xff] %v630_v42 }
 0x10f   :  { %v634_v44 = vpop.eup %633  ;;  %450 = vst [vmem:[%s765_s3 + $0x20] sm:$0xff] %v632_v43 }
 0x110   :  { %v636_v45 = vpop.eup %635  ;;  %458 = vst [vmem:[%s765_s3 + $0x60] sm:$0xff] %v634_v44 }
 0x111   :  { %v638_v46 = vpop.eup %637  ;;  %453 = vst [vmem:[%s765_s3 + $0x38] sm:$0xff] %v636_v45 }
 0x112   :  { %v640_v47 = vpop.eup %639  ;;  %461 = vst [vmem:[%s765_s3 + $0x78] sm:$0xff] %v638_v46 }
 0x113   :  { %v642_v48 = vpop.eup %641  ;;  %451 = vst [vmem:[%s765_s3 + $0x28] sm:$0xff] %v640_v47 }
 0x114   :  { %459 = vst [vmem:[%s765_s3 + $0x68] sm:$0xff] %v642_v48 }

</bundles_post_ra>
